<compile_context>
chip_gen: v7x
topology: tpu7x:2x2x1
jax: 0.10.0
libtpu: 0.0.40
codegen_flags: <defaults>
</compile_context>

<pallas_src>
import jax
import jax.numpy as jnp
from jax.experimental import pallas as pl
from jax.experimental.pallas import tpu as pltpu


# ---------------------------------------------------------------------------
# small helpers
# ---------------------------------------------------------------------------
def _round_up(x, m):
    return ((x + m - 1) // m) * m


def _pick_rows_tile(m, max_tile):
    """Largest multiple-of-8 divisor of m that is <= max_tile (or m itself)."""
    if m <= max_tile:
        return m
    t = (max_tile // 8) * 8
    while t >= 8:
        if m % t == 0:
            return t
        t -= 8
    return m  # fall back to a single full block


# ---------------------------------------------------------------------------
# im2col (bf16) — plain 3x3/pad=1 and the 2x2-pool-tap variant
# ---------------------------------------------------------------------------
def _im2col_3x3(x):
    """x: (B,H,W,C) f32 -> (B*H*W, 9*C) bf16, taps ordered (dh, dw, c)."""
    B, H, W, C = x.shape
    xp = jnp.pad(x.astype(jnp.bfloat16), ((0, 0), (1, 1), (1, 1), (0, 0)))
    patches = [xp[:, dh:dh + H, dw:dw + W, :]
               for dh in range(3) for dw in range(3)]
    return jnp.concatenate(patches, axis=-1).reshape(B * H * W, 9 * C)


def _im2col_pool_taps(x):
    """Four pool-tap im2col matrices for fused conv+relu+maxpool2x2.

    tap[q] row (b,i,j) is the 3x3 patch centered at conv position
    (2i+qh, 2j+qw).  Each returns (B*(H//2)*(W//2), 9*C) bf16.
    """
    B, H, W, C = x.shape
    xp = jnp.pad(x.astype(jnp.bfloat16), ((0, 0), (1, 1), (1, 1), (0, 0)))
    taps = []
    for qh in range(2):
        for qw in range(2):
            patches = []
            for dh in range(3):
                for dw in range(3):
                    r0 = qh + dh
                    c0 = qw + dw
                    patches.append(
                        xp[:, r0:r0 + H - 1:2, c0:c0 + W - 1:2, :])
            t = jnp.concatenate(patches, axis=-1)      # (B, H/2, W/2, 9C)
            taps.append(t.reshape(B * (H // 2) * (W // 2), 9 * C))
    return taps


# ---------------------------------------------------------------------------
# Kernel 1: fused 3x3 conv + bias + ReLU + global average pool  (rgb stem)
# ---------------------------------------------------------------------------
def conv3x3_relu_gap(x, w, b, *, max_rows=1024):
    """x: (B,H,W,Cin) NHWC; w: (3,3,Cin,Cout); b: (Cout,) -> (B, Cout)."""
    B, H, W, Cin = x.shape
    Cout = w.shape[-1]
    K = 9 * Cin
    cols = _im2col_3x3(x)                               # (B*H*W, K) bf16
    tile = _pick_rows_tile(H * W, max_rows)
    S = (H * W) // tile
    wm = w.reshape(K, Cout).astype(jnp.bfloat16)
    b2 = b.reshape(1, Cout).astype(jnp.float32)
    inv_hw = 1.0 / float(H * W)

    def kernel(x_ref, w_ref, b_ref, o_ref, acc_ref):
        s = pl.program_id(1)

        @pl.when(s == 0)
        def _():
            acc_ref[...] = jnp.zeros_like(acc_ref)

        y = jnp.dot(x_ref[...], w_ref[...], preferred_element_type=jnp.float32)
        y = jnp.maximum(y + b_ref[...], 0.0)
        acc_ref[...] += jnp.sum(y, axis=0, keepdims=True)

        @pl.when(s == pl.num_programs(1) - 1)
        def _():
            o_ref[...] = (acc_ref[...] * inv_hw).reshape(1, 1, Cout)

    out = pl.pallas_call(
        kernel,
        out_shape=jax.ShapeDtypeStruct((B, 1, Cout), jnp.float32),
        grid=(B, S),
        in_specs=[
            pl.BlockSpec((tile, K), lambda bb, s: (bb * S + s, 0)),
            pl.BlockSpec((K, Cout), lambda bb, s: (0, 0)),
            pl.BlockSpec((1, Cout), lambda bb, s: (0, 0)),
        ],
        out_specs=pl.BlockSpec((1, 1, Cout), lambda bb, s: (bb, 0, 0)),
        scratch_shapes=[pltpu.VMEM((1, Cout), jnp.float32)],
        compiler_params=pltpu.CompilerParams(
            dimension_semantics=("parallel", "arbitrary")),
    )(cols, wm, b2)
    return out.reshape(B, Cout)


# ---------------------------------------------------------------------------
# Kernel 2: fused 3x3 conv + bias + ReLU + 2x2 maxpool  (dsm branch)
# ---------------------------------------------------------------------------
def conv3x3_relu_maxpool(x, w, b, *, max_rows=1024):
    """x: (B,H,W,Cin) NHWC; w: (3,3,Cin,Cout); b: (Cout,) -> (B,H/2,W/2,Cout)."""
    B, H, W, Cin = x.shape
    Cout = w.shape[-1]
    K = 9 * Cin
    taps = _im2col_pool_taps(x)                         # 4 x (M, K) bf16
    M = B * (H // 2) * (W // 2)
    tm = _pick_rows_tile(M, max_rows)
    wm = w.reshape(K, Cout).astype(jnp.bfloat16)
    b2 = b.reshape(1, Cout).astype(jnp.float32)

    def kernel(t00, t01, t10, t11, w_ref, bias_ref, o_ref):
        def tap(r):
            y = jnp.dot(r[...], w_ref[...],
                        preferred_element_type=jnp.float32)
            return jnp.maximum(y + bias_ref[...], 0.0)   # ReLU(conv)
        # max(ReLU(.)) == ReLU(max(.)) — matches Conv->ReLU->MaxPool2
        o_ref[...] = jnp.maximum(jnp.maximum(tap(t00), tap(t01)),
                                 jnp.maximum(tap(t10), tap(t11)))

    out = pl.pallas_call(
        kernel,
        out_shape=jax.ShapeDtypeStruct((M, Cout), jnp.float32),
        grid=(M // tm,),
        in_specs=[pl.BlockSpec((tm, K), lambda i: (i, 0))] * 4
                 + [pl.BlockSpec((K, Cout), lambda i: (0, 0)),
                    pl.BlockSpec((1, Cout), lambda i: (0, 0))],
        out_specs=pl.BlockSpec((tm, Cout), lambda i: (i, 0)),
        compiler_params=pltpu.CompilerParams(
            dimension_semantics=("parallel",)),
    )(*taps, wm, b2)
    return out.reshape(B, H // 2, W // 2, Cout)


# ---------------------------------------------------------------------------
# Kernel 3: fused classification head  fc1(K-tiled)+ReLU -> fc2+ReLU -> fc3
# ---------------------------------------------------------------------------
def pallas_head(x, w1, b1, w2, b2, w3, b3):
    """x: (B, F) -> (B, 2).  Dropout layers are inference-mode identities."""
    M, K = x.shape
    N1 = w1.shape[1]
    N2 = w2.shape[1]
    N3 = w3.shape[1]

    # K tiling (reduction axis of fc1) — multiple of 128, padded with zeros.
    tk = 2048 if K >= 2048 else _round_up(K, 128)
    Kp = _round_up(K, tk)
    # M tiling — full block for small batch, 256-row multiple-of-8 tiles else.
    if M <= 256:
        tm, Mp = M, M
    else:
        tm, Mp = 256, _round_up(M, 256)

    xp = jnp.pad(x.astype(jnp.bfloat16), ((0, Mp - M), (0, Kp - K)))
    w1p = jnp.pad(w1.astype(jnp.bfloat16), ((0, Kp - K), (0, 0)))
    w2b = w2.astype(jnp.bfloat16)
    w3b = w3.astype(jnp.bfloat16)
    b1f = b1.reshape(1, N1).astype(jnp.float32)
    b2f = b2.reshape(1, N2).astype(jnp.float32)
    b3f = b3.reshape(1, N3).astype(jnp.float32)

    def kernel(x_ref, w1_ref, b1_ref, w2_ref, b2_ref, w3_ref, b3_ref,
               o_ref, acc_ref):
        k = pl.program_id(1)

        @pl.when(k == 0)
        def _():
            acc_ref[...] = jnp.zeros_like(acc_ref)

        acc_ref[...] += jnp.dot(x_ref[...], w1_ref[...],
                                preferred_element_type=jnp.float32)

        @pl.when(k == pl.num_programs(1) - 1)
        def _():
            h = jnp.maximum(acc_ref[...] + b1_ref[...], 0.0)        # fc1+ReLU
            h = jnp.dot(h.astype(jnp.bfloat16), w2_ref[...],
                        preferred_element_type=jnp.float32) + b2_ref[...]
            h = jnp.maximum(h, 0.0)                                 # fc2+ReLU
            o_ref[...] = jnp.dot(h.astype(jnp.bfloat16), w3_ref[...],
                                 preferred_element_type=jnp.float32) \
                         + b3_ref[...]                              # fc3

    out = pl.pallas_call(
        kernel,
        out_shape=jax.ShapeDtypeStruct((Mp, N3), jnp.float32),
        grid=(Mp // tm, Kp // tk),
        in_specs=[
            pl.BlockSpec((tm, tk), lambda i, k: (i, k)),
            pl.BlockSpec((tk, N1), lambda i, k: (k, 0)),
            pl.BlockSpec((1, N1), lambda i, k: (0, 0)),
            pl.BlockSpec((N1, N2), lambda i, k: (0, 0)),
            pl.BlockSpec((1, N2), lambda i, k: (0, 0)),
            pl.BlockSpec((N2, N3), lambda i, k: (0, 0)),
            pl.BlockSpec((1, N3), lambda i, k: (0, 0)),
        ],
        out_specs=pl.BlockSpec((tm, N3), lambda i, k: (i, 0)),
        scratch_shapes=[pltpu.VMEM((tm, N1), jnp.float32)],
        compiler_params=pltpu.CompilerParams(
            dimension_semantics=("parallel", "arbitrary")),
    )(xp, w1p, b1f, w2b, b2f, w3b, b3f)
    return out[:M]


# ---------------------------------------------------------------------------
# Parameters (deterministic synthetic init)
# ---------------------------------------------------------------------------
def init_params(key, feature_size):
    ks = jax.random.split(key, 16)
    s = 0.05

    def w(k, shape):
        return jax.random.normal(k, shape, jnp.float32) * s

    return {
        # stand-in for timm mobilevitv2_100 (num_features = 512)
        "rgb_stem_w": w(ks[0], (3, 3, 3, 512)),
        "rgb_stem_b": w(ks[1], (512,)),
        # dsm_conv: Conv2d(1,16,3,p=1) ReLU MaxPool2 Conv2d(16,32,3,p=1) ReLU MaxPool2
        "dsm_w1": w(ks[2], (3, 3, 1, 16)),
        "dsm_b1": w(ks[3], (16,)),
        "dsm_w2": w(ks[4], (3, 3, 16, 32)),
        "dsm_b2": w(ks[5], (32,)),
        # trait_fc: Linear(1, 16) + ReLU
        "trait_w": w(ks[6], (1, 16)),
        "trait_b": w(ks[7], (16,)),
        # head: Linear(F,512) ReLU Drop Linear(512,256) ReLU Drop Linear(256,2)
        "fc1_w": w(ks[8], (feature_size, 512)),
        "fc1_b": w(ks[9], (512,)),
        "fc2_w": w(ks[10], (512, 256)),
        "fc2_b": w(ks[11], (256,)),
        "fc3_w": w(ks[12], (256, 2)),
        "fc3_b": w(ks[13], (2,)),
    }


# ---------------------------------------------------------------------------
# Forward pass
# ---------------------------------------------------------------------------
@jax.jit
def forward(params, rgb_nchw, dsm_nchw, extra_input):
    B = rgb_nchw.shape[0]

    # NCHW -> NHWC
    rgb = jnp.transpose(rgb_nchw, (0, 2, 3, 1)).astype(jnp.float32)
    dsm = jnp.transpose(dsm_nchw, (0, 2, 3, 1)).astype(jnp.float32)

    # --- rgb branch: stand-in backbone, conv stem + ReLU + fused GAP -> (B,512)
    rgb_feat = conv3x3_relu_gap(rgb, params["rgb_stem_w"], params["rgb_stem_b"])

    # --- dsm branch: two fused conv+ReLU+maxpool2 stages -> (B, H/4, W/4, 32)
    d = conv3x3_relu_maxpool(dsm, params["dsm_w1"], params["dsm_b1"])
    d = conv3x3_relu_maxpool(d, params["dsm_w2"], params["dsm_b2"])
    # torch.flatten on NCHW is channel-major -> transpose back first
    dsm_feat = jnp.transpose(d, (0, 3, 1, 2)).reshape(B, -1)

    # --- extra (trait) branch: 2x1x16 matmul, plain XLA per perf review
    extra = extra_input.reshape(-1, 1).astype(jnp.float32)
    extra_feat = jnp.maximum(extra @ params["trait_w"] + params["trait_b"], 0.0)

    # --- concat + fused head (dropout = identity at inference)
    combined = jnp.concatenate([rgb_feat, dsm_feat, extra_feat], axis=1)
    return pallas_head(combined,
                       params["fc1_w"], params["fc1_b"],
                       params["fc2_w"], params["fc2_b"],
                       params["fc3_w"], params["fc3_b"])          # (B, 2)


# ---------------------------------------------------------------------------
# Main
# ---------------------------------------------------------------------------
if __name__ == "__main__":
    key = jax.random.PRNGKey(0)
    k_rgb, k_dsm, k_extra, k_params = jax.random.split(key, 4)

    B, H, W = 2, 16, 32  # small stand-in for the module's 256x512 inputs
    rgb = jax.random.normal(k_rgb, (B, 3, H, W), jnp.float32)     # NCHW
    dsm = jax.random.normal(k_dsm, (B, 1, H, W), jnp.float32)     # NCHW
    extra_input = jax.random.normal(k_extra, (B, 1), jnp.float32)

    # feature_size = rgb(512) + dsm(32 * H/4 * W/4) + extra(16)
    feature_size = 512 + 32 * (H // 4) * (W // 4) + 16
    params = init_params(k_params, feature_size)

    out = forward(params, rgb, dsm, extra_input)
    out = jax.block_until_ready(out)
    assert out.shape == (B, 2), out.shape
    assert out.dtype == jnp.float32
    print("KERNEL_OK")
</pallas_src>

<mosaic_0001>
module attributes {stable_mosaic.version = 11 : i64} {
  func.func @kernel(%arg0: i32, %arg1: memref<256x9xbf16, #tpu.memory_space<vmem>>, %arg2: memref<256x9xbf16, #tpu.memory_space<vmem>>, %arg3: memref<256x9xbf16, #tpu.memory_space<vmem>>, %arg4: memref<256x9xbf16, #tpu.memory_space<vmem>>, %arg5: memref<9x16xbf16, #tpu.memory_space<vmem>>, %arg6: memref<1x16xf32, #tpu.memory_space<vmem>>, %arg7: memref<256x16xf32, #tpu.memory_space<vmem>>) attributes {dimension_semantics = [#tpu.dimension_semantics<parallel>], iteration_bounds = array<i64: 1>, scalar_prefetch = 0 : i64, scratch_operands = 0 : i64, tpu.core_type = #tpu.core_type<tc>, window_params = [{transform_indices = @transform_0, window_bounds = array<i64: 256, 9>}, {transform_indices = @transform_1, window_bounds = array<i64: 256, 9>}, {transform_indices = @transform_2, window_bounds = array<i64: 256, 9>}, {transform_indices = @transform_3, window_bounds = array<i64: 256, 9>}, {pipeline_mode = #tpu.pipeline_mode<synchronous>, transform_indices = @transform_4, window_bounds = array<i64: 9, 16>}, {pipeline_mode = #tpu.pipeline_mode<synchronous>, transform_indices = @transform_5, window_bounds = array<i64: 1, 16>}, {transform_indices = @transform_6, window_bounds = array<i64: 256, 16>}]} {
    %c0 = arith.constant 0 : index
    %c0_0 = arith.constant 0 : index
    %0 = vector.load %arg1[%c0, %c0_0] : memref<256x9xbf16, #tpu.memory_space<vmem>>, vector<256x9xbf16>
    %c0_1 = arith.constant 0 : index
    %c0_2 = arith.constant 0 : index
    %1 = vector.load %arg5[%c0_1, %c0_2] : memref<9x16xbf16, #tpu.memory_space<vmem>>, vector<9x16xbf16>
    %cst = arith.constant dense<0.000000e+00> : vector<256x16xf32>
    %2 = tpu.matmul %0, %1, %cst {dimension_numbers = #tpu.dot_dimension_numbers<[1], [0], [0], [1], [0, 0, 1, 1], [], []>} : vector<256x9xbf16>, vector<9x16xbf16>, vector<256x16xf32> -> vector<256x16xf32>
    %c0_3 = arith.constant 0 : index
    %c0_4 = arith.constant 0 : index
    %3 = vector.load %arg6[%c0_3, %c0_4] : memref<1x16xf32, #tpu.memory_space<vmem>>, vector<1x16xf32>
    %4 = vector.broadcast %3 : vector<1x16xf32> to vector<256x16xf32>
    %5 = arith.addf %2, %4 : vector<256x16xf32>
    %cst_5 = arith.constant 0.000000e+00 : f32
    %6 = vector.broadcast %cst_5 : f32 to vector<256x16xf32>
    %7 = arith.maximumf %5, %6 : vector<256x16xf32>
    %c0_6 = arith.constant 0 : index
    %c0_7 = arith.constant 0 : index
    %8 = vector.load %arg2[%c0_6, %c0_7] : memref<256x9xbf16, #tpu.memory_space<vmem>>, vector<256x9xbf16>
    %c0_8 = arith.constant 0 : index
    %c0_9 = arith.constant 0 : index
    %9 = vector.load %arg5[%c0_8, %c0_9] : memref<9x16xbf16, #tpu.memory_space<vmem>>, vector<9x16xbf16>
    %cst_10 = arith.constant dense<0.000000e+00> : vector<256x16xf32>
    %10 = tpu.matmul %8, %9, %cst_10 {dimension_numbers = #tpu.dot_dimension_numbers<[1], [0], [0], [1], [0, 0, 1, 1], [], []>} : vector<256x9xbf16>, vector<9x16xbf16>, vector<256x16xf32> -> vector<256x16xf32>
    %c0_11 = arith.constant 0 : index
    %c0_12 = arith.constant 0 : index
    %11 = vector.load %arg6[%c0_11, %c0_12] : memref<1x16xf32, #tpu.memory_space<vmem>>, vector<1x16xf32>
    %12 = vector.broadcast %11 : vector<1x16xf32> to vector<256x16xf32>
    %13 = arith.addf %10, %12 : vector<256x16xf32>
    %cst_13 = arith.constant 0.000000e+00 : f32
    %14 = vector.broadcast %cst_13 : f32 to vector<256x16xf32>
    %15 = arith.maximumf %13, %14 : vector<256x16xf32>
    %16 = arith.maximumf %7, %15 : vector<256x16xf32>
    %c0_14 = arith.constant 0 : index
    %c0_15 = arith.constant 0 : index
    %17 = vector.load %arg3[%c0_14, %c0_15] : memref<256x9xbf16, #tpu.memory_space<vmem>>, vector<256x9xbf16>
    %c0_16 = arith.constant 0 : index
    %c0_17 = arith.constant 0 : index
    %18 = vector.load %arg5[%c0_16, %c0_17] : memref<9x16xbf16, #tpu.memory_space<vmem>>, vector<9x16xbf16>
    %cst_18 = arith.constant dense<0.000000e+00> : vector<256x16xf32>
    %19 = tpu.matmul %17, %18, %cst_18 {dimension_numbers = #tpu.dot_dimension_numbers<[1], [0], [0], [1], [0, 0, 1, 1], [], []>} : vector<256x9xbf16>, vector<9x16xbf16>, vector<256x16xf32> -> vector<256x16xf32>
    %c0_19 = arith.constant 0 : index
    %c0_20 = arith.constant 0 : index
    %20 = vector.load %arg6[%c0_19, %c0_20] : memref<1x16xf32, #tpu.memory_space<vmem>>, vector<1x16xf32>
    %21 = vector.broadcast %20 : vector<1x16xf32> to vector<256x16xf32>
    %22 = arith.addf %19, %21 : vector<256x16xf32>
    %cst_21 = arith.constant 0.000000e+00 : f32
    %23 = vector.broadcast %cst_21 : f32 to vector<256x16xf32>
    %24 = arith.maximumf %22, %23 : vector<256x16xf32>
    %c0_22 = arith.constant 0 : index
    %c0_23 = arith.constant 0 : index
    %25 = vector.load %arg4[%c0_22, %c0_23] : memref<256x9xbf16, #tpu.memory_space<vmem>>, vector<256x9xbf16>
    %c0_24 = arith.constant 0 : index
    %c0_25 = arith.constant 0 : index
    %26 = vector.load %arg5[%c0_24, %c0_25] : memref<9x16xbf16, #tpu.memory_space<vmem>>, vector<9x16xbf16>
    %cst_26 = arith.constant dense<0.000000e+00> : vector<256x16xf32>
    %27 = tpu.matmul %25, %26, %cst_26 {dimension_numbers = #tpu.dot_dimension_numbers<[1], [0], [0], [1], [0, 0, 1, 1], [], []>} : vector<256x9xbf16>, vector<9x16xbf16>, vector<256x16xf32> -> vector<256x16xf32>
    %c0_27 = arith.constant 0 : index
    %c0_28 = arith.constant 0 : index
    %28 = vector.load %arg6[%c0_27, %c0_28] : memref<1x16xf32, #tpu.memory_space<vmem>>, vector<1x16xf32>
    %29 = vector.broadcast %28 : vector<1x16xf32> to vector<256x16xf32>
    %30 = arith.addf %27, %29 : vector<256x16xf32>
    %cst_29 = arith.constant 0.000000e+00 : f32
    %31 = vector.broadcast %cst_29 : f32 to vector<256x16xf32>
    %32 = arith.maximumf %30, %31 : vector<256x16xf32>
    %33 = arith.maximumf %24, %32 : vector<256x16xf32>
    %34 = arith.maximumf %16, %33 : vector<256x16xf32>
    %c0_30 = arith.constant 0 : index
    %c0_31 = arith.constant 0 : index
    %35 = vector.load %arg7[%c0_30, %c0_31] : memref<256x16xf32, #tpu.memory_space<vmem>>, vector<256x16xf32>
    tpu.vector_store %arg7[%c0_30, %c0_31], %34 {strides = array<i32>} : memref<256x16xf32, #tpu.memory_space<vmem>>, vector<256x16xf32>,
    return
  }
  func.func @transform_0(%arg0: i32) -> (i32, i32) {
    %c0_i32 = arith.constant 0 : i32
    %c0_i32_0 = arith.constant 0 : i32
    return %arg0, %c0_i32 : i32, i32
  }
  func.func @transform_1(%arg0: i32) -> (i32, i32) {
    %c0_i32 = arith.constant 0 : i32
    %c0_i32_0 = arith.constant 0 : i32
    return %arg0, %c0_i32 : i32, i32
  }
  func.func @transform_2(%arg0: i32) -> (i32, i32) {
    %c0_i32 = arith.constant 0 : i32
    %c0_i32_0 = arith.constant 0 : i32
    return %arg0, %c0_i32 : i32, i32
  }
  func.func @transform_3(%arg0: i32) -> (i32, i32) {
    %c0_i32 = arith.constant 0 : i32
    %c0_i32_0 = arith.constant 0 : i32
    return %arg0, %c0_i32 : i32, i32
  }
  func.func @transform_4(%arg0: i32) -> (i32, i32) {
    %c0_i32 = arith.constant 0 : i32
    %c0_i32_0 = arith.constant 0 : i32
    %c0_i32_1 = arith.constant 0 : i32
    return %c0_i32, %c0_i32_0 : i32, i32
  }
  func.func @transform_5(%arg0: i32) -> (i32, i32) {
    %c0_i32 = arith.constant 0 : i32
    %c0_i32_0 = arith.constant 0 : i32
    %c0_i32_1 = arith.constant 0 : i32
    return %c0_i32, %c0_i32_0 : i32, i32
  }
  func.func @transform_6(%arg0: i32) -> (i32, i32) {
    %c0_i32 = arith.constant 0 : i32
    %c0_i32_0 = arith.constant 0 : i32
    return %arg0, %c0_i32 : i32, i32
  }
}

module attributes {stable_mosaic.version = 11 : i64} {
  func.func @kernel(%arg0: i32, %arg1: memref<64x144xbf16, #tpu.memory_space<vmem>>, %arg2: memref<64x144xbf16, #tpu.memory_space<vmem>>, %arg3: memref<64x144xbf16, #tpu.memory_space<vmem>>, %arg4: memref<64x144xbf16, #tpu.memory_space<vmem>>, %arg5: memref<144x32xbf16, #tpu.memory_space<vmem>>, %arg6: memref<1x32xf32, #tpu.memory_space<vmem>>, %arg7: memref<64x32xf32, #tpu.memory_space<vmem>>) attributes {dimension_semantics = [#tpu.dimension_semantics<parallel>], iteration_bounds = array<i64: 1>, scalar_prefetch = 0 : i64, scratch_operands = 0 : i64, tpu.core_type = #tpu.core_type<tc>, window_params = [{transform_indices = @transform_0, window_bounds = array<i64: 64, 144>}, {transform_indices = @transform_1, window_bounds = array<i64: 64, 144>}, {transform_indices = @transform_2, window_bounds = array<i64: 64, 144>}, {transform_indices = @transform_3, window_bounds = array<i64: 64, 144>}, {pipeline_mode = #tpu.pipeline_mode<synchronous>, transform_indices = @transform_4, window_bounds = array<i64: 144, 32>}, {pipeline_mode = #tpu.pipeline_mode<synchronous>, transform_indices = @transform_5, window_bounds = array<i64: 1, 32>}, {transform_indices = @transform_6, window_bounds = array<i64: 64, 32>}]} {
    %c0 = arith.constant 0 : index
    %c0_0 = arith.constant 0 : index
    %0 = vector.load %arg1[%c0, %c0_0] : memref<64x144xbf16, #tpu.memory_space<vmem>>, vector<64x144xbf16>
    %c0_1 = arith.constant 0 : index
    %c0_2 = arith.constant 0 : index
    %1 = vector.load %arg5[%c0_1, %c0_2] : memref<144x32xbf16, #tpu.memory_space<vmem>>, vector<144x32xbf16>
    %cst = arith.constant dense<0.000000e+00> : vector<64x32xf32>
    %2 = tpu.matmul %0, %1, %cst {dimension_numbers = #tpu.dot_dimension_numbers<[1], [0], [0], [1], [0, 0, 1, 1], [], []>} : vector<64x144xbf16>, vector<144x32xbf16>, vector<64x32xf32> -> vector<64x32xf32>
    %c0_3 = arith.constant 0 : index
    %c0_4 = arith.constant 0 : index
    %3 = vector.load %arg6[%c0_3, %c0_4] : memref<1x32xf32, #tpu.memory_space<vmem>>, vector<1x32xf32>
    %4 = vector.broadcast %3 : vector<1x32xf32> to vector<64x32xf32>
    %5 = arith.addf %2, %4 : vector<64x32xf32>
    %cst_5 = arith.constant 0.000000e+00 : f32
    %6 = vector.broadcast %cst_5 : f32 to vector<64x32xf32>
    %7 = arith.maximumf %5, %6 : vector<64x32xf32>
    %c0_6 = arith.constant 0 : index
    %c0_7 = arith.constant 0 : index
    %8 = vector.load %arg2[%c0_6, %c0_7] : memref<64x144xbf16, #tpu.memory_space<vmem>>, vector<64x144xbf16>
    %c0_8 = arith.constant 0 : index
    %c0_9 = arith.constant 0 : index
    %9 = vector.load %arg5[%c0_8, %c0_9] : memref<144x32xbf16, #tpu.memory_space<vmem>>, vector<144x32xbf16>
    %cst_10 = arith.constant dense<0.000000e+00> : vector<64x32xf32>
    %10 = tpu.matmul %8, %9, %cst_10 {dimension_numbers = #tpu.dot_dimension_numbers<[1], [0], [0], [1], [0, 0, 1, 1], [], []>} : vector<64x144xbf16>, vector<144x32xbf16>, vector<64x32xf32> -> vector<64x32xf32>
    %c0_11 = arith.constant 0 : index
    %c0_12 = arith.constant 0 : index
    %11 = vector.load %arg6[%c0_11, %c0_12] : memref<1x32xf32, #tpu.memory_space<vmem>>, vector<1x32xf32>
    %12 = vector.broadcast %11 : vector<1x32xf32> to vector<64x32xf32>
    %13 = arith.addf %10, %12 : vector<64x32xf32>
    %cst_13 = arith.constant 0.000000e+00 : f32
    %14 = vector.broadcast %cst_13 : f32 to vector<64x32xf32>
    %15 = arith.maximumf %13, %14 : vector<64x32xf32>
    %16 = arith.maximumf %7, %15 : vector<64x32xf32>
    %c0_14 = arith.constant 0 : index
    %c0_15 = arith.constant 0 : index
    %17 = vector.load %arg3[%c0_14, %c0_15] : memref<64x144xbf16, #tpu.memory_space<vmem>>, vector<64x144xbf16>
    %c0_16 = arith.constant 0 : index
    %c0_17 = arith.constant 0 : index
    %18 = vector.load %arg5[%c0_16, %c0_17] : memref<144x32xbf16, #tpu.memory_space<vmem>>, vector<144x32xbf16>
    %cst_18 = arith.constant dense<0.000000e+00> : vector<64x32xf32>
    %19 = tpu.matmul %17, %18, %cst_18 {dimension_numbers = #tpu.dot_dimension_numbers<[1], [0], [0], [1], [0, 0, 1, 1], [], []>} : vector<64x144xbf16>, vector<144x32xbf16>, vector<64x32xf32> -> vector<64x32xf32>
    %c0_19 = arith.constant 0 : index
    %c0_20 = arith.constant 0 : index
    %20 = vector.load %arg6[%c0_19, %c0_20] : memref<1x32xf32, #tpu.memory_space<vmem>>, vector<1x32xf32>
    %21 = vector.broadcast %20 : vector<1x32xf32> to vector<64x32xf32>
    %22 = arith.addf %19, %21 : vector<64x32xf32>
    %cst_21 = arith.constant 0.000000e+00 : f32
    %23 = vector.broadcast %cst_21 : f32 to vector<64x32xf32>
    %24 = arith.maximumf %22, %23 : vector<64x32xf32>
    %c0_22 = arith.constant 0 : index
    %c0_23 = arith.constant 0 : index
    %25 = vector.load %arg4[%c0_22, %c0_23] : memref<64x144xbf16, #tpu.memory_space<vmem>>, vector<64x144xbf16>
    %c0_24 = arith.constant 0 : index
    %c0_25 = arith.constant 0 : index
    %26 = vector.load %arg5[%c0_24, %c0_25] : memref<144x32xbf16, #tpu.memory_space<vmem>>, vector<144x32xbf16>
    %cst_26 = arith.constant dense<0.000000e+00> : vector<64x32xf32>
    %27 = tpu.matmul %25, %26, %cst_26 {dimension_numbers = #tpu.dot_dimension_numbers<[1], [0], [0], [1], [0, 0, 1, 1], [], []>} : vector<64x144xbf16>, vector<144x32xbf16>, vector<64x32xf32> -> vector<64x32xf32>
    %c0_27 = arith.constant 0 : index
    %c0_28 = arith.constant 0 : index
    %28 = vector.load %arg6[%c0_27, %c0_28] : memref<1x32xf32, #tpu.memory_space<vmem>>, vector<1x32xf32>
    %29 = vector.broadcast %28 : vector<1x32xf32> to vector<64x32xf32>
    %30 = arith.addf %27, %29 : vector<64x32xf32>
    %cst_29 = arith.constant 0.000000e+00 : f32
    %31 = vector.broadcast %cst_29 : f32 to vector<64x32xf32>
    %32 = arith.maximumf %30, %31 : vector<64x32xf32>
    %33 = arith.maximumf %24, %32 : vector<64x32xf32>
    %34 = arith.maximumf %16, %33 : vector<64x32xf32>
    %c0_30 = arith.constant 0 : index
    %c0_31 = arith.constant 0 : index
    %35 = vector.load %arg7[%c0_30, %c0_31] : memref<64x32xf32, #tpu.memory_space<vmem>>, vector<64x32xf32>
    tpu.vector_store %arg7[%c0_30, %c0_31], %34 {strides = array<i32>} : memref<64x32xf32, #tpu.memory_space<vmem>>, vector<64x32xf32>,
    return
  }
  func.func @transform_0(%arg0: i32) -> (i32, i32) {
    %c0_i32 = arith.constant 0 : i32
    %c0_i32_0 = arith.constant 0 : i32
    return %arg0, %c0_i32 : i32, i32
  }
  func.func @transform_1(%arg0: i32) -> (i32, i32) {
    %c0_i32 = arith.constant 0 : i32
    %c0_i32_0 = arith.constant 0 : i32
    return %arg0, %c0_i32 : i32, i32
  }
  func.func @transform_2(%arg0: i32) -> (i32, i32) {
    %c0_i32 = arith.constant 0 : i32
    %c0_i32_0 = arith.constant 0 : i32
    return %arg0, %c0_i32 : i32, i32
  }
  func.func @transform_3(%arg0: i32) -> (i32, i32) {
    %c0_i32 = arith.constant 0 : i32
    %c0_i32_0 = arith.constant 0 : i32
    return %arg0, %c0_i32 : i32, i32
  }
  func.func @transform_4(%arg0: i32) -> (i32, i32) {
    %c0_i32 = arith.constant 0 : i32
    %c0_i32_0 = arith.constant 0 : i32
    %c0_i32_1 = arith.constant 0 : i32
    return %c0_i32, %c0_i32_0 : i32, i32
  }
  func.func @transform_5(%arg0: i32) -> (i32, i32) {
    %c0_i32 = arith.constant 0 : i32
    %c0_i32_0 = arith.constant 0 : i32
    %c0_i32_1 = arith.constant 0 : i32
    return %c0_i32, %c0_i32_0 : i32, i32
  }
  func.func @transform_6(%arg0: i32) -> (i32, i32) {
    %c0_i32 = arith.constant 0 : i32
    %c0_i32_0 = arith.constant 0 : i32
    return %arg0, %c0_i32 : i32, i32
  }
}

module attributes {stable_mosaic.version = 11 : i64} {
  func.func @kernel(%arg0: i32, %arg1: i32, %arg2: memref<512x27xbf16, #tpu.memory_space<vmem>>, %arg3: memref<27x512xbf16, #tpu.memory_space<vmem>>, %arg4: memref<1x512xf32, #tpu.memory_space<vmem>>, %arg5: memref<1x1x512xf32, #tpu.memory_space<vmem>>, %arg6: memref<1x512xf32, #tpu.memory_space<vmem>>) attributes {dimension_semantics = [#tpu.dimension_semantics<parallel>, #tpu.dimension_semantics<arbitrary>], iteration_bounds = array<i64: 2, 1>, scalar_prefetch = 0 : i64, scratch_operands = 1 : i64, tpu.core_type = #tpu.core_type<tc>, window_params = [{transform_indices = @transform_0, window_bounds = array<i64: 512, 27>}, {pipeline_mode = #tpu.pipeline_mode<synchronous>, transform_indices = @transform_1, window_bounds = array<i64: 27, 512>}, {pipeline_mode = #tpu.pipeline_mode<synchronous>, transform_indices = @transform_2, window_bounds = array<i64: 1, 512>}, {transform_indices = @transform_3, window_bounds = array<i64: 1, 1, 512>}]} {
    %c0_i32 = arith.constant 0 : i32
    %0 = arith.cmpi eq, %arg1, %c0_i32 : i32
    %1 = arith.extui %0 : i1 to i32
    %c0_i32_0 = arith.constant 0 : i32
    %2 = arith.cmpi ne, %1, %c0_i32_0 : i32
    scf.if %2 {
      %cst_14 = arith.constant 0.000000e+00 : f32
      %19 = vector.broadcast %cst_14 : f32 to vector<1x512xf32>
      %c0_15 = arith.constant 0 : index
      %c0_16 = arith.constant 0 : index
      %20 = vector.load %arg6[%c0_15, %c0_16] : memref<1x512xf32, #tpu.memory_space<vmem>>, vector<1x512xf32>
      tpu.vector_store %arg6[%c0_15, %c0_16], %19 {strides = array<i32>} : memref<1x512xf32, #tpu.memory_space<vmem>>, vector<1x512xf32>,
    } else {
    }
    %c0 = arith.constant 0 : index
    %c0_1 = arith.constant 0 : index
    %3 = vector.load %arg2[%c0, %c0_1] : memref<512x27xbf16, #tpu.memory_space<vmem>>, vector<512x27xbf16>
    %c0_2 = arith.constant 0 : index
    %c0_3 = arith.constant 0 : index
    %4 = vector.load %arg3[%c0_2, %c0_3] : memref<27x512xbf16, #tpu.memory_space<vmem>>, vector<27x512xbf16>
    %cst = arith.constant dense<0.000000e+00> : vector<512x512xf32>
    %5 = tpu.matmul %3, %4, %cst {dimension_numbers = #tpu.dot_dimension_numbers<[1], [0], [0], [1], [0, 0, 1, 1], [], []>} : vector<512x27xbf16>, vector<27x512xbf16>, vector<512x512xf32> -> vector<512x512xf32>
    %c0_4 = arith.constant 0 : index
    %c0_5 = arith.constant 0 : index
    %6 = vector.load %arg4[%c0_4, %c0_5] : memref<1x512xf32, #tpu.memory_space<vmem>>, vector<1x512xf32>
    %7 = vector.broadcast %6 : vector<1x512xf32> to vector<512x512xf32>
    %8 = arith.addf %5, %7 : vector<512x512xf32>
    %cst_6 = arith.constant 0.000000e+00 : f32
    %9 = vector.broadcast %cst_6 : f32 to vector<512x512xf32>
    %10 = arith.maximumf %8, %9 : vector<512x512xf32>
    %c0_7 = arith.constant 0 : index
    %c0_8 = arith.constant 0 : index
    %11 = vector.load %arg6[%c0_7, %c0_8] : memref<1x512xf32, #tpu.memory_space<vmem>>, vector<1x512xf32>
    %cst_9 = arith.constant dense<0.000000e+00> : vector<512xf32>
    %12 = vector.multi_reduction <add>, %10, %cst_9 [0] : vector<512x512xf32> to vector<512xf32>
    %13 = vector.shape_cast %12 : vector<512xf32> to vector<1x512xf32>
    %14 = arith.addf %11, %13 : vector<1x512xf32>
    %c0_10 = arith.constant 0 : index
    %c0_11 = arith.constant 0 : index
    %15 = vector.load %arg6[%c0_10, %c0_11] : memref<1x512xf32, #tpu.memory_space<vmem>>, vector<1x512xf32>
    tpu.vector_store %arg6[%c0_10, %c0_11], %14 {strides = array<i32>} : memref<1x512xf32, #tpu.memory_space<vmem>>, vector<1x512xf32>,
    %c0_i32_12 = arith.constant 0 : i32
    %16 = arith.cmpi eq, %arg1, %c0_i32_12 : i32
    %17 = arith.extui %16 : i1 to i32
    %c0_i32_13 = arith.constant 0 : i32
    %18 = arith.cmpi ne, %17, %c0_i32_13 : i32
    scf.if %18 {
      %c0_14 = arith.constant 0 : index
      %c0_15 = arith.constant 0 : index
      %19 = vector.load %arg6[%c0_14, %c0_15] : memref<1x512xf32, #tpu.memory_space<vmem>>, vector<1x512xf32>
      %cst_16 = arith.constant 0.001953125 : f32
      %20 = vector.broadcast %cst_16 : f32 to vector<1x512xf32>
      %21 = arith.mulf %19, %20 : vector<1x512xf32>
      %22 = vector.shape_cast %21 : vector<1x512xf32> to vector<1x1x512xf32>
      %c0_17 = arith.constant 0 : index
      %c0_18 = arith.constant 0 : index
      %c0_19 = arith.constant 0 : index
      %23 = vector.load %arg5[%c0_17, %c0_18, %c0_19] : memref<1x1x512xf32, #tpu.memory_space<vmem>>, vector<1x1x512xf32>
      tpu.vector_store %arg5[%c0_17, %c0_18, %c0_19], %22 {strides = array<i32>} : memref<1x1x512xf32, #tpu.memory_space<vmem>>, vector<1x1x512xf32>,
    } else {
    }
    return
  }
  func.func @transform_0(%arg0: i32, %arg1: i32) -> (i32, i32) {
    %c1_i32 = arith.constant 1 : i32
    %0 = arith.muli %arg0, %c1_i32 : i32
    %1 = arith.addi %0, %arg1 : i32
    %c0_i32 = arith.constant 0 : i32
    %c0_i32_0 = arith.constant 0 : i32
    return %1, %c0_i32 : i32, i32
  }
  func.func @transform_1(%arg0: i32, %arg1: i32) -> (i32, i32) {
    %c0_i32 = arith.constant 0 : i32
    %c0_i32_0 = arith.constant 0 : i32
    %c0_i32_1 = arith.constant 0 : i32
    return %c0_i32, %c0_i32_0 : i32, i32
  }
  func.func @transform_2(%arg0: i32, %arg1: i32) -> (i32, i32) {
    %c0_i32 = arith.constant 0 : i32
    %c0_i32_0 = arith.constant 0 : i32
    %c0_i32_1 = arith.constant 0 : i32
    return %c0_i32, %c0_i32_0 : i32, i32
  }
  func.func @transform_3(%arg0: i32, %arg1: i32) -> (i32, i32, i32) {
    %c0_i32 = arith.constant 0 : i32
    %c0_i32_0 = arith.constant 0 : i32
    %c0_i32_1 = arith.constant 0 : i32
    return %arg0, %c0_i32, %c0_i32_0 : i32, i32, i32
  }
}

module attributes {stable_mosaic.version = 11 : i64} {
  func.func @kernel(%arg0: i32, %arg1: i32, %arg2: memref<2x1664xbf16, #tpu.memory_space<vmem>>, %arg3: memref<1664x512xbf16, #tpu.memory_space<vmem>>, %arg4: memref<1x512xf32, #tpu.memory_space<vmem>>, %arg5: memref<512x256xbf16, #tpu.memory_space<vmem>>, %arg6: memref<1x256xf32, #tpu.memory_space<vmem>>, %arg7: memref<256x2xbf16, #tpu.memory_space<vmem>>, %arg8: memref<1x2xf32, #tpu.memory_space<vmem>>, %arg9: memref<2x2xf32, #tpu.memory_space<vmem>>, %arg10: memref<2x512xf32, #tpu.memory_space<vmem>>) attributes {dimension_semantics = [#tpu.dimension_semantics<parallel>, #tpu.dimension_semantics<arbitrary>], iteration_bounds = array<i64: 1, 1>, scalar_prefetch = 0 : i64, scratch_operands = 1 : i64, tpu.core_type = #tpu.core_type<tc>, window_params = [{transform_indices = @transform_0, window_bounds = array<i64: 2, 1664>}, {transform_indices = @transform_1, window_bounds = array<i64: 1664, 512>}, {pipeline_mode = #tpu.pipeline_mode<synchronous>, transform_indices = @transform_2, window_bounds = array<i64: 1, 512>}, {pipeline_mode = #tpu.pipeline_mode<synchronous>, transform_indices = @transform_3, window_bounds = array<i64: 512, 256>}, {pipeline_mode = #tpu.pipeline_mode<synchronous>, transform_indices = @transform_4, window_bounds = array<i64: 1, 256>}, {pipeline_mode = #tpu.pipeline_mode<synchronous>, transform_indices = @transform_5, window_bounds = array<i64: 256, 2>}, {pipeline_mode = #tpu.pipeline_mode<synchronous>, transform_indices = @transform_6, window_bounds = array<i64: 1, 2>}, {transform_indices = @transform_7, window_bounds = array<i64: 2, 2>}]} {
    %c0_i32 = arith.constant 0 : i32
    %0 = arith.cmpi eq, %arg1, %c0_i32 : i32
    %1 = arith.extui %0 : i1 to i32
    %c0_i32_0 = arith.constant 0 : i32
    %2 = arith.cmpi ne, %1, %c0_i32_0 : i32
    scf.if %2 {
      %cst_10 = arith.constant 0.000000e+00 : f32
      %12 = vector.broadcast %cst_10 : f32 to vector<2x512xf32>
      %c0_11 = arith.constant 0 : index
      %c0_12 = arith.constant 0 : index
      %13 = vector.load %arg10[%c0_11, %c0_12] : memref<2x512xf32, #tpu.memory_space<vmem>>, vector<2x512xf32>
      tpu.vector_store %arg10[%c0_11, %c0_12], %12 {strides = array<i32>} : memref<2x512xf32, #tpu.memory_space<vmem>>, vector<2x512xf32>,
    } else {
    }
    %c0 = arith.constant 0 : index
    %c0_1 = arith.constant 0 : index
    %3 = vector.load %arg10[%c0, %c0_1] : memref<2x512xf32, #tpu.memory_space<vmem>>, vector<2x512xf32>
    %c0_2 = arith.constant 0 : index
    %c0_3 = arith.constant 0 : index
    %4 = vector.load %arg2[%c0_2, %c0_3] : memref<2x1664xbf16, #tpu.memory_space<vmem>>, vector<2x1664xbf16>
    %c0_4 = arith.constant 0 : index
    %c0_5 = arith.constant 0 : index
    %5 = vector.load %arg3[%c0_4, %c0_5] : memref<1664x512xbf16, #tpu.memory_space<vmem>>, vector<1664x512xbf16>
    %cst = arith.constant dense<0.000000e+00> : vector<2x512xf32>
    %6 = tpu.matmul %4, %5, %cst {dimension_numbers = #tpu.dot_dimension_numbers<[1], [0], [0], [1], [0, 0, 1, 1], [], []>} : vector<2x1664xbf16>, vector<1664x512xbf16>, vector<2x512xf32> -> vector<2x512xf32>
    %7 = arith.addf %3, %6 : vector<2x512xf32>
    %c0_6 = arith.constant 0 : index
    %c0_7 = arith.constant 0 : index
    %8 = vector.load %arg10[%c0_6, %c0_7] : memref<2x512xf32, #tpu.memory_space<vmem>>, vector<2x512xf32>
    tpu.vector_store %arg10[%c0_6, %c0_7], %7 {strides = array<i32>} : memref<2x512xf32, #tpu.memory_space<vmem>>, vector<2x512xf32>,
    %c0_i32_8 = arith.constant 0 : i32
    %9 = arith.cmpi eq, %arg1, %c0_i32_8 : i32
    %10 = arith.extui %9 : i1 to i32
    %c0_i32_9 = arith.constant 0 : i32
    %11 = arith.cmpi ne, %10, %c0_i32_9 : i32
    scf.if %11 {
      %c0_10 = arith.constant 0 : index
      %c0_11 = arith.constant 0 : index
      %12 = vector.load %arg10[%c0_10, %c0_11] : memref<2x512xf32, #tpu.memory_space<vmem>>, vector<2x512xf32>
      %c0_12 = arith.constant 0 : index
      %c0_13 = arith.constant 0 : index
      %13 = vector.load %arg4[%c0_12, %c0_13] : memref<1x512xf32, #tpu.memory_space<vmem>>, vector<1x512xf32>
      %14 = vector.broadcast %13 : vector<1x512xf32> to vector<2x512xf32>
      %15 = arith.addf %12, %14 : vector<2x512xf32>
      %cst_14 = arith.constant 0.000000e+00 : f32
      %16 = vector.broadcast %cst_14 : f32 to vector<2x512xf32>
      %17 = arith.maximumf %15, %16 : vector<2x512xf32>
      %18 = arith.truncf %17 : vector<2x512xf32> to vector<2x512xbf16>
      %c0_15 = arith.constant 0 : index
      %c0_16 = arith.constant 0 : index
      %19 = vector.load %arg5[%c0_15, %c0_16] : memref<512x256xbf16, #tpu.memory_space<vmem>>, vector<512x256xbf16>
      %cst_17 = arith.constant dense<0.000000e+00> : vector<2x256xf32>
      %20 = tpu.matmul %18, %19, %cst_17 {dimension_numbers = #tpu.dot_dimension_numbers<[1], [0], [0], [1], [0, 0, 1, 1], [], []>} : vector<2x512xbf16>, vector<512x256xbf16>, vector<2x256xf32> -> vector<2x256xf32>
      %c0_18 = arith.constant 0 : index
      %c0_19 = arith.constant 0 : index
      %21 = vector.load %arg6[%c0_18, %c0_19] : memref<1x256xf32, #tpu.memory_space<vmem>>, vector<1x256xf32>
      %22 = vector.broadcast %21 : vector<1x256xf32> to vector<2x256xf32>
      %23 = arith.addf %20, %22 : vector<2x256xf32>
      %cst_20 = arith.constant 0.000000e+00 : f32
      %24 = vector.broadcast %cst_20 : f32 to vector<2x256xf32>
      %25 = arith.maximumf %23, %24 : vector<2x256xf32>
      %26 = arith.truncf %25 : vector<2x256xf32> to vector<2x256xbf16>
      %c0_21 = arith.constant 0 : index
      %c0_22 = arith.constant 0 : index
      %27 = vector.load %arg7[%c0_21, %c0_22] : memref<256x2xbf16, #tpu.memory_space<vmem>>, vector<256x2xbf16>
      %cst_23 = arith.constant dense<0.000000e+00> : vector<2x2xf32>
      %28 = tpu.matmul %26, %27, %cst_23 {dimension_numbers = #tpu.dot_dimension_numbers<[1], [0], [0], [1], [0, 0, 1, 1], [], []>} : vector<2x256xbf16>, vector<256x2xbf16>, vector<2x2xf32> -> vector<2x2xf32>
      %c0_24 = arith.constant 0 : index
      %c0_25 = arith.constant 0 : index
      %29 = vector.load %arg8[%c0_24, %c0_25] : memref<1x2xf32, #tpu.memory_space<vmem>>, vector<1x2xf32>
      %30 = vector.broadcast %29 : vector<1x2xf32> to vector<2x2xf32>
      %31 = arith.addf %28, %30 : vector<2x2xf32>
      %c0_26 = arith.constant 0 : index
      %c0_27 = arith.constant 0 : index
      %32 = vector.load %arg9[%c0_26, %c0_27] : memref<2x2xf32, #tpu.memory_space<vmem>>, vector<2x2xf32>
      tpu.vector_store %arg9[%c0_26, %c0_27], %31 {strides = array<i32>} : memref<2x2xf32, #tpu.memory_space<vmem>>, vector<2x2xf32>,
    } else {
    }
    return
  }
  func.func @transform_0(%arg0: i32, %arg1: i32) -> (i32, i32) {
    %c0_i32 = arith.constant 0 : i32
    return %arg0, %arg1 : i32, i32
  }
  func.func @transform_1(%arg0: i32, %arg1: i32) -> (i32, i32) {
    %c0_i32 = arith.constant 0 : i32
    %c0_i32_0 = arith.constant 0 : i32
    return %arg1, %c0_i32 : i32, i32
  }
  func.func @transform_2(%arg0: i32, %arg1: i32) -> (i32, i32) {
    %c0_i32 = arith.constant 0 : i32
    %c0_i32_0 = arith.constant 0 : i32
    %c0_i32_1 = arith.constant 0 : i32
    return %c0_i32, %c0_i32_0 : i32, i32
  }
  func.func @transform_3(%arg0: i32, %arg1: i32) -> (i32, i32) {
    %c0_i32 = arith.constant 0 : i32
    %c0_i32_0 = arith.constant 0 : i32
    %c0_i32_1 = arith.constant 0 : i32
    return %c0_i32, %c0_i32_0 : i32, i32
  }
  func.func @transform_4(%arg0: i32, %arg1: i32) -> (i32, i32) {
    %c0_i32 = arith.constant 0 : i32
    %c0_i32_0 = arith.constant 0 : i32
    %c0_i32_1 = arith.constant 0 : i32
    return %c0_i32, %c0_i32_0 : i32, i32
  }
  func.func @transform_5(%arg0: i32, %arg1: i32) -> (i32, i32) {
    %c0_i32 = arith.constant 0 : i32
    %c0_i32_0 = arith.constant 0 : i32
    %c0_i32_1 = arith.constant 0 : i32
    return %c0_i32, %c0_i32_0 : i32, i32
  }
  func.func @transform_6(%arg0: i32, %arg1: i32) -> (i32, i32) {
    %c0_i32 = arith.constant 0 : i32
    %c0_i32_0 = arith.constant 0 : i32
    %c0_i32_1 = arith.constant 0 : i32
    return %c0_i32, %c0_i32_0 : i32, i32
  }
  func.func @transform_7(%arg0: i32, %arg1: i32) -> (i32, i32) {
    %c0_i32 = arith.constant 0 : i32
    %c0_i32_0 = arith.constant 0 : i32
    return %arg0, %c0_i32 : i32, i32
  }
}

</mosaic_0001>

<bundles_post_ra>
// kernel: forward.5
= control target key start
LH: loop header
LB: loop body
LE: loop exit
PB: predicated region body
PF: predicated region fallthrough
CT: control target
= control target key end

     0   :  { %11 = vsyncpa [#allocation3], 0  ;;  %s2029_s21 = smov [#allocation2]   ;;  %s2691_s0 = inlined_call_operand.vmem [shape: bf16[256,9], index: 0, kind: input, shape index: {}]   ;;  %s2692_s1 = inlined_call_operand.vmem [shape: bf16[256,9], index: 1, kind: input, shape index: {}]   ;;  %s2693_s2 = inlined_call_operand.vmem [shape: bf16[256,9], index: 2, kind: input, shape index: {}]   ;;  %s2694_s3 = inlined_call_operand.vmem [shape: bf16[256,9], index: 3, kind: input, shape index: {}]   ;;  %s2695_s4 = inlined_call_operand.vmem [shape: bf16[9,16], index: 4, kind: input, shape index: {}]   ;;  %s2696_s5 = inlined_call_operand.hbm [shape: f32[1,16], index: 5, kind: input, shape index: {}]   ;;  %s2697_s6 = inlined_call_operand.vmem [shape: f32[256,16], index: 6, kind: output, shape index: {}]  }
   0x1   :  { %s28_s22 = sshll.u32 %s2029_s21, 4  ;;  %s2005_s25 = scalar_lea.hbm %s2696_s5, 16  ;;  %s29_s22 = int_to_ptr.vmem [resolvable:$true] %s28_s22 }
   0x2   :  { %p2006_p0 = scmp.ne.s32.totalorder %s2696_s5, %s2005_s25  ;;  %p2009_p1 = scmp.lt.u32.totalorder %s2005_s25, %s2696_s5 }
   0x4   :  { %p2011_p2 = pnand %p2009_p1, %p2006_p0 }
   0x6   :  { %2014 = shalt.err (!%p2011_p2)
}
   0x7   :  { %s2015_s30 = scalar_lea.vmem %s29_s22, 16  ;;  %s2019_s7 = scalar_lea.vmem %s29_s22, 32 }
   0x8   :  { %p2016_p3 = scmp.ne.s32.totalorder %s29_s22, %s2015_s30  ;;  %p2020_p4 = scmp.lt.s32.totalorder %s29_s22, %s29_s22 }
   0x9   :  { %p2021_p5 = scmp.lt.s32.totalorder %s2019_s7, %s2015_s30 }
   0xb   :  { %p2022_p6 = por %p2021_p5, %p2020_p4 }
   0xd   :  { %p2023_p7 = pnand %p2022_p6, %p2016_p3 }
   0xf   :  { %2026 = shalt.err (!%p2023_p7)
}
  0x10   :  { %31 = dma.hbm_to_vmem [thread:$0]  %s2696_s5, 16, %s29_s22, [#allocation3]  }
  0x11   :  { %2027 = dma.done.wait [#allocation3], 16  }
  0x12   :  { %2028 = vsyncadd [#allocation3], 4294967280  ;;  %vm211_vm0 = vcmask 1043456   ;;  %vm212_vm1 = vcmask 1044480   ;;  %v2030_v0 = vmov 65535   ;;  %vm162_vm2 = vcmask 72704  }
  0x13   :  { %v213_v1 = vsel %vm211_vm0, 4294967295, %v2030_v0  ;;  %v1940_v3 = vld [vmem:[%s2695_s4] sm:$0x1f]   ;;  %v1943_v7 = vld [vmem:[%s2691_s0 + $0x8] sm:$0xff]   ;;  %v1945_v9 = vld [vmem:[%s2691_s0 + $0x10] sm:$0xff]   ;;  %vm1566_vm3 = vcmask 130048  }
  0x14   :  { %v214_v2 = vsel %vm212_vm1, %v213_v1, 0  ;;  %v1941_v4 = vld [vmem:[%s2691_s0] sm:$0xff]   ;;  %v1944_v8 = vld [vmem:[%s2692_s1 + $0x8] sm:$0xff]   ;;  %v1946_v10 = vld [vmem:[%s2692_s1 + $0x10] sm:$0xff]  }
  0x15   :  { %v216_v5 = vand.u32 %v1940_v3, %v214_v2  ;;  %v1942_v6 = vld [vmem:[%s2692_s1] sm:$0xff]   ;;  %1804 = vmatprep.mubr.msk.bf16.mxu0 %vm162_vm2, %v1941_v4  ;;  %v1947_v11 = vld [vmem:[%s2691_s0 + $0x18] sm:$0xff]   ;;  %v1951_v15 = vld [vmem:[%s2691_s0 + $0x28] sm:$0xff]  }
  0x16   :  { %1838 = vmatprep.mubr.msk.bf16.mxu1 %vm162_vm2, %v1942_v6  ;;  %v1948_v12 = vld [vmem:[%s2692_s1 + $0x18] sm:$0xff]   ;;  %v1949_v13 = vld [vmem:[%s2691_s0 + $0x20] sm:$0xff]   ;;  %v1952_v16 = vld [vmem:[%s2692_s1 + $0x28] sm:$0xff]  }
  0x17   :  { %1802 = vmatprep.subr.bf16.mxu0 %v216_v5  ;;  %1836 = vmatprep.subr.bf16.mxu1 %v216_v5  ;;  %v1950_v14 = vld [vmem:[%s2692_s1 + $0x20] sm:$0xff]   ;;  %v1953_v17 = vld [vmem:[%s2691_s0 + $0x30] sm:$0xff]   ;;  %v1955_v19 = vld [vmem:[%s2691_s0 + $0x38] sm:$0xff]  }
  0x18   :  { %1803 = vmatpush3.bf16.msra.mxu0 %v216_v5  ;;  %1837 = vmatpush3.bf16.msra.mxu1 %v216_v5  ;;  %v1954_v18 = vld [vmem:[%s2692_s1 + $0x30] sm:$0xff]   ;;  %v1956_v20 = vld [vmem:[%s2692_s1 + $0x38] sm:$0xff]   ;;  %v1957_v21 = vld [vmem:[%s2691_s0 + $0x40] sm:$0xff]  }
  0x19   :  { %1870 = vmatprep.subr.bf16.mxu0 %v216_v5  ;;  %1904 = vmatprep.subr.bf16.mxu1 %v216_v5  ;;  %v1958_v22 = vld [vmem:[%s2692_s1 + $0x40] sm:$0xff]   ;;  %v1959_v23 = vld [vmem:[%s2691_s0 + $0x48] sm:$0xff]   ;;  %v1961_v25 = vld [vmem:[%s2691_s0 + $0x50] sm:$0xff]  }
  0x1a   :  { %v1960_v24 = vld [vmem:[%s2692_s1 + $0x48] sm:$0xff]   ;;  %v1962_v26 = vld [vmem:[%s2692_s1 + $0x50] sm:$0xff]   ;;  %v1963_v27 = vld [vmem:[%s2691_s0 + $0x58] sm:$0xff]  }
  0x1b   :  { %1805 = vmatmul.mubr.msk.bf16.vlgmr.msra.gmra.mrb[0].mxu0 %vm162_vm2, %v1943_v7  ;;  %1839 = vmatmul.mubr.msk.bf16.vlgmr.msra.gmra.mrb[0].mxu1 %vm162_vm2, %v1944_v8  ;;  %v1964_v28 = vld [vmem:[%s2692_s1 + $0x58] sm:$0xff]   ;;  %v1965_v29 = vld [vmem:[%s2691_s0 + $0x60] sm:$0xff]   ;;  %v1967_v31 = vld [vmem:[%s2691_s0 + $0x68] sm:$0xff]  }
  0x1c   :  { %1871 = vmatpush3.bf16.msra.mxu0 %v216_v5  ;;  %1905 = vmatpush3.bf16.msra.mxu1 %v216_v5  ;;  %v1966_v30 = vld [vmem:[%s2692_s1 + $0x60] sm:$0xff]   ;;  %v1968_v32 = vld [vmem:[%s2692_s1 + $0x68] sm:$0xff]   ;;  %v1969_v33 = vld [vmem:[%s2691_s0 + $0x70] sm:$0xff]  }
  0x1d   :  { %1808 = vmatprep.mubr.msk.bf16.mxu0 %vm162_vm2, %v1945_v9  ;;  %1842 = vmatprep.mubr.msk.bf16.mxu1 %vm162_vm2, %v1946_v10  ;;  %v1970_v34 = vld [vmem:[%s2692_s1 + $0x70] sm:$0xff]   ;;  %v1971_v35 = vld [vmem:[%s2691_s0 + $0x78] sm:$0xff]   ;;  %v1973_v37 = vld [vmem:[%s2693_s2] sm:$0xff]  }
  0x1e   :  { %v1972_v36 = vld [vmem:[%s2692_s1 + $0x78] sm:$0xff]   ;;  %v1974_v38 = vld [vmem:[%s2694_s3] sm:$0xff]   ;;  %v1975_v39 = vld [vmem:[%s2693_s2 + $0x8] sm:$0xff]  }
  0x1f   :  { %v1976_v40 = vld [vmem:[%s2694_s3 + $0x8] sm:$0xff]   ;;  %v1977_v41 = vld [vmem:[%s2693_s2 + $0x10] sm:$0xff]   ;;  %v1979_v43 = vld [vmem:[%s2693_s2 + $0x18] sm:$0xff]  }
  0x20   :  { %v1978_v42 = vld [vmem:[%s2694_s3 + $0x10] sm:$0xff]   ;;  %v1980_v44 = vld [vmem:[%s2694_s3 + $0x18] sm:$0xff]   ;;  %v1981_v45 = vld [vmem:[%s2693_s2 + $0x20] sm:$0xff]  }
  0x21   :  { %v1982_v46 = vld [vmem:[%s2694_s3 + $0x20] sm:$0xff]   ;;  %v1983_v47 = vld [vmem:[%s2693_s2 + $0x28] sm:$0xff]   ;;  %v1985_v49 = vld [vmem:[%s2693_s2 + $0x30] sm:$0xff]  }
  0x22   :  { %v1984_v48 = vld [vmem:[%s2694_s3 + $0x28] sm:$0xff]   ;;  %v1986_v50 = vld [vmem:[%s2694_s3 + $0x30] sm:$0xff]   ;;  %v1987_v51 = vld [vmem:[%s2693_s2 + $0x38] sm:$0xff]  }
  0x23   :  { %1809 = vmatmul.mubr.msk.bf16.gmra.mrb[4].mxu0 %vm162_vm2, %v1947_v11  ;;  %1843 = vmatmul.mubr.msk.bf16.gmra.mrb[4].mxu1 %vm162_vm2, %v1948_v12  ;;  %v1988_v52 = vld [vmem:[%s2694_s3 + $0x38] sm:$0xff]   ;;  %v1989_v53 = vld [vmem:[%s2693_s2 + $0x40] sm:$0xff]   ;;  %v1991_v55 = vld [vmem:[%s2693_s2 + $0x48] sm:$0xff]  }
  0x24   :  { %1812 = vmatprep.mubr.msk.bf16.mxu0 %vm162_vm2, %v1949_v13  ;;  %1846 = vmatprep.mubr.msk.bf16.mxu1 %vm162_vm2, %v1950_v14  ;;  %v1990_v54 = vld [vmem:[%s2694_s3 + $0x40] sm:$0xff]   ;;  %v1992_v56 = vld [vmem:[%s2694_s3 + $0x48] sm:$0xff]   ;;  %v1993_v57 = vld [vmem:[%s2693_s2 + $0x50] sm:$0xff]  }
  0x25   :  { %v1994_v58 = vld [vmem:[%s2694_s3 + $0x50] sm:$0xff]   ;;  %v1995_v59 = vld [vmem:[%s2693_s2 + $0x58] sm:$0xff]   ;;  %v1997_v61 = vld [vmem:[%s2693_s2 + $0x60] sm:$0xff]  }
  0x26   :  { %v1996_v60 = vld [vmem:[%s2694_s3 + $0x58] sm:$0xff]   ;;  %v1998_v62 = vld [vmem:[%s2694_s3 + $0x60] sm:$0xff]   ;;  %v1999_v63 = vld [vmem:[%s2693_s2 + $0x68] sm:$0xff]  }
  0x27   :  { %v2000_v0 = vld [vmem:[%s2694_s3 + $0x68] sm:$0xff]   ;;  %v2001_v1 = vld [vmem:[%s2693_s2 + $0x70] sm:$0xff]   ;;  %v2003_v3 = vld [vmem:[%s2693_s2 + $0x78] sm:$0xff]  }
  0x28   :  { %v2002_v2 = vld [vmem:[%s2694_s3 + $0x70] sm:$0xff]   ;;  %v2004_v4 = vld [vmem:[%s2694_s3 + $0x78] sm:$0xff]   ;;  %v2337_v5 = vld [vmem:[#allocation2] ss:$0 sm:$0xff] }
  0x2b   :  { %1813 = vmatmul.mubr.msk.bf16.gmra.mrb[8].mxu0 %vm162_vm2, %v1951_v15  ;;  %1847 = vmatmul.mubr.msk.bf16.gmra.mrb[8].mxu1 %vm162_vm2, %v1952_v16 }
  0x2c   :  { %1816 = vmatprep.mubr.msk.bf16.mxu0 %vm162_vm2, %v1953_v17  ;;  %1850 = vmatprep.mubr.msk.bf16.mxu1 %vm162_vm2, %v1954_v18 }
  0x33   :  { %1817 = vmatmul.mubr.msk.bf16.gmra.mrb[12].mxu0 %vm162_vm2, %v1955_v19  ;;  %1851 = vmatmul.mubr.msk.bf16.gmra.mrb[12].mxu1 %vm162_vm2, %v1956_v20 }
  0x34   :  { %1820 = vmatprep.mubr.msk.bf16.mxu0 %vm162_vm2, %v1957_v21  ;;  %1854 = vmatprep.mubr.msk.bf16.mxu1 %vm162_vm2, %v1958_v22 }
  0x3b   :  { %1821 = vmatmul.mubr.msk.bf16.gmra.mrb[16].mxu0 %vm162_vm2, %v1959_v23  ;;  %1855 = vmatmul.mubr.msk.bf16.gmra.mrb[16].mxu1 %vm162_vm2, %v1960_v24 }
  0x3c   :  { %1824 = vmatprep.mubr.msk.bf16.mxu0 %vm162_vm2, %v1961_v25  ;;  %1858 = vmatprep.mubr.msk.bf16.mxu1 %vm162_vm2, %v1962_v26 }
  0x43   :  { %1825 = vmatmul.mubr.msk.bf16.gmra.mrb[20].mxu0 %vm162_vm2, %v1963_v27  ;;  %1859 = vmatmul.mubr.msk.bf16.gmra.mrb[20].mxu1 %vm162_vm2, %v1964_v28 }
  0x44   :  { %1828 = vmatprep.mubr.msk.bf16.mxu0 %vm162_vm2, %v1965_v29  ;;  %1862 = vmatprep.mubr.msk.bf16.mxu1 %vm162_vm2, %v1966_v30 }
  0x4b   :  { %1829 = vmatmul.mubr.msk.bf16.gmra.mrb[24].mxu0 %vm162_vm2, %v1967_v31  ;;  %1863 = vmatmul.mubr.msk.bf16.gmra.mrb[24].mxu1 %vm162_vm2, %v1968_v32 }
  0x4c   :  { %1832 = vmatprep.mubr.msk.bf16.mxu0 %vm162_vm2, %v1969_v33  ;;  %1866 = vmatprep.mubr.msk.bf16.mxu1 %vm162_vm2, %v1970_v34 }
  0x53   :  { %1833 = vmatmul.mubr.msk.bf16.gmra.mrb[28].mxu0 %vm162_vm2, %v1971_v35  ;;  %1867 = vmatmul.mubr.msk.bf16.gmra.mrb[28].mxu1 %vm162_vm2, %v1972_v36 }
  0x54   :  { %1872 = vmatprep.mubr.msk.bf16.mxu0 %vm162_vm2, %v1973_v37  ;;  %1906 = vmatprep.mubr.msk.bf16.mxu1 %vm162_vm2, %v1974_v38 }
  0x5b   :  { %1873 = vmatmul.mubr.msk.bf16.vlgmr.msra.gmra.mrb[32].mxu0 %vm162_vm2, %v1975_v39  ;;  %1907 = vmatmul.mubr.msk.bf16.vlgmr.msra.gmra.mrb[32].mxu1 %vm162_vm2, %v1976_v40 }
  0x5c   :  { %1876 = vmatprep.mubr.msk.bf16.mxu0 %vm162_vm2, %v1977_v41  ;;  %1910 = vmatprep.mubr.msk.bf16.mxu1 %vm162_vm2, %v1978_v42 }
  0x63   :  { %1877 = vmatmul.mubr.msk.bf16.gmra.mrb[36].mxu0 %vm162_vm2, %v1979_v43  ;;  %1911 = vmatmul.mubr.msk.bf16.gmra.mrb[36].mxu1 %vm162_vm2, %v1980_v44 }
  0x64   :  { %1880 = vmatprep.mubr.msk.bf16.mxu0 %vm162_vm2, %v1981_v45  ;;  %1914 = vmatprep.mubr.msk.bf16.mxu1 %vm162_vm2, %v1982_v46 }
  0x6b   :  { %1881 = vmatmul.mubr.msk.bf16.gmra.mrb[40].mxu0 %vm162_vm2, %v1983_v47  ;;  %1915 = vmatmul.mubr.msk.bf16.gmra.mrb[40].mxu1 %vm162_vm2, %v1984_v48 }
  0x6c   :  { %1884 = vmatprep.mubr.msk.bf16.mxu0 %vm162_vm2, %v1985_v49  ;;  %1918 = vmatprep.mubr.msk.bf16.mxu1 %vm162_vm2, %v1986_v50 }
  0x73   :  { %1885 = vmatmul.mubr.msk.bf16.gmra.mrb[44].mxu0 %vm162_vm2, %v1987_v51  ;;  %1919 = vmatmul.mubr.msk.bf16.gmra.mrb[44].mxu1 %vm162_vm2, %v1988_v52 }
  0x74   :  { %1888 = vmatprep.mubr.msk.bf16.mxu0 %vm162_vm2, %v1989_v53  ;;  %1922 = vmatprep.mubr.msk.bf16.mxu1 %vm162_vm2, %v1990_v54 }
  0x7b   :  { %1889 = vmatmul.mubr.msk.bf16.gmra.mrb[48].mxu0 %vm162_vm2, %v1991_v55  ;;  %1923 = vmatmul.mubr.msk.bf16.gmra.mrb[48].mxu1 %vm162_vm2, %v1992_v56 }
  0x7c   :  { %1892 = vmatprep.mubr.msk.bf16.mxu0 %vm162_vm2, %v1993_v57  ;;  %1926 = vmatprep.mubr.msk.bf16.mxu1 %vm162_vm2, %v1994_v58 }
  0x83   :  { %1893 = vmatmul.mubr.msk.bf16.gmra.mrb[52].mxu0 %vm162_vm2, %v1995_v59  ;;  %1927 = vmatmul.mubr.msk.bf16.gmra.mrb[52].mxu1 %vm162_vm2, %v1996_v60 }
  0x84   :  { %1896 = vmatprep.mubr.msk.bf16.mxu0 %vm162_vm2, %v1997_v61  ;;  %1930 = vmatprep.mubr.msk.bf16.mxu1 %vm162_vm2, %v1998_v62 }
  0x8b   :  { %1897 = vmatmul.mubr.msk.bf16.gmra.mrb[56].mxu0 %vm162_vm2, %v1999_v63  ;;  %1931 = vmatmul.mubr.msk.bf16.gmra.mrb[56].mxu1 %vm162_vm2, %v2000_v0 }
  0x8c   :  { %1900 = vmatprep.mubr.msk.bf16.mxu0 %vm162_vm2, %v2001_v1  ;;  %1934 = vmatprep.mubr.msk.bf16.mxu1 %vm162_vm2, %v2002_v2 }
  0x93   :  { %1901 = vmatmul.mubr.msk.bf16.gmra.mrb[60].mxu0 %vm162_vm2, %v2003_v3  ;;  %1935 = vmatmul.mubr.msk.bf16.gmra.mrb[60].mxu1 %vm162_vm2, %v2004_v4 }
  0xee   :  { %v1806_v6 = vpop.f32.mrb[0].mxu0  ;;  %v1840_v7 = vpop.f32.mrb[0].mxu1 }
  0xef   :  { %v261_v8 = vadd.f32 %v1806_v6, %v2337_v5  ;;  %v614_v9 = vadd.f32 %v1840_v7, %v2337_v5  ;;  %v252_v10 = vpop.f32.mrb[1].mxu0  ;;  %v605_v11 = vpop.f32.mrb[1].mxu1 }
  0xf0   :  { %v253_v12 = vadd.f32 %v2337_v5, %v252_v10  ;;  %v606_v13 = vadd.f32 %v2337_v5, %v605_v11  ;;  %v1807_v14 = vpop.f32.mrb[2].mxu0  ;;  %v1841_v15 = vpop.f32.mrb[2].mxu1 }
  0xf1   :  { %v381_v16 = vmax.f32 %v261_v8, 0.0  ;;  %v734_v17 = vmax.f32 %v614_v9, 0.0  ;;  %v264_v18 = vadd.f32 %v1807_v14, %v2337_v5  ;;  %v617_v19 = vadd.f32 %v1841_v15, %v2337_v5  ;;  %v255_v20 = vpop.f32.mrb[3].mxu0  ;;  %v608_v21 = vpop.f32.mrb[3].mxu1 }
  0xf2   :  { %v379_v22 = vmax.f32 %v253_v12, 0.0  ;;  %v732_v23 = vmax.f32 %v606_v13, 0.0  ;;  %v256_v24 = vadd.f32 %v2337_v5, %v255_v20  ;;  %v609_v25 = vadd.f32 %v2337_v5, %v608_v21 }
  0xf3   :  { %v2347_v26 = vmax.f32 %v381_v16, %v734_v17  ;;  %v382_v27 = vmax.f32 %v264_v18, 0.0  ;;  %v735_v28 = vmax.f32 %v617_v19, 0.0 }
  0xf4   :  { %v2349_v29 = vmax.f32 %v379_v22, %v732_v23  ;;  %v380_v30 = vmax.f32 %v256_v24, 0.0  ;;  %v733_v31 = vmax.f32 %v609_v25, 0.0 }
  0xf5   :  { %v2351_v32 = vmax.f32 %v382_v27, %v735_v28 }
  0xf6   :  { %v2353_v33 = vmax.f32 %v380_v30, %v733_v31  ;;  %v1810_v34 = vpop.f32.mrb[4].mxu0  ;;  %v1844_v35 = vpop.f32.mrb[4].mxu1 }
  0xf7   :  { %v277_v36 = vadd.f32 %v1810_v34, %v2337_v5  ;;  %v630_v37 = vadd.f32 %v1844_v35, %v2337_v5  ;;  %v268_v38 = vpop.f32.mrb[5].mxu0  ;;  %v621_v39 = vpop.f32.mrb[5].mxu1 }
  0xf8   :  { %v269_v40 = vadd.f32 %v2337_v5, %v268_v38  ;;  %v622_v41 = vadd.f32 %v2337_v5, %v621_v39  ;;  %v1811_v42 = vpop.f32.mrb[6].mxu0  ;;  %v1845_v43 = vpop.f32.mrb[6].mxu1 }
  0xf9   :  { %v385_v44 = vmax.f32 %v277_v36, 0.0  ;;  %v738_v45 = vmax.f32 %v630_v37, 0.0  ;;  %v280_v46 = vadd.f32 %v1811_v42, %v2337_v5  ;;  %v633_v47 = vadd.f32 %v1845_v43, %v2337_v5  ;;  %v271_v48 = vpop.f32.mrb[7].mxu0  ;;  %v624_v49 = vpop.f32.mrb[7].mxu1 }
  0xfa   :  { %v383_v50 = vmax.f32 %v269_v40, 0.0  ;;  %v736_v51 = vmax.f32 %v622_v41, 0.0  ;;  %v272_v52 = vadd.f32 %v2337_v5, %v271_v48  ;;  %v625_v53 = vadd.f32 %v2337_v5, %v624_v49 }
  0xfb   :  { %v2363_v54 = vmax.f32 %v385_v44, %v738_v45  ;;  %v386_v55 = vmax.f32 %v280_v46, 0.0  ;;  %v739_v56 = vmax.f32 %v633_v47, 0.0 }
  0xfc   :  { %v2365_v57 = vmax.f32 %v383_v50, %v736_v51  ;;  %v384_v58 = vmax.f32 %v272_v52, 0.0  ;;  %v737_v59 = vmax.f32 %v625_v53, 0.0 }
  0xfd   :  { %v2367_v60 = vmax.f32 %v386_v55, %v739_v56 }
  0xfe   :  { %v2369_v61 = vmax.f32 %v384_v58, %v737_v59  ;;  %v1814_v62 = vpop.f32.mrb[8].mxu0  ;;  %v1848_v63 = vpop.f32.mrb[8].mxu1 }
  0xff   :  { %v293_v0 = vadd.f32 %v1814_v62, %v2337_v5  ;;  %v646_v1 = vadd.f32 %v1848_v63, %v2337_v5  ;;  %v284_v2 = vpop.f32.mrb[9].mxu0  ;;  %v637_v3 = vpop.f32.mrb[9].mxu1 }
 0x100   :  { %v285_v4 = vadd.f32 %v2337_v5, %v284_v2  ;;  %v638_v6 = vadd.f32 %v2337_v5, %v637_v3  ;;  %v1815_v7 = vpop.f32.mrb[10].mxu0  ;;  %v1849_v8 = vpop.f32.mrb[10].mxu1 }
 0x101   :  { %v389_v9 = vmax.f32 %v293_v0, 0.0  ;;  %v742_v10 = vmax.f32 %v646_v1, 0.0  ;;  %v296_v11 = vadd.f32 %v1815_v7, %v2337_v5  ;;  %v649_v12 = vadd.f32 %v1849_v8, %v2337_v5  ;;  %v287_v13 = vpop.f32.mrb[11].mxu0  ;;  %v640_v14 = vpop.f32.mrb[11].mxu1 }
 0x102   :  { %v387_v15 = vmax.f32 %v285_v4, 0.0  ;;  %v740_v16 = vmax.f32 %v638_v6, 0.0  ;;  %v288_v17 = vadd.f32 %v2337_v5, %v287_v13  ;;  %v641_v18 = vadd.f32 %v2337_v5, %v640_v14 }
 0x103   :  { %v2379_v19 = vmax.f32 %v389_v9, %v742_v10  ;;  %v390_v20 = vmax.f32 %v296_v11, 0.0  ;;  %v743_v21 = vmax.f32 %v649_v12, 0.0 }
 0x104   :  { %v2381_v22 = vmax.f32 %v387_v15, %v740_v16  ;;  %v388_v23 = vmax.f32 %v288_v17, 0.0  ;;  %v741_v24 = vmax.f32 %v641_v18, 0.0 }
 0x105   :  { %v2383_v25 = vmax.f32 %v390_v20, %v743_v21 }
 0x106   :  { %v2385_v27 = vmax.f32 %v388_v23, %v741_v24  ;;  %v1818_v28 = vpop.f32.mrb[12].mxu0  ;;  %v1852_v30 = vpop.f32.mrb[12].mxu1 }
 0x107   :  { %v309_v31 = vadd.f32 %v1818_v28, %v2337_v5  ;;  %v662_v34 = vadd.f32 %v1852_v30, %v2337_v5  ;;  %v300_v35 = vpop.f32.mrb[13].mxu0  ;;  %v653_v36 = vpop.f32.mrb[13].mxu1 }
 0x108   :  { %v301_v37 = vadd.f32 %v2337_v5, %v300_v35  ;;  %v654_v38 = vadd.f32 %v2337_v5, %v653_v36  ;;  %v1819_v39 = vpop.f32.mrb[14].mxu0  ;;  %v1853_v40 = vpop.f32.mrb[14].mxu1 }
 0x109   :  { %v393_v41 = vmax.f32 %v309_v31, 0.0  ;;  %v746_v42 = vmax.f32 %v662_v34, 0.0  ;;  %v312_v43 = vadd.f32 %v1819_v39, %v2337_v5  ;;  %v665_v44 = vadd.f32 %v1853_v40, %v2337_v5  ;;  %v303_v45 = vpop.f32.mrb[15].mxu0  ;;  %v656_v46 = vpop.f32.mrb[15].mxu1 }
 0x10a   :  { %v391_v47 = vmax.f32 %v301_v37, 0.0  ;;  %v744_v48 = vmax.f32 %v654_v38, 0.0  ;;  %v304_v49 = vadd.f32 %v2337_v5, %v303_v45  ;;  %v657_v50 = vadd.f32 %v2337_v5, %v656_v46 }
 0x10b   :  { %v2395_v51 = vmax.f32 %v393_v41, %v746_v42  ;;  %v394_v52 = vmax.f32 %v312_v43, 0.0  ;;  %v747_v53 = vmax.f32 %v665_v44, 0.0 }
 0x10c   :  { %v2397_v55 = vmax.f32 %v391_v47, %v744_v48  ;;  %v392_v56 = vmax.f32 %v304_v49, 0.0  ;;  %v745_v58 = vmax.f32 %v657_v50, 0.0 }
 0x10d   :  { %v2399_v59 = vmax.f32 %v394_v52, %v747_v53 }
 0x10e   :  { %v2401_v62 = vmax.f32 %v392_v56, %v745_v58  ;;  %v1822_v63 = vpop.f32.mrb[16].mxu0  ;;  %v1856_v0 = vpop.f32.mrb[16].mxu1 }
 0x10f   :  { %v325_v1 = vadd.f32 %v1822_v63, %v2337_v5  ;;  %v678_v2 = vadd.f32 %v1856_v0, %v2337_v5  ;;  %v316_v3 = vpop.f32.mrb[17].mxu0  ;;  %v669_v4 = vpop.f32.mrb[17].mxu1 }
 0x110   :  { %v317_v6 = vadd.f32 %v2337_v5, %v316_v3  ;;  %v670_v7 = vadd.f32 %v2337_v5, %v669_v4  ;;  %v1823_v8 = vpop.f32.mrb[18].mxu0  ;;  %v1857_v9 = vpop.f32.mrb[18].mxu1 }
 0x111   :  { %v397_v10 = vmax.f32 %v325_v1, 0.0  ;;  %v750_v11 = vmax.f32 %v678_v2, 0.0  ;;  %v328_v12 = vadd.f32 %v1823_v8, %v2337_v5  ;;  %v681_v13 = vadd.f32 %v1857_v9, %v2337_v5  ;;  %v319_v14 = vpop.f32.mrb[19].mxu0  ;;  %v672_v15 = vpop.f32.mrb[19].mxu1 }
 0x112   :  { %v395_v16 = vmax.f32 %v317_v6, 0.0  ;;  %v748_v17 = vmax.f32 %v670_v7, 0.0  ;;  %v320_v18 = vadd.f32 %v2337_v5, %v319_v14  ;;  %v673_v20 = vadd.f32 %v2337_v5, %v672_v15 }
 0x113   :  { %v2411_v21 = vmax.f32 %v397_v10, %v750_v11  ;;  %v398_v23 = vmax.f32 %v328_v12, 0.0  ;;  %v751_v24 = vmax.f32 %v681_v13, 0.0 }
 0x114   :  { %v2413_v28 = vmax.f32 %v395_v16, %v748_v17  ;;  %v396_v30 = vmax.f32 %v320_v18, 0.0  ;;  %v749_v31 = vmax.f32 %v673_v20, 0.0 }
 0x115   :  { %v2415_v34 = vmax.f32 %v398_v23, %v751_v24 }
 0x116   :  { %v2417_v35 = vmax.f32 %v396_v30, %v749_v31  ;;  %v1826_v36 = vpop.f32.mrb[20].mxu0  ;;  %v1860_v37 = vpop.f32.mrb[20].mxu1 }
 0x117   :  { %v341_v38 = vadd.f32 %v1826_v36, %v2337_v5  ;;  %v694_v39 = vadd.f32 %v1860_v37, %v2337_v5  ;;  %v332_v40 = vpop.f32.mrb[21].mxu0  ;;  %v685_v41 = vpop.f32.mrb[21].mxu1 }
 0x118   :  { %v333_v42 = vadd.f32 %v2337_v5, %v332_v40  ;;  %v686_v43 = vadd.f32 %v2337_v5, %v685_v41  ;;  %v1827_v44 = vpop.f32.mrb[22].mxu0  ;;  %v1861_v45 = vpop.f32.mrb[22].mxu1 }
 0x119   :  { %v401_v46 = vmax.f32 %v341_v38, 0.0  ;;  %v754_v47 = vmax.f32 %v694_v39, 0.0  ;;  %v344_v48 = vadd.f32 %v1827_v44, %v2337_v5  ;;  %v697_v49 = vadd.f32 %v1861_v45, %v2337_v5  ;;  %v335_v50 = vpop.f32.mrb[23].mxu0  ;;  %v688_v52 = vpop.f32.mrb[23].mxu1 }
 0x11a   :  { %v399_v53 = vmax.f32 %v333_v42, 0.0  ;;  %v752_v56 = vmax.f32 %v686_v43, 0.0  ;;  %v336_v58 = vadd.f32 %v2337_v5, %v335_v50  ;;  %v689_v63 = vadd.f32 %v2337_v5, %v688_v52 }
 0x11b   :  { %v2427_v0 = vmax.f32 %v401_v46, %v754_v47  ;;  %v402_v1 = vmax.f32 %v344_v48, 0.0  ;;  %v755_v2 = vmax.f32 %v697_v49, 0.0 }
 0x11c   :  { %v2429_v3 = vmax.f32 %v399_v53, %v752_v56  ;;  %v400_v4 = vmax.f32 %v336_v58, 0.0  ;;  %v753_v6 = vmax.f32 %v689_v63, 0.0 }
 0x11d   :  { %v2431_v7 = vmax.f32 %v402_v1, %v755_v2 }
 0x11e   :  { %v2433_v8 = vmax.f32 %v400_v4, %v753_v6  ;;  %v1830_v9 = vpop.f32.mrb[24].mxu0  ;;  %v1864_v10 = vpop.f32.mrb[24].mxu1 }
 0x11f   :  { %v357_v11 = vadd.f32 %v1830_v9, %v2337_v5  ;;  %v710_v12 = vadd.f32 %v1864_v10, %v2337_v5  ;;  %v348_v13 = vpop.f32.mrb[25].mxu0  ;;  %v701_v14 = vpop.f32.mrb[25].mxu1 }
 0x120   :  { %v349_v15 = vadd.f32 %v2337_v5, %v348_v13  ;;  %v702_v16 = vadd.f32 %v2337_v5, %v701_v14  ;;  %v1831_v17 = vpop.f32.mrb[26].mxu0  ;;  %v1865_v18 = vpop.f32.mrb[26].mxu1 }
 0x121   :  { %v405_v20 = vmax.f32 %v357_v11, 0.0  ;;  %v758_v23 = vmax.f32 %v710_v12, 0.0  ;;  %v360_v24 = vadd.f32 %v1831_v17, %v2337_v5  ;;  %v713_v30 = vadd.f32 %v1865_v18, %v2337_v5  ;;  %v351_v31 = vpop.f32.mrb[27].mxu0  ;;  %v704_v36 = vpop.f32.mrb[27].mxu1 }
 0x122   :  { %v403_v37 = vmax.f32 %v349_v15, 0.0  ;;  %v756_v38 = vmax.f32 %v702_v16, 0.0  ;;  %v352_v39 = vadd.f32 %v2337_v5, %v351_v31  ;;  %v705_v40 = vadd.f32 %v2337_v5, %v704_v36 }
 0x123   :  { %v2443_v41 = vmax.f32 %v405_v20, %v758_v23  ;;  %v406_v42 = vmax.f32 %v360_v24, 0.0  ;;  %v759_v43 = vmax.f32 %v713_v30, 0.0 }
 0x124   :  { %v2445_v44 = vmax.f32 %v403_v37, %v756_v38  ;;  %v404_v45 = vmax.f32 %v352_v39, 0.0  ;;  %v757_v46 = vmax.f32 %v705_v40, 0.0 }
 0x125   :  { %v2447_v47 = vmax.f32 %v406_v42, %v759_v43 }
 0x126   :  { %v2449_v48 = vmax.f32 %v404_v45, %v757_v46  ;;  %v1834_v49 = vpop.f32.mrb[28].mxu0  ;;  %v1868_v50 = vpop.f32.mrb[28].mxu1 }
 0x127   :  { %v373_v52 = vadd.f32 %v1834_v49, %v2337_v5  ;;  %v726_v53 = vadd.f32 %v1868_v50, %v2337_v5  ;;  %v364_v56 = vpop.f32.mrb[29].mxu0  ;;  %v717_v58 = vpop.f32.mrb[29].mxu1 }
 0x128   :  { %v365_v63 = vadd.f32 %v2337_v5, %v364_v56  ;;  %v718_v1 = vadd.f32 %v2337_v5, %v717_v58  ;;  %v1835_v2 = vpop.f32.mrb[30].mxu0  ;;  %v1869_v4 = vpop.f32.mrb[30].mxu1 }
 0x129   :  { %v409_v6 = vmax.f32 %v373_v52, 0.0  ;;  %v762_v9 = vmax.f32 %v726_v53, 0.0  ;;  %v376_v10 = vadd.f32 %v1835_v2, %v2337_v5  ;;  %v729_v11 = vadd.f32 %v1869_v4, %v2337_v5  ;;  %v367_v12 = vpop.f32.mrb[31].mxu0  ;;  %v720_v13 = vpop.f32.mrb[31].mxu1 }
 0x12a   :  { %v407_v14 = vmax.f32 %v365_v63, 0.0  ;;  %v760_v15 = vmax.f32 %v718_v1, 0.0  ;;  %v368_v16 = vadd.f32 %v2337_v5, %v367_v12  ;;  %v721_v17 = vadd.f32 %v2337_v5, %v720_v13 }
 0x12b   :  { %v2459_v18 = vmax.f32 %v409_v6, %v762_v9  ;;  %v410_v20 = vmax.f32 %v376_v10, 0.0  ;;  %v763_v23 = vmax.f32 %v729_v11, 0.0 }
 0x12c   :  { %v2461_v24 = vmax.f32 %v407_v14, %v760_v15  ;;  %v408_v30 = vmax.f32 %v368_v16, 0.0  ;;  %v761_v31 = vmax.f32 %v721_v17, 0.0 }
 0x12d   :  { %v2463_v36 = vmax.f32 %v410_v20, %v763_v23 }
 0x12e   :  { %v2465_v37 = vmax.f32 %v408_v30, %v761_v31  ;;  %v1874_v38 = vpop.f32.mrb[32].mxu0  ;;  %v1908_v39 = vpop.f32.mrb[32].mxu1 }
 0x12f   :  { %v999_v40 = vadd.f32 %v1874_v38, %v2337_v5  ;;  %v1352_v42 = vadd.f32 %v1908_v39, %v2337_v5  ;;  %v990_v43 = vpop.f32.mrb[33].mxu0  ;;  %v1343_v45 = vpop.f32.mrb[33].mxu1 }
 0x130   :  { %v991_v46 = vadd.f32 %v2337_v5, %v990_v43  ;;  %v1344_v49 = vadd.f32 %v2337_v5, %v1343_v45  ;;  %v1875_v50 = vpop.f32.mrb[34].mxu0  ;;  %v1909_v52 = vpop.f32.mrb[34].mxu1 }
 0x131   :  { %v1119_v53 = vmax.f32 %v999_v40, 0.0  ;;  %v1472_v56 = vmax.f32 %v1352_v42, 0.0  ;;  %v1002_v58 = vadd.f32 %v1875_v50, %v2337_v5  ;;  %v1355_v63 = vadd.f32 %v1909_v52, %v2337_v5  ;;  %v993_v1 = vpop.f32.mrb[35].mxu0  ;;  %v1346_v2 = vpop.f32.mrb[35].mxu1 }
 0x132   :  { %v1117_v4 = vmax.f32 %v991_v46, 0.0  ;;  %v1470_v6 = vmax.f32 %v1344_v49, 0.0  ;;  %v994_v9 = vadd.f32 %v2337_v5, %v993_v1  ;;  %v1347_v10 = vadd.f32 %v2337_v5, %v1346_v2 }
 0x133   :  { %v1504_v11 = vmax.f32 %v1119_v53, %v1472_v56  ;;  %v1120_v12 = vmax.f32 %v1002_v58, 0.0  ;;  %v1473_v13 = vmax.f32 %v1355_v63, 0.0 }
 0x134   :  { %v1502_v14 = vmax.f32 %v1117_v4, %v1470_v6  ;;  %v1118_v15 = vmax.f32 %v994_v9, 0.0  ;;  %v1471_v16 = vmax.f32 %v1347_v10, 0.0 }
 0x135   :  { %v1536_v17 = vmax.f32 %v2347_v26, %v1504_v11  ;;  %v1505_v20 = vmax.f32 %v1120_v12, %v1473_v13 }
 0x136   :  { %v1534_v23 = vmax.f32 %v2349_v29, %v1502_v14  ;;  %v1503_v30 = vmax.f32 %v1118_v15, %v1471_v16  ;;  %v1878_v31 = vpop.f32.mrb[36].mxu0  ;;  %v1912_v38 = vpop.f32.mrb[36].mxu1 }
 0x137   :  { %1569 = vst.msk [vmem:[%s2697_s6 + $0x10] sm:$0xff] %vm1566_vm3, %v1536_v17  ;;  %v1537_v39 = vmax.f32 %v2351_v32, %v1505_v20  ;;  %v1015_v40 = vadd.f32 %v1878_v31, %v2337_v5  ;;  %v1368_v42 = vadd.f32 %v1912_v38, %v2337_v5  ;;  %v1006_v43 = vpop.f32.mrb[37].mxu0  ;;  %v1359_v45 = vpop.f32.mrb[37].mxu1 }
 0x138   :  { %1567 = vst.msk [vmem:[%s2697_s6] sm:$0xff] %vm1566_vm3, %v1534_v23  ;;  %v1535_v26 = vmax.f32 %v2353_v33, %v1503_v30  ;;  %v1007_v29 = vadd.f32 %v2337_v5, %v1006_v43  ;;  %v1360_v46 = vadd.f32 %v2337_v5, %v1359_v45  ;;  %v1879_v49 = vpop.f32.mrb[38].mxu0  ;;  %v1913_v50 = vpop.f32.mrb[38].mxu1 }
 0x139   :  { %1570 = vst.msk [vmem:[%s2697_s6 + $0x18] sm:$0xff] %vm1566_vm3, %v1537_v39  ;;  %v1123_v32 = vmax.f32 %v1015_v40, 0.0  ;;  %v1476_v52 = vmax.f32 %v1368_v42, 0.0  ;;  %v1018_v53 = vadd.f32 %v1879_v49, %v2337_v5  ;;  %v1371_v56 = vadd.f32 %v1913_v50, %v2337_v5  ;;  %v1009_v58 = vpop.f32.mrb[39].mxu0  ;;  %v1362_v63 = vpop.f32.mrb[39].mxu1 }
 0x13a   :  { %1568 = vst.msk [vmem:[%s2697_s6 + $0x8] sm:$0xff] %vm1566_vm3, %v1535_v26  ;;  %v1121_v33 = vmax.f32 %v1007_v29, 0.0  ;;  %v1474_v1 = vmax.f32 %v1360_v46, 0.0  ;;  %v1010_v2 = vadd.f32 %v2337_v5, %v1009_v58  ;;  %v1363_v4 = vadd.f32 %v2337_v5, %v1362_v63 }
 0x13b   :  { %v1508_v6 = vmax.f32 %v1123_v32, %v1476_v52  ;;  %v1124_v9 = vmax.f32 %v1018_v53, 0.0  ;;  %v1477_v10 = vmax.f32 %v1371_v56, 0.0 }
 0x13c   :  { %v1506_v11 = vmax.f32 %v1121_v33, %v1474_v1  ;;  %v1122_v12 = vmax.f32 %v1010_v2, 0.0  ;;  %v1475_v13 = vmax.f32 %v1363_v4, 0.0 }
 0x13d   :  { %v1540_v14 = vmax.f32 %v2363_v54, %v1508_v6  ;;  %v1509_v15 = vmax.f32 %v1124_v9, %v1477_v10 }
 0x13e   :  { %v1538_v16 = vmax.f32 %v2365_v57, %v1506_v11  ;;  %v1507_v17 = vmax.f32 %v1122_v12, %v1475_v13  ;;  %v1882_v20 = vpop.f32.mrb[40].mxu0  ;;  %v1916_v23 = vpop.f32.mrb[40].mxu1 }
 0x13f   :  { %1573 = vst.msk [vmem:[%s2697_s6 + $0x30] sm:$0xff] %vm1566_vm3, %v1540_v14  ;;  %v1541_v30 = vmax.f32 %v2367_v60, %v1509_v15  ;;  %v1031_v31 = vadd.f32 %v1882_v20, %v2337_v5  ;;  %v1384_v38 = vadd.f32 %v1916_v23, %v2337_v5  ;;  %v1022_v39 = vpop.f32.mrb[41].mxu0  ;;  %v1375_v40 = vpop.f32.mrb[41].mxu1 }
 0x140   :  { %1571 = vst.msk [vmem:[%s2697_s6 + $0x20] sm:$0xff] %vm1566_vm3, %v1538_v16  ;;  %v1539_v54 = vmax.f32 %v2369_v61, %v1507_v17  ;;  %v1023_v57 = vadd.f32 %v2337_v5, %v1022_v39  ;;  %v1376_v42 = vadd.f32 %v2337_v5, %v1375_v40  ;;  %v1883_v43 = vpop.f32.mrb[42].mxu0  ;;  %v1917_v45 = vpop.f32.mrb[42].mxu1 }
 0x141   :  { %1574 = vst.msk [vmem:[%s2697_s6 + $0x38] sm:$0xff] %vm1566_vm3, %v1541_v30  ;;  %v1127_v60 = vmax.f32 %v1031_v31, 0.0  ;;  %v1480_v26 = vmax.f32 %v1384_v38, 0.0  ;;  %v1034_v29 = vadd.f32 %v1883_v43, %v2337_v5  ;;  %v1387_v46 = vadd.f32 %v1917_v45, %v2337_v5  ;;  %v1025_v49 = vpop.f32.mrb[43].mxu0  ;;  %v1378_v50 = vpop.f32.mrb[43].mxu1 }
 0x142   :  { %1572 = vst.msk [vmem:[%s2697_s6 + $0x28] sm:$0xff] %vm1566_vm3, %v1539_v54  ;;  %v1125_v61 = vmax.f32 %v1023_v57, 0.0  ;;  %v1478_v32 = vmax.f32 %v1376_v42, 0.0  ;;  %v1026_v52 = vadd.f32 %v2337_v5, %v1025_v49  ;;  %v1379_v53 = vadd.f32 %v2337_v5, %v1378_v50 }
 0x143   :  { %v1512_v56 = vmax.f32 %v1127_v60, %v1480_v26  ;;  %v1128_v58 = vmax.f32 %v1034_v29, 0.0  ;;  %v1481_v63 = vmax.f32 %v1387_v46, 0.0 }
 0x144   :  { %v1510_v33 = vmax.f32 %v1125_v61, %v1478_v32  ;;  %v1126_v1 = vmax.f32 %v1026_v52, 0.0  ;;  %v1479_v2 = vmax.f32 %v1379_v53, 0.0 }
 0x145   :  { %v1544_v4 = vmax.f32 %v2379_v19, %v1512_v56  ;;  %v1513_v6 = vmax.f32 %v1128_v58, %v1481_v63 }
 0x146   :  { %v1542_v9 = vmax.f32 %v2381_v22, %v1510_v33  ;;  %v1511_v10 = vmax.f32 %v1126_v1, %v1479_v2  ;;  %v1886_v11 = vpop.f32.mrb[44].mxu0  ;;  %v1920_v12 = vpop.f32.mrb[44].mxu1 }
 0x147   :  { %1577 = vst.msk [vmem:[%s2697_s6 + $0x50] sm:$0xff] %vm1566_vm3, %v1544_v4  ;;  %v1545_v13 = vmax.f32 %v2383_v25, %v1513_v6  ;;  %v1047_v14 = vadd.f32 %v1886_v11, %v2337_v5  ;;  %v1400_v15 = vadd.f32 %v1920_v12, %v2337_v5  ;;  %v1038_v16 = vpop.f32.mrb[45].mxu0  ;;  %v1391_v17 = vpop.f32.mrb[45].mxu1 }
 0x148   :  { %1575 = vst.msk [vmem:[%s2697_s6 + $0x40] sm:$0xff] %vm1566_vm3, %v1542_v9  ;;  %v1543_v19 = vmax.f32 %v2385_v27, %v1511_v10  ;;  %v1039_v22 = vadd.f32 %v2337_v5, %v1038_v16  ;;  %v1392_v20 = vadd.f32 %v2337_v5, %v1391_v17  ;;  %v1887_v23 = vpop.f32.mrb[46].mxu0  ;;  %v1921_v30 = vpop.f32.mrb[46].mxu1 }
 0x149   :  { %1578 = vst.msk [vmem:[%s2697_s6 + $0x58] sm:$0xff] %vm1566_vm3, %v1545_v13  ;;  %v1131_v25 = vmax.f32 %v1047_v14, 0.0  ;;  %v1484_v31 = vmax.f32 %v1400_v15, 0.0  ;;  %v1050_v38 = vadd.f32 %v1887_v23, %v2337_v5  ;;  %v1403_v39 = vadd.f32 %v1921_v30, %v2337_v5  ;;  %v1041_v40 = vpop.f32.mrb[47].mxu0  ;;  %v1394_v54 = vpop.f32.mrb[47].mxu1 }
 0x14a   :  { %1576 = vst.msk [vmem:[%s2697_s6 + $0x48] sm:$0xff] %vm1566_vm3, %v1543_v19  ;;  %v1129_v27 = vmax.f32 %v1039_v22, 0.0  ;;  %v1482_v57 = vmax.f32 %v1392_v20, 0.0  ;;  %v1042_v42 = vadd.f32 %v2337_v5, %v1041_v40  ;;  %v1395_v43 = vadd.f32 %v2337_v5, %v1394_v54 }
 0x14b   :  { %v1516_v45 = vmax.f32 %v1131_v25, %v1484_v31  ;;  %v1132_v60 = vmax.f32 %v1050_v38, 0.0  ;;  %v1485_v26 = vmax.f32 %v1403_v39, 0.0 }
 0x14c   :  { %v1514_v29 = vmax.f32 %v1129_v27, %v1482_v57  ;;  %v1130_v46 = vmax.f32 %v1042_v42, 0.0  ;;  %v1483_v49 = vmax.f32 %v1395_v43, 0.0 }
 0x14d   :  { %v1548_v50 = vmax.f32 %v2395_v51, %v1516_v45  ;;  %v1517_v61 = vmax.f32 %v1132_v60, %v1485_v26 }
 0x14e   :  { %v1546_v32 = vmax.f32 %v2397_v55, %v1514_v29  ;;  %v1515_v52 = vmax.f32 %v1130_v46, %v1483_v49  ;;  %v1890_v53 = vpop.f32.mrb[48].mxu0  ;;  %v1924_v56 = vpop.f32.mrb[48].mxu1 }
 0x14f   :  { %1581 = vst.msk [vmem:[%s2697_s6 + $0x70] sm:$0xff] %vm1566_vm3, %v1548_v50  ;;  %v1549_v58 = vmax.f32 %v2399_v59, %v1517_v61  ;;  %v1063_v63 = vadd.f32 %v1890_v53, %v2337_v5  ;;  %v1416_v33 = vadd.f32 %v1924_v56, %v2337_v5  ;;  %v1054_v1 = vpop.f32.mrb[49].mxu0  ;;  %v1407_v2 = vpop.f32.mrb[49].mxu1 }
 0x150   :  { %1579 = vst.msk [vmem:[%s2697_s6 + $0x60] sm:$0xff] %vm1566_vm3, %v1546_v32  ;;  %v1547_v51 = vmax.f32 %v2401_v62, %v1515_v52  ;;  %v1055_v55 = vadd.f32 %v2337_v5, %v1054_v1  ;;  %v1408_v4 = vadd.f32 %v2337_v5, %v1407_v2  ;;  %v1891_v6 = vpop.f32.mrb[50].mxu0  ;;  %v1925_v9 = vpop.f32.mrb[50].mxu1 }
 0x151   :  { %1582 = vst.msk [vmem:[%s2697_s6 + $0x78] sm:$0xff] %vm1566_vm3, %v1549_v58  ;;  %v1135_v59 = vmax.f32 %v1063_v63, 0.0  ;;  %v1488_v10 = vmax.f32 %v1416_v33, 0.0  ;;  %v1066_v11 = vadd.f32 %v1891_v6, %v2337_v5  ;;  %v1419_v12 = vadd.f32 %v1925_v9, %v2337_v5  ;;  %v1057_v13 = vpop.f32.mrb[51].mxu0  ;;  %v1410_v14 = vpop.f32.mrb[51].mxu1 }
 0x152   :  { %1580 = vst.msk [vmem:[%s2697_s6 + $0x68] sm:$0xff] %vm1566_vm3, %v1547_v51  ;;  %v1133_v62 = vmax.f32 %v1055_v55, 0.0  ;;  %v1486_v15 = vmax.f32 %v1408_v4, 0.0  ;;  %v1058_v16 = vadd.f32 %v2337_v5, %v1057_v13  ;;  %v1411_v17 = vadd.f32 %v2337_v5, %v1410_v14 }
 0x153   :  { %v1520_v19 = vmax.f32 %v1135_v59, %v1488_v10  ;;  %v1136_v22 = vmax.f32 %v1066_v11, 0.0  ;;  %v1489_v20 = vmax.f32 %v1419_v12, 0.0 }
 0x154   :  { %v1518_v23 = vmax.f32 %v1133_v62, %v1486_v15  ;;  %v1134_v30 = vmax.f32 %v1058_v16, 0.0  ;;  %v1487_v25 = vmax.f32 %v1411_v17, 0.0 }
 0x155   :  { %v1552_v31 = vmax.f32 %v2411_v21, %v1520_v19  ;;  %v1521_v38 = vmax.f32 %v1136_v22, %v1489_v20 }
 0x156   :  { %v1550_v39 = vmax.f32 %v2413_v28, %v1518_v23  ;;  %v1519_v40 = vmax.f32 %v1134_v30, %v1487_v25  ;;  %v1894_v54 = vpop.f32.mrb[52].mxu0  ;;  %v1928_v27 = vpop.f32.mrb[52].mxu1 }
 0x157   :  { %1585 = vst.msk [vmem:[%s2697_s6 + $0x90] sm:$0xff] %vm1566_vm3, %v1552_v31  ;;  %v1553_v57 = vmax.f32 %v2415_v34, %v1521_v38  ;;  %v1079_v42 = vadd.f32 %v1894_v54, %v2337_v5  ;;  %v1432_v43 = vadd.f32 %v1928_v27, %v2337_v5  ;;  %v1070_v45 = vpop.f32.mrb[53].mxu0  ;;  %v1423_v60 = vpop.f32.mrb[53].mxu1 }
 0x158   :  { %1583 = vst.msk [vmem:[%s2697_s6 + $0x80] sm:$0xff] %vm1566_vm3, %v1550_v39  ;;  %v1551_v21 = vmax.f32 %v2417_v35, %v1519_v40  ;;  %v1071_v28 = vadd.f32 %v2337_v5, %v1070_v45  ;;  %v1424_v26 = vadd.f32 %v2337_v5, %v1423_v60  ;;  %v1895_v29 = vpop.f32.mrb[54].mxu0  ;;  %v1929_v46 = vpop.f32.mrb[54].mxu1 }
 0x159   :  { %1586 = vst.msk [vmem:[%s2697_s6 + $0x98] sm:$0xff] %vm1566_vm3, %v1553_v57  ;;  %v1139_v34 = vmax.f32 %v1079_v42, 0.0  ;;  %v1492_v49 = vmax.f32 %v1432_v43, 0.0  ;;  %v1082_v50 = vadd.f32 %v1895_v29, %v2337_v5  ;;  %v1435_v61 = vadd.f32 %v1929_v46, %v2337_v5  ;;  %v1073_v32 = vpop.f32.mrb[55].mxu0  ;;  %v1426_v52 = vpop.f32.mrb[55].mxu1 }
 0x15a   :  { %1584 = vst.msk [vmem:[%s2697_s6 + $0x88] sm:$0xff] %vm1566_vm3, %v1551_v21  ;;  %v1137_v35 = vmax.f32 %v1071_v28, 0.0  ;;  %v1490_v53 = vmax.f32 %v1424_v26, 0.0  ;;  %v1074_v56 = vadd.f32 %v2337_v5, %v1073_v32  ;;  %v1427_v58 = vadd.f32 %v2337_v5, %v1426_v52 }
 0x15b   :  { %v1524_v63 = vmax.f32 %v1139_v34, %v1492_v49  ;;  %v1140_v33 = vmax.f32 %v1082_v50, 0.0  ;;  %v1493_v1 = vmax.f32 %v1435_v61, 0.0 }
 0x15c   :  { %v1522_v2 = vmax.f32 %v1137_v35, %v1490_v53  ;;  %v1138_v51 = vmax.f32 %v1074_v56, 0.0  ;;  %v1491_v55 = vmax.f32 %v1427_v58, 0.0 }
 0x15d   :  { %v1556_v4 = vmax.f32 %v2427_v0, %v1524_v63  ;;  %v1525_v6 = vmax.f32 %v1140_v33, %v1493_v1 }
 0x15e   :  { %v1554_v9 = vmax.f32 %v2429_v3, %v1522_v2  ;;  %v1523_v59 = vmax.f32 %v1138_v51, %v1491_v55  ;;  %v1898_v10 = vpop.f32.mrb[56].mxu0  ;;  %v1932_v11 = vpop.f32.mrb[56].mxu1 }
 0x15f   :  { %1589 = vst.msk [vmem:[%s2697_s6 + $0xb0] sm:$0xff] %vm1566_vm3, %v1556_v4  ;;  %v1557_v12 = vmax.f32 %v2431_v7, %v1525_v6  ;;  %v1095_v13 = vadd.f32 %v1898_v10, %v2337_v5  ;;  %v1448_v14 = vadd.f32 %v1932_v11, %v2337_v5  ;;  %v1086_v62 = vpop.f32.mrb[57].mxu0  ;;  %v1439_v15 = vpop.f32.mrb[57].mxu1 }
 0x160   :  { %1587 = vst.msk [vmem:[%s2697_s6 + $0xa0] sm:$0xff] %vm1566_vm3, %v1554_v9  ;;  %v1555_v0 = vmax.f32 %v2433_v8, %v1523_v59  ;;  %v1087_v3 = vadd.f32 %v2337_v5, %v1086_v62  ;;  %v1440_v16 = vadd.f32 %v2337_v5, %v1439_v15  ;;  %v1899_v17 = vpop.f32.mrb[58].mxu0  ;;  %v1933_v19 = vpop.f32.mrb[58].mxu1 }
 0x161   :  { %1590 = vst.msk [vmem:[%s2697_s6 + $0xb8] sm:$0xff] %vm1566_vm3, %v1557_v12  ;;  %v1143_v7 = vmax.f32 %v1095_v13, 0.0  ;;  %v1496_v22 = vmax.f32 %v1448_v14, 0.0  ;;  %v1098_v20 = vadd.f32 %v1899_v17, %v2337_v5  ;;  %v1451_v23 = vadd.f32 %v1933_v19, %v2337_v5  ;;  %v1089_v30 = vpop.f32.mrb[59].mxu0  ;;  %v1442_v25 = vpop.f32.mrb[59].mxu1 }
 0x162   :  { %1588 = vst.msk [vmem:[%s2697_s6 + $0xa8] sm:$0xff] %vm1566_vm3, %v1555_v0  ;;  %v1141_v8 = vmax.f32 %v1087_v3, 0.0  ;;  %v1494_v31 = vmax.f32 %v1440_v16, 0.0  ;;  %v1090_v38 = vadd.f32 %v2337_v5, %v1089_v30  ;;  %v1443_v39 = vadd.f32 %v2337_v5, %v1442_v25 }
 0x163   :  { %v1528_v40 = vmax.f32 %v1143_v7, %v1496_v22  ;;  %v1144_v54 = vmax.f32 %v1098_v20, 0.0  ;;  %v1497_v27 = vmax.f32 %v1451_v23, 0.0 }
 0x164   :  { %v1526_v57 = vmax.f32 %v1141_v8, %v1494_v31  ;;  %v1142_v42 = vmax.f32 %v1090_v38, 0.0  ;;  %v1495_v43 = vmax.f32 %v1443_v39, 0.0 }
 0x165   :  { %v1560_v45 = vmax.f32 %v2443_v41, %v1528_v40  ;;  %v1529_v60 = vmax.f32 %v1144_v54, %v1497_v27 }
 0x166   :  { %v1558_v21 = vmax.f32 %v2445_v44, %v1526_v57  ;;  %v1527_v28 = vmax.f32 %v1142_v42, %v1495_v43  ;;  %v1902_v26 = vpop.f32.mrb[60].mxu0  ;;  %v1936_v29 = vpop.f32.mrb[60].mxu1 }
 0x167   :  { %1593 = vst.msk [vmem:[%s2697_s6 + $0xd0] sm:$0xff] %vm1566_vm3, %v1560_v45  ;;  %v1561_v46 = vmax.f32 %v2447_v47, %v1529_v60  ;;  %v1111_v34 = vadd.f32 %v1902_v26, %v2337_v5  ;;  %v1464_v49 = vadd.f32 %v1936_v29, %v2337_v5  ;;  %v1102_v50 = vpop.f32.mrb[61].mxu0  ;;  %v1455_v61 = vpop.f32.mrb[61].mxu1 }
 0x168   :  { %1591 = vst.msk [vmem:[%s2697_s6 + $0xc0] sm:$0xff] %vm1566_vm3, %v1558_v21  ;;  %v1559_v41 = vmax.f32 %v2449_v48, %v1527_v28  ;;  %v1103_v44 = vadd.f32 %v2337_v5, %v1102_v50  ;;  %v1456_v32 = vadd.f32 %v2337_v5, %v1455_v61  ;;  %v1903_v52 = vpop.f32.mrb[62].mxu0  ;;  %v1937_v35 = vpop.f32.mrb[62].mxu1 }
 0x169   :  { %1594 = vst.msk [vmem:[%s2697_s6 + $0xd8] sm:$0xff] %vm1566_vm3, %v1561_v46  ;;  %v1147_v47 = vmax.f32 %v1111_v34, 0.0  ;;  %v1500_v53 = vmax.f32 %v1464_v49, 0.0  ;;  %v1114_v56 = vadd.f32 %v1903_v52, %v2337_v5  ;;  %v1467_v58 = vadd.f32 %v1937_v35, %v2337_v5  ;;  %v1105_v63 = vpop.f32.mrb[63].mxu0  ;;  %v1458_v33 = vpop.f32.mrb[63].mxu1 }
 0x16a   :  { %1592 = vst.msk [vmem:[%s2697_s6 + $0xc8] sm:$0xff] %vm1566_vm3, %v1559_v41  ;;  %v1145_v48 = vmax.f32 %v1103_v44, 0.0  ;;  %v1498_v1 = vmax.f32 %v1456_v32, 0.0  ;;  %v1106_v2 = vadd.f32 %v2337_v5, %v1105_v63  ;;  %v1459_v51 = vadd.f32 %v2337_v5, %v1458_v33 }
 0x16b   :  { %v1532_v55 = vmax.f32 %v1147_v47, %v1500_v53  ;;  %v1148_v4 = vmax.f32 %v1114_v56, 0.0  ;;  %v1501_v6 = vmax.f32 %v1467_v58, 0.0 }
 0x16c   :  { %v1530_v9 = vmax.f32 %v1145_v48, %v1498_v1  ;;  %v1146_v59 = vmax.f32 %v1106_v2, 0.0  ;;  %v1499_v10 = vmax.f32 %v1459_v51, 0.0 }
 0x16d   :  { %v1564_v11 = vmax.f32 %v2459_v18, %v1532_v55  ;;  %v1533_v12 = vmax.f32 %v1148_v4, %v1501_v6 }
 0x16e   :  { %v1562_v13 = vmax.f32 %v2461_v24, %v1530_v9  ;;  %v1531_v14 = vmax.f32 %v1146_v59, %v1499_v10 }
 0x16f   :  { %1597 = vst.msk [vmem:[%s2697_s6 + $0xf0] sm:$0xff] %vm1566_vm3, %v1564_v11  ;;  %v1565_v62 = vmax.f32 %v2463_v36, %v1533_v12 }
 0x170   :  { %1595 = vst.msk [vmem:[%s2697_s6 + $0xe0] sm:$0xff] %vm1566_vm3, %v1562_v13  ;;  %v1563_v5 = vmax.f32 %v2465_v37, %v1531_v14 }
 0x171   :  { %1598 = vst.msk [vmem:[%s2697_s6 + $0xf8] sm:$0xff] %vm1566_vm3, %v1565_v62 }
 0x172   :  { %1596 = vst.msk [vmem:[%s2697_s6 + $0xe8] sm:$0xff] %vm1566_vm3, %v1563_v5 }
 0x173   :  { %1603 = vsyncpa [#allocation3], 1 }

// kernel: forward.6
= control target key start
LH: loop header
LB: loop body
LE: loop exit
PB: predicated region body
PF: predicated region fallthrough
CT: control target
= control target key end

     0   :  { %v773_v0 = vmov 0   ;;  %vm147_vm0 = vcmask 130048   ;;  %vm644_vm1 = vcmask 261120   ;;  %s1125_s4 = inlined_call_operand.vmem [shape: bf16[144,32], index: 4, kind: input, shape index: {}]   ;;  %s1126_s0 = inlined_call_operand.vmem [shape: bf16[64,144], index: 0, kind: input, shape index: {}]   ;;  %s1127_s1 = inlined_call_operand.vmem [shape: bf16[64,144], index: 1, kind: input, shape index: {}]   ;;  %s1128_s2 = inlined_call_operand.vmem [shape: bf16[64,144], index: 2, kind: input, shape index: {}]   ;;  %s1129_s3 = inlined_call_operand.vmem [shape: bf16[64,144], index: 3, kind: input, shape index: {}]   ;;  %s1130_s5 = inlined_call_operand.vmem [shape: f32[1,32], index: 5, kind: input, shape index: {}]   ;;  %s1131_s6 = inlined_call_operand.vmem [shape: f32[64,32], index: 6, kind: output, shape index: {}]  }
   0x1   :  { %160 = vmatprep.subr.bf16.mxu0 %v773_v0  ;;  %289 = vmatprep.subr.bf16.mxu1 %v773_v0  ;;  %v716_v1 = vld [vmem:[%s1125_s4] sm:$0xff]   ;;  %v817_v2 = vld [vmem:[%s1125_s4 + $0x8] sm:$0xff]   ;;  %v826_v3 = vld [vmem:[%s1125_s4 + $0x10] sm:$0xff]  }
   0x2   :  { %161 = vmatpush1.bf16.msra.mxu0 %v716_v1  ;;  %290 = vmatpush1.bf16.msra.mxu1 %v716_v1  ;;  %v833_v4 = vld [vmem:[%s1125_s4 + $0x18] sm:$0xff]   ;;  %v727_v5 = vld [vmem:[%s1126_s0 + $0x4] ss:$8 sps:$4 sm:$0xff]   ;;  %v870_v9 = vld [vmem:[%s1125_s4 + $0x30] sm:$0xff]  }
   0x3   :  { %162 = vmatprep.subr.bf16.mxu0 %v773_v0  ;;  %291 = vmatprep.subr.bf16.mxu1 %v773_v0  ;;  %v730_v6 = vld [vmem:[%s1127_s1 + $0x4] ss:$8 sps:$4 sm:$0xff]   ;;  %v879_v10 = vld [vmem:[%s1125_s4 + $0x38] sm:$0xff]   ;;  %v725_v12 = vld [vmem:[%s1126_s0] ss:$8 sps:$4 sm:$0xff]  }
   0x4   :  { %675 = vmatprep.mubr.msk.bf16.mxu0 %vm147_vm0, %v727_v5  ;;  %687 = vmatprep.mubr.msk.bf16.mxu1 %vm147_vm0, %v730_v6  ;;  %v852_v7 = vld [vmem:[%s1125_s4 + $0x20] sm:$0xff]   ;;  %v861_v8 = vld [vmem:[%s1125_s4 + $0x28] sm:$0xff]   ;;  %v731_v14 = vld [vmem:[%s1126_s0 + $0x14] ss:$8 sps:$4 sm:$0xff]  }
   0x5   :  { %v888_v11 = vld [vmem:[%s1125_s4 + $0x40] sm:$0xff]   ;;  %v733_v15 = vld [vmem:[%s1127_s1 + $0x14] ss:$8 sps:$4 sm:$0xff]   ;;  %v735_v16 = vld [vmem:[%s1126_s0 + $0x10] ss:$8 sps:$4 sm:$0xff]  }
   0x6   :  { %163 = vmatpush1.bf16.msra.mxu0 %v817_v2  ;;  %292 = vmatpush1.bf16.msra.mxu1 %v817_v2  ;;  %v728_v13 = vld [vmem:[%s1127_s1] ss:$8 sps:$4 sm:$0xff]   ;;  %v736_v17 = vld [vmem:[%s1127_s1 + $0x10] ss:$8 sps:$4 sm:$0xff]   ;;  %v737_v18 = vld [vmem:[%s1126_s0 + $0x24] ss:$8 sps:$4 sm:$0xff]  }
   0x7   :  { %164 = vmatprep.subr.bf16.mxu0 %v773_v0  ;;  %293 = vmatprep.subr.bf16.mxu1 %v773_v0  ;;  %v739_v19 = vld [vmem:[%s1127_s1 + $0x24] ss:$8 sps:$4 sm:$0xff]   ;;  %v741_v20 = vld [vmem:[%s1126_s0 + $0x20] ss:$8 sps:$4 sm:$0xff]   ;;  %v743_v22 = vld [vmem:[%s1126_s0 + $0x34] ss:$8 sps:$4 sm:$0xff]  }
   0x8   :  { %v742_v21 = vld [vmem:[%s1127_s1 + $0x20] ss:$8 sps:$4 sm:$0xff]   ;;  %v745_v23 = vld [vmem:[%s1127_s1 + $0x34] ss:$8 sps:$4 sm:$0xff]   ;;  %v747_v24 = vld [vmem:[%s1126_s0 + $0x30] ss:$8 sps:$4 sm:$0xff]  }
   0x9   :  { %v748_v25 = vld [vmem:[%s1127_s1 + $0x30] ss:$8 sps:$4 sm:$0xff]   ;;  %v751_v26 = vld [vmem:[%s1128_s2 + $0x4] ss:$8 sps:$4 sm:$0xff]   ;;  %v749_v28 = vld [vmem:[%s1128_s2] ss:$8 sps:$4 sm:$0xff]  }
   0xa   :  { %165 = vmatpush1.bf16.msra.mxu0 %v826_v3  ;;  %294 = vmatpush1.bf16.msra.mxu1 %v826_v3  ;;  %v754_v27 = vld [vmem:[%s1129_s3 + $0x4] ss:$8 sps:$4 sm:$0xff]   ;;  %v752_v29 = vld [vmem:[%s1129_s3] ss:$8 sps:$4 sm:$0xff]   ;;  %v755_v30 = vld [vmem:[%s1128_s2 + $0x14] ss:$8 sps:$4 sm:$0xff]  }
   0xb   :  { %166 = vmatprep.subr.bf16.mxu0 %v773_v0  ;;  %295 = vmatprep.subr.bf16.mxu1 %v773_v0  ;;  %v757_v31 = vld [vmem:[%s1129_s3 + $0x14] ss:$8 sps:$4 sm:$0xff]   ;;  %v759_v32 = vld [vmem:[%s1128_s2 + $0x10] ss:$8 sps:$4 sm:$0xff]   ;;  %v761_v34 = vld [vmem:[%s1128_s2 + $0x24] ss:$8 sps:$4 sm:$0xff]  }
   0xc   :  { %v760_v33 = vld [vmem:[%s1129_s3 + $0x10] ss:$8 sps:$4 sm:$0xff]   ;;  %v763_v35 = vld [vmem:[%s1129_s3 + $0x24] ss:$8 sps:$4 sm:$0xff]   ;;  %v765_v36 = vld [vmem:[%s1128_s2 + $0x20] ss:$8 sps:$4 sm:$0xff]  }
   0xd   :  { %v766_v37 = vld [vmem:[%s1129_s3 + $0x20] ss:$8 sps:$4 sm:$0xff]   ;;  %v767_v38 = vld [vmem:[%s1128_s2 + $0x34] ss:$8 sps:$4 sm:$0xff]   ;;  %v771_v40 = vld [vmem:[%s1128_s2 + $0x30] ss:$8 sps:$4 sm:$0xff]  }
   0xe   :  { %167 = vmatpush1.bf16.msra.mxu0 %v833_v4  ;;  %296 = vmatpush1.bf16.msra.mxu1 %v833_v4  ;;  %v769_v39 = vld [vmem:[%s1129_s3 + $0x34] ss:$8 sps:$4 sm:$0xff]   ;;  %v772_v41 = vld [vmem:[%s1129_s3 + $0x30] ss:$8 sps:$4 sm:$0xff]   ;;  %v1035_v42 = vld [vmem:[%s1130_s5] ss:$0 sm:$0xff] }
   0xf   :  { %168 = vmatprep.subr.bf16.mxu0 %v773_v0  ;;  %297 = vmatprep.subr.bf16.mxu1 %v773_v0 }
  0x12   :  { %169 = vmatpush1.bf16.msra.mxu0 %v852_v7  ;;  %298 = vmatpush1.bf16.msra.mxu1 %v852_v7 }
  0x13   :  { %170 = vmatprep.subr.bf16.mxu0 %v773_v0  ;;  %299 = vmatprep.subr.bf16.mxu1 %v773_v0 }
  0x16   :  { %171 = vmatpush1.bf16.msra.mxu0 %v861_v8  ;;  %300 = vmatpush1.bf16.msra.mxu1 %v861_v8 }
  0x17   :  { %172 = vmatprep.subr.bf16.mxu0 %v773_v0  ;;  %301 = vmatprep.subr.bf16.mxu1 %v773_v0 }
  0x1a   :  { %173 = vmatpush1.bf16.msra.mxu0 %v870_v9  ;;  %302 = vmatpush1.bf16.msra.mxu1 %v870_v9 }
  0x1b   :  { %174 = vmatprep.subr.bf16.mxu0 %v773_v0  ;;  %303 = vmatprep.subr.bf16.mxu1 %v773_v0 }
  0x1e   :  { %175 = vmatpush1.bf16.msra.mxu0 %v879_v10  ;;  %304 = vmatpush1.bf16.msra.mxu1 %v879_v10 }
  0x1f   :  { %176 = vmatprep.subr.bf16.mxu0 %v773_v0  ;;  %305 = vmatprep.subr.bf16.mxu1 %v773_v0 }
  0x22   :  { %177 = vmatpush1.bf16.msra.mxu0 %v888_v11  ;;  %306 = vmatpush1.bf16.msra.mxu1 %v888_v11 }
  0x23   :  { %426 = vmatprep.subr.bf16.mxu0 %v773_v0  ;;  %555 = vmatprep.subr.bf16.mxu1 %v773_v0 }
  0x25   :  { %193 = vmatmul.mubr.bf16.vlgmr.msra.gmra.mrb[0].mxu0 %v725_v12  ;;  %322 = vmatmul.mubr.bf16.vlgmr.msra.gmra.mrb[0].mxu1 %v728_v13 }
  0x26   :  { %427 = vmatpush1.bf16.msra.mxu0 %v716_v1  ;;  %556 = vmatpush1.bf16.msra.mxu1 %v716_v1 }
  0x27   :  { %428 = vmatprep.subr.bf16.mxu0 %v773_v0  ;;  %557 = vmatprep.subr.bf16.mxu1 %v773_v0 }
  0x28   :  { %676 = vmatprep.mubr.msk.bf16.mxu0 %vm147_vm0, %v731_v14  ;;  %688 = vmatprep.mubr.msk.bf16.mxu1 %vm147_vm0, %v733_v15 }
  0x2a   :  { %429 = vmatpush1.bf16.msra.mxu0 %v817_v2  ;;  %558 = vmatpush1.bf16.msra.mxu1 %v817_v2 }
  0x2b   :  { %430 = vmatprep.subr.bf16.mxu0 %v773_v0  ;;  %559 = vmatprep.subr.bf16.mxu1 %v773_v0 }
  0x2d   :  { %201 = vmatmul.mubr.bf16.gmra.mrb[4].mxu0 %v735_v16  ;;  %330 = vmatmul.mubr.bf16.gmra.mrb[4].mxu1 %v736_v17 }
  0x2e   :  { %431 = vmatpush1.bf16.msra.mxu0 %v826_v3  ;;  %560 = vmatpush1.bf16.msra.mxu1 %v826_v3 }
  0x2f   :  { %432 = vmatprep.subr.bf16.mxu0 %v773_v0  ;;  %561 = vmatprep.subr.bf16.mxu1 %v773_v0 }
  0x30   :  { %677 = vmatprep.mubr.msk.bf16.mxu0 %vm147_vm0, %v737_v18  ;;  %689 = vmatprep.mubr.msk.bf16.mxu1 %vm147_vm0, %v739_v19 }
  0x32   :  { %433 = vmatpush1.bf16.msra.mxu0 %v833_v4  ;;  %562 = vmatpush1.bf16.msra.mxu1 %v833_v4 }
  0x33   :  { %434 = vmatprep.subr.bf16.mxu0 %v773_v0  ;;  %563 = vmatprep.subr.bf16.mxu1 %v773_v0 }
  0x35   :  { %209 = vmatmul.mubr.bf16.gmra.mrb[8].mxu0 %v741_v20  ;;  %338 = vmatmul.mubr.bf16.gmra.mrb[8].mxu1 %v742_v21 }
  0x36   :  { %435 = vmatpush1.bf16.msra.mxu0 %v852_v7  ;;  %564 = vmatpush1.bf16.msra.mxu1 %v852_v7 }
  0x37   :  { %436 = vmatprep.subr.bf16.mxu0 %v773_v0  ;;  %565 = vmatprep.subr.bf16.mxu1 %v773_v0 }
  0x38   :  { %678 = vmatprep.mubr.msk.bf16.mxu0 %vm147_vm0, %v743_v22  ;;  %690 = vmatprep.mubr.msk.bf16.mxu1 %vm147_vm0, %v745_v23 }
  0x3a   :  { %437 = vmatpush1.bf16.msra.mxu0 %v861_v8  ;;  %566 = vmatpush1.bf16.msra.mxu1 %v861_v8 }
  0x3b   :  { %438 = vmatprep.subr.bf16.mxu0 %v773_v0  ;;  %567 = vmatprep.subr.bf16.mxu1 %v773_v0 }
  0x3d   :  { %217 = vmatmul.mubr.bf16.gmra.mrb[12].mxu0 %v747_v24  ;;  %346 = vmatmul.mubr.bf16.gmra.mrb[12].mxu1 %v748_v25 }
  0x3e   :  { %439 = vmatpush1.bf16.msra.mxu0 %v870_v9  ;;  %568 = vmatpush1.bf16.msra.mxu1 %v870_v9 }
  0x3f   :  { %440 = vmatprep.subr.bf16.mxu0 %v773_v0  ;;  %569 = vmatprep.subr.bf16.mxu1 %v773_v0 }
  0x40   :  { %699 = vmatprep.mubr.msk.bf16.mxu0 %vm147_vm0, %v751_v26  ;;  %711 = vmatprep.mubr.msk.bf16.mxu1 %vm147_vm0, %v754_v27 }
  0x42   :  { %441 = vmatpush1.bf16.msra.mxu0 %v879_v10  ;;  %570 = vmatpush1.bf16.msra.mxu1 %v879_v10 }
  0x43   :  { %442 = vmatprep.subr.bf16.mxu0 %v773_v0  ;;  %571 = vmatprep.subr.bf16.mxu1 %v773_v0 }
  0x46   :  { %443 = vmatpush1.bf16.msra.mxu0 %v888_v11  ;;  %572 = vmatpush1.bf16.msra.mxu1 %v888_v11 }
  0x49   :  { %459 = vmatmul.mubr.bf16.vlgmr.msra.gmra.mrb[16].mxu0 %v749_v28  ;;  %588 = vmatmul.mubr.bf16.vlgmr.msra.gmra.mrb[16].mxu1 %v752_v29 }
  0x4a   :  { %700 = vmatprep.mubr.msk.bf16.mxu0 %vm147_vm0, %v755_v30  ;;  %712 = vmatprep.mubr.msk.bf16.mxu1 %vm147_vm0, %v757_v31 }
  0x51   :  { %467 = vmatmul.mubr.bf16.gmra.mrb[20].mxu0 %v759_v32  ;;  %596 = vmatmul.mubr.bf16.gmra.mrb[20].mxu1 %v760_v33 }
  0x52   :  { %701 = vmatprep.mubr.msk.bf16.mxu0 %vm147_vm0, %v761_v34  ;;  %713 = vmatprep.mubr.msk.bf16.mxu1 %vm147_vm0, %v763_v35 }
  0x59   :  { %475 = vmatmul.mubr.bf16.gmra.mrb[24].mxu0 %v765_v36  ;;  %604 = vmatmul.mubr.bf16.gmra.mrb[24].mxu1 %v766_v37 }
  0x5a   :  { %702 = vmatprep.mubr.msk.bf16.mxu0 %vm147_vm0, %v767_v38  ;;  %714 = vmatprep.mubr.msk.bf16.mxu1 %vm147_vm0, %v769_v39 }
  0x61   :  { %483 = vmatmul.mubr.bf16.gmra.mrb[28].mxu0 %v771_v40  ;;  %612 = vmatmul.mubr.bf16.gmra.mrb[28].mxu1 %v772_v41 }
  0xf8   :  { %v194_v43 = vpop.f32.mrb[0].mxu0  ;;  %v323_v44 = vpop.f32.mrb[0].mxu1 }
  0xf9   :  { %v195_v45 = vadd.f32 %v1035_v42, %v194_v43  ;;  %v324_v46 = vadd.f32 %v1035_v42, %v323_v44  ;;  %v196_v47 = vpop.f32.mrb[1].mxu0  ;;  %v325_v48 = vpop.f32.mrb[1].mxu1 }
  0xfa   :  { %v197_v49 = vpop.f32.mrb[2].mxu0  ;;  %v326_v50 = vpop.f32.mrb[2].mxu1 }
  0xfb   :  { %v225_v51 = vmax.f32 %v195_v45, 0.0  ;;  %v354_v52 = vmax.f32 %v324_v46, 0.0  ;;  %v198_v53 = vadd.f32 %v1035_v42, %v197_v49  ;;  %v327_v54 = vadd.f32 %v1035_v42, %v326_v50  ;;  %v199_v55 = vpop.f32.mrb[3].mxu0  ;;  %v328_v56 = vpop.f32.mrb[3].mxu1 }
  0xfd   :  { %v1041_v57 = vmax.f32 %v225_v51, %v354_v52  ;;  %v226_v58 = vmax.f32 %v198_v53, 0.0  ;;  %v355_v59 = vmax.f32 %v327_v54, 0.0 }
  0xff   :  { %v1043_v60 = vmax.f32 %v226_v58, %v355_v59 }
 0x100   :  { %v202_v61 = vpop.f32.mrb[4].mxu0  ;;  %v331_v62 = vpop.f32.mrb[4].mxu1 }
 0x101   :  { %v203_v63 = vadd.f32 %v1035_v42, %v202_v61  ;;  %v332_v0 = vadd.f32 %v1035_v42, %v331_v62  ;;  %v204_v1 = vpop.f32.mrb[5].mxu0  ;;  %v333_v2 = vpop.f32.mrb[5].mxu1 }
 0x102   :  { %v205_v3 = vpop.f32.mrb[6].mxu0  ;;  %v334_v4 = vpop.f32.mrb[6].mxu1 }
 0x103   :  { %v227_v5 = vmax.f32 %v203_v63, 0.0  ;;  %v356_v6 = vmax.f32 %v332_v0, 0.0  ;;  %v206_v7 = vadd.f32 %v1035_v42, %v205_v3  ;;  %v335_v8 = vadd.f32 %v1035_v42, %v334_v4  ;;  %v207_v9 = vpop.f32.mrb[7].mxu0  ;;  %v336_v10 = vpop.f32.mrb[7].mxu1 }
 0x105   :  { %v1049_v11 = vmax.f32 %v227_v5, %v356_v6  ;;  %v228_v12 = vmax.f32 %v206_v7, 0.0  ;;  %v357_v13 = vmax.f32 %v335_v8, 0.0 }
 0x107   :  { %v1051_v14 = vmax.f32 %v228_v12, %v357_v13 }
 0x108   :  { %v210_v15 = vpop.f32.mrb[8].mxu0  ;;  %v339_v16 = vpop.f32.mrb[8].mxu1 }
 0x109   :  { %v211_v17 = vadd.f32 %v1035_v42, %v210_v15  ;;  %v340_v18 = vadd.f32 %v1035_v42, %v339_v16  ;;  %v212_v19 = vpop.f32.mrb[9].mxu0  ;;  %v341_v20 = vpop.f32.mrb[9].mxu1 }
 0x10a   :  { %v213_v21 = vpop.f32.mrb[10].mxu0  ;;  %v342_v22 = vpop.f32.mrb[10].mxu1 }
 0x10b   :  { %v229_v23 = vmax.f32 %v211_v17, 0.0  ;;  %v358_v24 = vmax.f32 %v340_v18, 0.0  ;;  %v214_v25 = vadd.f32 %v1035_v42, %v213_v21  ;;  %v343_v26 = vadd.f32 %v1035_v42, %v342_v22  ;;  %v215_v27 = vpop.f32.mrb[11].mxu0  ;;  %v344_v28 = vpop.f32.mrb[11].mxu1 }
 0x10d   :  { %v1057_v29 = vmax.f32 %v229_v23, %v358_v24  ;;  %v230_v30 = vmax.f32 %v214_v25, 0.0  ;;  %v359_v31 = vmax.f32 %v343_v26, 0.0 }
 0x10f   :  { %v1059_v32 = vmax.f32 %v230_v30, %v359_v31 }
 0x110   :  { %v218_v33 = vpop.f32.mrb[12].mxu0  ;;  %v347_v34 = vpop.f32.mrb[12].mxu1 }
 0x111   :  { %v219_v35 = vadd.f32 %v1035_v42, %v218_v33  ;;  %v348_v36 = vadd.f32 %v1035_v42, %v347_v34  ;;  %v220_v37 = vpop.f32.mrb[13].mxu0  ;;  %v349_v38 = vpop.f32.mrb[13].mxu1 }
 0x112   :  { %v221_v39 = vpop.f32.mrb[14].mxu0  ;;  %v350_v40 = vpop.f32.mrb[14].mxu1 }
 0x113   :  { %v231_v41 = vmax.f32 %v219_v35, 0.0  ;;  %v360_v43 = vmax.f32 %v348_v36, 0.0  ;;  %v222_v44 = vadd.f32 %v1035_v42, %v221_v39  ;;  %v351_v45 = vadd.f32 %v1035_v42, %v350_v40  ;;  %v223_v46 = vpop.f32.mrb[15].mxu0  ;;  %v352_v47 = vpop.f32.mrb[15].mxu1 }
 0x115   :  { %v1065_v48 = vmax.f32 %v231_v41, %v360_v43  ;;  %v232_v49 = vmax.f32 %v222_v44, 0.0  ;;  %v361_v50 = vmax.f32 %v351_v45, 0.0 }
 0x117   :  { %v1067_v51 = vmax.f32 %v232_v49, %v361_v50 }
 0x11c   :  { %v460_v52 = vpop.f32.mrb[16].mxu0  ;;  %v589_v53 = vpop.f32.mrb[16].mxu1 }
 0x11d   :  { %v461_v54 = vadd.f32 %v1035_v42, %v460_v52  ;;  %v590_v55 = vadd.f32 %v1035_v42, %v589_v53  ;;  %v462_v56 = vpop.f32.mrb[17].mxu0  ;;  %v591_v58 = vpop.f32.mrb[17].mxu1 }
 0x11e   :  { %v463_v59 = vpop.f32.mrb[18].mxu0  ;;  %v592_v61 = vpop.f32.mrb[18].mxu1 }
 0x11f   :  { %v491_v62 = vmax.f32 %v461_v54, 0.0  ;;  %v620_v63 = vmax.f32 %v590_v55, 0.0  ;;  %v464_v0 = vadd.f32 %v1035_v42, %v463_v59  ;;  %v593_v1 = vadd.f32 %v1035_v42, %v592_v61  ;;  %v465_v2 = vpop.f32.mrb[19].mxu0  ;;  %v594_v3 = vpop.f32.mrb[19].mxu1 }
 0x121   :  { %v628_v4 = vmax.f32 %v491_v62, %v620_v63  ;;  %v492_v5 = vmax.f32 %v464_v0, 0.0  ;;  %v621_v6 = vmax.f32 %v593_v1, 0.0 }
 0x123   :  { %v636_v7 = vmax.f32 %v1041_v57, %v628_v4  ;;  %v629_v8 = vmax.f32 %v492_v5, %v621_v6 }
 0x124   :  { %v468_v9 = vpop.f32.mrb[20].mxu0  ;;  %v597_v10 = vpop.f32.mrb[20].mxu1 }
 0x125   :  { %645 = vst.msk [vmem:[%s1131_s6] sm:$0xff] %vm644_vm1, %v636_v7  ;;  %v637_v12 = vmax.f32 %v1043_v60, %v629_v8  ;;  %v469_v13 = vadd.f32 %v1035_v42, %v468_v9  ;;  %v598_v15 = vadd.f32 %v1035_v42, %v597_v10  ;;  %v470_v16 = vpop.f32.mrb[21].mxu0  ;;  %v599_v17 = vpop.f32.mrb[21].mxu1 }
 0x126   :  { %v471_v18 = vpop.f32.mrb[22].mxu0  ;;  %v600_v19 = vpop.f32.mrb[22].mxu1 }
 0x127   :  { %646 = vst.msk [vmem:[%s1131_s6 + $0x8] sm:$0xff] %vm644_vm1, %v637_v12  ;;  %v493_v57 = vmax.f32 %v469_v13, 0.0  ;;  %v622_v20 = vmax.f32 %v598_v15, 0.0  ;;  %v472_v21 = vadd.f32 %v1035_v42, %v471_v18  ;;  %v601_v22 = vadd.f32 %v1035_v42, %v600_v19  ;;  %v473_v60 = vpop.f32.mrb[23].mxu0  ;;  %v602_v23 = vpop.f32.mrb[23].mxu1 }
 0x129   :  { %v630_v24 = vmax.f32 %v493_v57, %v622_v20  ;;  %v494_v25 = vmax.f32 %v472_v21, 0.0  ;;  %v623_v26 = vmax.f32 %v601_v22, 0.0 }
 0x12b   :  { %v638_v27 = vmax.f32 %v1049_v11, %v630_v24  ;;  %v631_v28 = vmax.f32 %v494_v25, %v623_v26 }
 0x12c   :  { %v476_v30 = vpop.f32.mrb[24].mxu0  ;;  %v605_v31 = vpop.f32.mrb[24].mxu1 }
 0x12d   :  { %647 = vst.msk [vmem:[%s1131_s6 + $0x10] sm:$0xff] %vm644_vm1, %v638_v27  ;;  %v639_v33 = vmax.f32 %v1051_v14, %v631_v28  ;;  %v477_v34 = vadd.f32 %v1035_v42, %v476_v30  ;;  %v606_v35 = vadd.f32 %v1035_v42, %v605_v31  ;;  %v478_v36 = vpop.f32.mrb[25].mxu0  ;;  %v607_v37 = vpop.f32.mrb[25].mxu1 }
 0x12e   :  { %v479_v38 = vpop.f32.mrb[26].mxu0  ;;  %v608_v39 = vpop.f32.mrb[26].mxu1 }
 0x12f   :  { %648 = vst.msk [vmem:[%s1131_s6 + $0x18] sm:$0xff] %vm644_vm1, %v639_v33  ;;  %v495_v11 = vmax.f32 %v477_v34, 0.0  ;;  %v624_v40 = vmax.f32 %v606_v35, 0.0  ;;  %v480_v41 = vadd.f32 %v1035_v42, %v479_v38  ;;  %v609_v43 = vadd.f32 %v1035_v42, %v608_v39  ;;  %v481_v14 = vpop.f32.mrb[27].mxu0  ;;  %v610_v44 = vpop.f32.mrb[27].mxu1 }
 0x131   :  { %v632_v45 = vmax.f32 %v495_v11, %v624_v40  ;;  %v496_v46 = vmax.f32 %v480_v41, 0.0  ;;  %v625_v47 = vmax.f32 %v609_v43, 0.0 }
 0x133   :  { %v640_v49 = vmax.f32 %v1057_v29, %v632_v45  ;;  %v633_v50 = vmax.f32 %v496_v46, %v625_v47 }
 0x134   :  { %v484_v52 = vpop.f32.mrb[28].mxu0  ;;  %v613_v53 = vpop.f32.mrb[28].mxu1 }
 0x135   :  { %649 = vst.msk [vmem:[%s1131_s6 + $0x20] sm:$0xff] %vm644_vm1, %v640_v49  ;;  %v641_v54 = vmax.f32 %v1059_v32, %v633_v50  ;;  %v485_v55 = vadd.f32 %v1035_v42, %v484_v52  ;;  %v614_v56 = vadd.f32 %v1035_v42, %v613_v53  ;;  %v486_v58 = vpop.f32.mrb[29].mxu0  ;;  %v615_v59 = vpop.f32.mrb[29].mxu1 }
 0x136   :  { %v487_v61 = vpop.f32.mrb[30].mxu0  ;;  %v616_v62 = vpop.f32.mrb[30].mxu1 }
 0x137   :  { %650 = vst.msk [vmem:[%s1131_s6 + $0x28] sm:$0xff] %vm644_vm1, %v641_v54  ;;  %v497_v29 = vmax.f32 %v485_v55, 0.0  ;;  %v626_v63 = vmax.f32 %v614_v56, 0.0  ;;  %v488_v0 = vadd.f32 %v1035_v42, %v487_v61  ;;  %v617_v1 = vadd.f32 %v1035_v42, %v616_v62  ;;  %v489_v32 = vpop.f32.mrb[31].mxu0  ;;  %v618_v2 = vpop.f32.mrb[31].mxu1 }
 0x139   :  { %v634_v3 = vmax.f32 %v497_v29, %v626_v63  ;;  %v498_v4 = vmax.f32 %v488_v0, 0.0  ;;  %v627_v5 = vmax.f32 %v617_v1, 0.0 }
 0x13b   :  { %v642_v6 = vmax.f32 %v1065_v48, %v634_v3  ;;  %v635_v7 = vmax.f32 %v498_v4, %v627_v5 }
 0x13d   :  { %651 = vst.msk [vmem:[%s1131_s6 + $0x30] sm:$0xff] %vm644_vm1, %v642_v6  ;;  %v643_v8 = vmax.f32 %v1067_v51, %v635_v7 }
 0x13f   :  { %652 = vst.msk [vmem:[%s1131_s6 + $0x38] sm:$0xff] %vm644_vm1, %v643_v8 }

// kernel: forward.4
= control target key start
LH: loop header
LB: loop body
LE: loop exit
PB: predicated region body
PF: predicated region fallthrough
CT: control target
= control target key end

     0   :  { %s2178_s12 = smov 0   ;;  %s2180_s13 = smov 0   ;;  %s2688_s0 = inlined_call_operand.vmem [shape: bf16[1024,27], index: 0, kind: input, shape index: {}]   ;;  %s2689_s1 = inlined_call_operand.vmem [shape: bf16[27,512], index: 1, kind: input, shape index: {}]   ;;  %s2690_s2 = inlined_call_operand.vmem [shape: f32[1,512], index: 2, kind: input, shape index: {}]   ;;  %s2691_s3 = inlined_call_operand.vmem [shape: f32[2,1,512], index: 3, kind: output, shape index: {}]  }
   0x1   :  { %s2182_s14 = smov 0  }
   0x2 LB: > { %s25_s15 = sadd.s32 1, %s2148_s13  ;;  %p1948_p0 = scmp.ge.s32.totalorder %s2152_s14, 1  ;;  %s2152_s14 = sphi %s2182_s14, %s13_s14   ;;  %s2148_s13 = sphi %s2180_s13, %s2695_s13   ;;  %s2144_s12 = sphi %s2178_s12, %s2694_s12  }
   0x3   : > { %p27_p1 = scmp.ge.s32.totalorder %s25_s15, 2  ;;  %p154_p2 = scmp.lt.s32.totalorder %s2152_s14, 3 }
   0x5   : > { %s2697_s15 = smov (%p27_p1, %s25_s15), 0  ;;  %p155_p3 = pnand %p1948_p0, %p154_p2 }
   0x6   : > { %v2086_v0 = vld [vmem:[%s2689_s1 + $0x4] ss:$16 sps:$4 sm:$0xff] (!%p155_p3)   ;;  %vm587_vm0 = vcmask (!%p155_p3), 1044480   ;;  %vm588_vm1 = vcmask (!%p155_p3), 1045504   ;;  %v2088_v1 = vld [vmem:[%s2689_s1 + $0xc] ss:$16 sps:$4 sm:$0xff] (!%p155_p3)   ;;  %v195_v42 = vlaneseq (!%p155_p3) }
   0x7   : > { %158 = sbr.rel (%p155_p3) target bundleno = 520 (0x208), region = 32  ;;  %603 = vmatprep.subr.bf16.mxu0 (!%p155_p3), %v2086_v0  ;;  %v2090_v2 = vld [vmem:[%s2689_s1] ss:$16 sps:$4 sm:$0xff] (!%p155_p3)   ;;  %v2091_v3 = vld [vmem:[%s2689_s1 + $0x8] ss:$16 sps:$4 sm:$0xff] (!%p155_p3)   ;;  %v2154_v4 = vmov (!%p155_p3), 65535   ;;  %956 = vmatprep.subr.bf16.mxu1 (!%p155_p3), %v2088_v1 }
   0x8   : > { %v589_v5 = vsel (!%p155_p3), %vm587_vm0, 4294967295, %v2154_v4  ;;  %v2155_v6 = vmov (!%p155_p3), 0   ;;  %v2092_v7 = vld [vmem:[%s2689_s1 + $0x24] ss:$16 sps:$4 sm:$0x3f] (!%p155_p3)   ;;  %604 = vmatpush1.bf16.msra.mxu0 (!%p155_p3), %v2090_v2  ;;  %957 = vmatpush1.bf16.msra.mxu1 (!%p155_p3), %v2091_v3  ;;  %s1949_s5 = sshll.u32 (!%p155_p3), %s2144_s12, 6 }
   0x9   : > { %635 = vmatprep.mubr.bf16.mxu0 (!%p155_p3), %v2155_v6  ;;  %v590_v8 = vsel (!%p155_p3), %vm588_vm1, %v589_v5, 0  ;;  %988 = vmatprep.mubr.bf16.mxu1 (!%p155_p3), %v2155_v6  ;;  %v2094_v9 = vld [vmem:[%s2689_s1 + $0x2c] ss:$16 sps:$4 sm:$0x3f] (!%p155_p3)   ;;  %p180_p4 = scmp.lt.s32.totalorder (!%p155_p3), %s1949_s5, 127  ;;  %vm490_vm2 = vcmask (!%p155_p3), 220160  }
   0xa   : > { %v595_v10 = vand.u32 (!%p155_p3), %v2092_v7, %v590_v8  ;;  %v2096_v11 = vld [vmem:[%s2689_s1 + $0x20] ss:$16 sps:$4 sm:$0x3f] (!%p155_p3)   ;;  %v2097_v12 = vld [vmem:[%s2689_s1 + $0x28] ss:$16 sps:$4 sm:$0x3f] (!%p155_p3)   ;;  %v601_v13 = vand.u32 (!%p155_p3), %v2094_v9, %v590_v8 }
   0xb   : > { %v592_v14 = vand.u32 (!%p155_p3), %v2096_v11, %v590_v8  ;;  %v598_v15 = vand.u32 (!%p155_p3), %v2097_v12, %v590_v8  ;;  %v2359_v43 = vshrl.u32 (!%p155_p3), %v195_v42, 7  ;;  %v272_v47 = vld [vmem:[%s2690_s2] sm:$0xf] (!%p155_p3)  ;;  %vm2551_vm3 = vcmp.lt.s32.totalorder (!%p155_p3), %v195_v42, 512  ;;  %p186_p5 = scmp.lt.s32.totalorder (!%p155_p3), %s2144_s12, 1 }
   0xc   : > { %605 = vmatprep.subr.bf16.mxu0 (!%p155_p3), %v595_v10  ;;  %958 = vmatprep.subr.bf16.mxu1 (!%p155_p3), %v601_v13 }
   0xd   : > { %606 = vmatpush1.bf16.msra.mxu0 (!%p155_p3), %v592_v14  ;;  %959 = vmatpush1.bf16.msra.mxu1 (!%p155_p3), %v598_v15  ;;  %v276_v45 = vsub.s32 (!%p155_p3), 0, %v2359_v43  ;;  %v284_v46 = vsub.s32 (!%p155_p3), 2, %v2359_v43  ;;  %v280_v48 = vsub.s32 (!%p155_p3), 1, %v2359_v43  ;;  %v288_v49 = vsub.s32 (!%p155_p3), 3, %v2359_v43 }
   0xe   : > { %s2699_s5 = smov (!%p180_p4, %s1949_s5), 127  ;;  %s2701_s12 = smov (!%p186_p5, %s2144_s12), 1 }
   0xf   : > { %s1950_s6 = sshll.u32 %s2699_s5, 2  ;;  %v2373_v50 = vrot.slane %v272_v47, %v276_v45  ;;  %v2375_v51 = vrot.slane %v272_v47, %v284_v46  ;;  %v2377_v52 = vrot.slane %v272_v47, %v280_v48  ;;  %v2379_v53 = vrot.slane %v272_v47, %v288_v49  ;;  %s1951_s16 = sshll.u32 %s2701_s12, 2 }
  0x10   : > { %s2228_s9 = scalar_lea.vmem %s2688_s0, %s1950_s6  ;;  %s189_s19 = scalar_lea.vmem %s2691_s3, %s1951_s16 }
  0x11   : > { %v2098_v16 = vld [vmem:[%s2228_s9] sm:$0xff]   ;;  %v2099_v17 = vld [vmem:[%s2228_s9 + $0x8] sm:$0xff]   ;;  %v2100_v18 = vld [vmem:[%s2228_s9 + $0x10] sm:$0xff]  }
  0x12   : > { %1992 = vmatmul.mubr.msk.bf16.vlgmr.msra.gmra.mrb[0].mxu0 %vm490_vm2, %v2098_v16  ;;  %2024 = vmatmul.mubr.msk.bf16.vlgmr.msra.gmra.mrb[0].mxu1 %vm490_vm2, %v2098_v16  ;;  %v2101_v19 = vld [vmem:[%s2228_s9 + $0x18] sm:$0xff]   ;;  %v2102_v20 = vld [vmem:[%s2228_s9 + $0x20] sm:$0xff]   ;;  %v2103_v21 = vld [vmem:[%s2228_s9 + $0x28] sm:$0xff]  }
  0x13   : > { %645 = vmatprep.mubr.bf16.mxu0 %v2155_v6  ;;  %998 = vmatprep.mubr.bf16.mxu1 %v2155_v6  ;;  %v2104_v22 = vld [vmem:[%s2228_s9 + $0x30] sm:$0xff]   ;;  %v2105_v23 = vld [vmem:[%s2228_s9 + $0x38] sm:$0xff]   ;;  %v2106_v24 = vld [vmem:[%s2228_s9 + $0x40] sm:$0xff]  }
  0x14   : > { %v2107_v25 = vld [vmem:[%s2228_s9 + $0x48] sm:$0xff]   ;;  %v2108_v26 = vld [vmem:[%s2228_s9 + $0x50] sm:$0xff]   ;;  %v2109_v27 = vld [vmem:[%s2228_s9 + $0x58] sm:$0xff]  }
  0x15   : > { %v2110_v28 = vld [vmem:[%s2228_s9 + $0x60] sm:$0xff]   ;;  %v2111_v29 = vld [vmem:[%s2228_s9 + $0x68] sm:$0xff]   ;;  %v2112_v30 = vld [vmem:[%s2228_s9 + $0x70] sm:$0xff]  }
  0x16   : > { %v2113_v31 = vld [vmem:[%s2228_s9 + $0x78] sm:$0xff]   ;;  %v2114_v32 = vld [vmem:[%s2228_s9 + $0x80] sm:$0xff]   ;;  %v2115_v33 = vld [vmem:[%s2228_s9 + $0x88] sm:$0xff]  }
  0x17   : > { %v2116_v34 = vld [vmem:[%s2228_s9 + $0x90] sm:$0xff]   ;;  %v2117_v35 = vld [vmem:[%s2228_s9 + $0x98] sm:$0xff]   ;;  %v2118_v36 = vld [vmem:[%s2228_s9 + $0xa0] sm:$0xff]  }
  0x18   : > { %v2119_v37 = vld [vmem:[%s2228_s9 + $0xa8] sm:$0xff]   ;;  %v2120_v38 = vld [vmem:[%s2228_s9 + $0xb0] sm:$0xff]   ;;  %v2121_v39 = vld [vmem:[%s2228_s9 + $0xb8] sm:$0xff]  }
  0x19   : > { %v2122_v40 = vld [vmem:[%s2228_s9 + $0xc0] sm:$0xff]   ;;  %v2123_v41 = vld [vmem:[%s2228_s9 + $0xc8] sm:$0xff]   ;;  %v2124_v44 = vld [vmem:[%s2228_s9 + $0xd0] sm:$0xff]  }
  0x1a   : > { %1993 = vmatmul.mubr.msk.bf16.gmra.mrb[4].mxu0 %vm490_vm2, %v2099_v17  ;;  %2025 = vmatmul.mubr.msk.bf16.gmra.mrb[4].mxu1 %vm490_vm2, %v2099_v17  ;;  %v2125_v60 = vld [vmem:[%s2228_s9 + $0xd8] sm:$0xff]  }
  0x1b   : > { %655 = vmatprep.mubr.bf16.mxu0 %v2155_v6  ;;  %1008 = vmatprep.mubr.bf16.mxu1 %v2155_v6 }
  0x22   : > { %1994 = vmatmul.mubr.msk.bf16.gmra.mrb[8].mxu0 %vm490_vm2, %v2100_v18  ;;  %2026 = vmatmul.mubr.msk.bf16.gmra.mrb[8].mxu1 %vm490_vm2, %v2100_v18 }
  0x23   : > { %665 = vmatprep.mubr.bf16.mxu0 %v2155_v6  ;;  %1018 = vmatprep.mubr.bf16.mxu1 %v2155_v6 }
  0x2a   : > { %1995 = vmatmul.mubr.msk.bf16.gmra.mrb[12].mxu0 %vm490_vm2, %v2101_v19  ;;  %2027 = vmatmul.mubr.msk.bf16.gmra.mrb[12].mxu1 %vm490_vm2, %v2101_v19 }
  0x2b   : > { %675 = vmatprep.mubr.bf16.mxu0 %v2155_v6  ;;  %1028 = vmatprep.mubr.bf16.mxu1 %v2155_v6 }
  0x32   : > { %1996 = vmatmul.mubr.msk.bf16.gmra.mrb[16].mxu0 %vm490_vm2, %v2102_v20  ;;  %2028 = vmatmul.mubr.msk.bf16.gmra.mrb[16].mxu1 %vm490_vm2, %v2102_v20 }
  0x33   : > { %685 = vmatprep.mubr.bf16.mxu0 %v2155_v6  ;;  %1038 = vmatprep.mubr.bf16.mxu1 %v2155_v6 }
  0x3a   : > { %1997 = vmatmul.mubr.msk.bf16.gmra.mrb[20].mxu0 %vm490_vm2, %v2103_v21  ;;  %2029 = vmatmul.mubr.msk.bf16.gmra.mrb[20].mxu1 %vm490_vm2, %v2103_v21 }
  0x3b   : > { %695 = vmatprep.mubr.bf16.mxu0 %v2155_v6  ;;  %1048 = vmatprep.mubr.bf16.mxu1 %v2155_v6 }
  0x42   : > { %1998 = vmatmul.mubr.msk.bf16.gmra.mrb[24].mxu0 %vm490_vm2, %v2104_v22  ;;  %2030 = vmatmul.mubr.msk.bf16.gmra.mrb[24].mxu1 %vm490_vm2, %v2104_v22 }
  0x43   : > { %705 = vmatprep.mubr.bf16.mxu0 %v2155_v6  ;;  %1058 = vmatprep.mubr.bf16.mxu1 %v2155_v6 }
  0x4a   : > { %1999 = vmatmul.mubr.msk.bf16.gmra.mrb[28].mxu0 %vm490_vm2, %v2105_v23  ;;  %2031 = vmatmul.mubr.msk.bf16.gmra.mrb[28].mxu1 %vm490_vm2, %v2105_v23 }
  0x4b   : > { %715 = vmatprep.mubr.bf16.mxu0 %v2155_v6  ;;  %1068 = vmatprep.mubr.bf16.mxu1 %v2155_v6 }
  0x52   : > { %2000 = vmatmul.mubr.msk.bf16.gmra.mrb[32].mxu0 %vm490_vm2, %v2106_v24  ;;  %2032 = vmatmul.mubr.msk.bf16.gmra.mrb[32].mxu1 %vm490_vm2, %v2106_v24 }
  0x53   : > { %725 = vmatprep.mubr.bf16.mxu0 %v2155_v6  ;;  %1078 = vmatprep.mubr.bf16.mxu1 %v2155_v6 }
  0x5a   : > { %2001 = vmatmul.mubr.msk.bf16.gmra.mrb[36].mxu0 %vm490_vm2, %v2107_v25  ;;  %2033 = vmatmul.mubr.msk.bf16.gmra.mrb[36].mxu1 %vm490_vm2, %v2107_v25 }
  0x5b   : > { %735 = vmatprep.mubr.bf16.mxu0 %v2155_v6  ;;  %1088 = vmatprep.mubr.bf16.mxu1 %v2155_v6 }
  0x62   : > { %2002 = vmatmul.mubr.msk.bf16.gmra.mrb[40].mxu0 %vm490_vm2, %v2108_v26  ;;  %2034 = vmatmul.mubr.msk.bf16.gmra.mrb[40].mxu1 %vm490_vm2, %v2108_v26  ;;  %v2126_v26 = vld [vmem:[%s2228_s9 + $0xe0] sm:$0xff]  }
  0x63   : > { %745 = vmatprep.mubr.bf16.mxu0 %v2155_v6  ;;  %1098 = vmatprep.mubr.bf16.mxu1 %v2155_v6 }
  0x6a   : > { %2003 = vmatmul.mubr.msk.bf16.gmra.mrb[44].mxu0 %vm490_vm2, %v2109_v27  ;;  %2035 = vmatmul.mubr.msk.bf16.gmra.mrb[44].mxu1 %vm490_vm2, %v2109_v27 }
  0x6b   : > { %755 = vmatprep.mubr.bf16.mxu0 %v2155_v6  ;;  %1108 = vmatprep.mubr.bf16.mxu1 %v2155_v6 }
  0x72   : > { %2004 = vmatmul.mubr.msk.bf16.gmra.mrb[48].mxu0 %vm490_vm2, %v2110_v28  ;;  %2036 = vmatmul.mubr.msk.bf16.gmra.mrb[48].mxu1 %vm490_vm2, %v2110_v28 }
  0x73   : > { %765 = vmatprep.mubr.bf16.mxu0 %v2155_v6  ;;  %1118 = vmatprep.mubr.bf16.mxu1 %v2155_v6 }
  0x7a   : > { %2005 = vmatmul.mubr.msk.bf16.gmra.mrb[52].mxu0 %vm490_vm2, %v2111_v29  ;;  %2037 = vmatmul.mubr.msk.bf16.gmra.mrb[52].mxu1 %vm490_vm2, %v2111_v29 }
  0x7b   : > { %775 = vmatprep.mubr.bf16.mxu0 %v2155_v6  ;;  %1128 = vmatprep.mubr.bf16.mxu1 %v2155_v6 }
  0x82   : > { %2006 = vmatmul.mubr.msk.bf16.gmra.mrb[56].mxu0 %vm490_vm2, %v2112_v30  ;;  %2038 = vmatmul.mubr.msk.bf16.gmra.mrb[56].mxu1 %vm490_vm2, %v2112_v30 }
  0x83   : > { %785 = vmatprep.mubr.bf16.mxu0 %v2155_v6  ;;  %1138 = vmatprep.mubr.bf16.mxu1 %v2155_v6 }
  0x8a   : > { %2007 = vmatmul.mubr.msk.bf16.gmra.mrb[60].mxu0 %vm490_vm2, %v2113_v31  ;;  %2039 = vmatmul.mubr.msk.bf16.gmra.mrb[60].mxu1 %vm490_vm2, %v2113_v31 }
  0x8b   : > { %795 = vmatprep.mubr.bf16.mxu0 %v2155_v6  ;;  %1148 = vmatprep.mubr.bf16.mxu1 %v2155_v6 }
  0x92   : > { %2008 = vmatmul.mubr.msk.bf16.gmra.mrb[64].mxu0 %vm490_vm2, %v2114_v32  ;;  %2040 = vmatmul.mubr.msk.bf16.gmra.mrb[64].mxu1 %vm490_vm2, %v2114_v32 }
  0x93   : > { %805 = vmatprep.mubr.bf16.mxu0 %v2155_v6  ;;  %1158 = vmatprep.mubr.bf16.mxu1 %v2155_v6 }
  0x9a   : > { %2009 = vmatmul.mubr.msk.bf16.gmra.mrb[68].mxu0 %vm490_vm2, %v2115_v33  ;;  %2041 = vmatmul.mubr.msk.bf16.gmra.mrb[68].mxu1 %vm490_vm2, %v2115_v33 }
  0x9b   : > { %815 = vmatprep.mubr.bf16.mxu0 %v2155_v6  ;;  %1168 = vmatprep.mubr.bf16.mxu1 %v2155_v6 }
  0xa2   : > { %2010 = vmatmul.mubr.msk.bf16.gmra.mrb[72].mxu0 %vm490_vm2, %v2116_v34  ;;  %2042 = vmatmul.mubr.msk.bf16.gmra.mrb[72].mxu1 %vm490_vm2, %v2116_v34 }
  0xa3   : > { %825 = vmatprep.mubr.bf16.mxu0 %v2155_v6  ;;  %1178 = vmatprep.mubr.bf16.mxu1 %v2155_v6 }
  0xaa   : > { %2011 = vmatmul.mubr.msk.bf16.gmra.mrb[76].mxu0 %vm490_vm2, %v2117_v35  ;;  %2043 = vmatmul.mubr.msk.bf16.gmra.mrb[76].mxu1 %vm490_vm2, %v2117_v35 }
  0xab   : > { %835 = vmatprep.mubr.bf16.mxu0 %v2155_v6  ;;  %1188 = vmatprep.mubr.bf16.mxu1 %v2155_v6 }
  0xb2   : > { %2012 = vmatmul.mubr.msk.bf16.gmra.mrb[80].mxu0 %vm490_vm2, %v2118_v36  ;;  %2044 = vmatmul.mubr.msk.bf16.gmra.mrb[80].mxu1 %vm490_vm2, %v2118_v36 }
  0xb3   : > { %845 = vmatprep.mubr.bf16.mxu0 %v2155_v6  ;;  %1198 = vmatprep.mubr.bf16.mxu1 %v2155_v6 }
  0xba   : > { %2013 = vmatmul.mubr.msk.bf16.gmra.mrb[84].mxu0 %vm490_vm2, %v2119_v37  ;;  %2045 = vmatmul.mubr.msk.bf16.gmra.mrb[84].mxu1 %vm490_vm2, %v2119_v37 }
  0xbb   : > { %855 = vmatprep.mubr.bf16.mxu0 %v2155_v6  ;;  %1208 = vmatprep.mubr.bf16.mxu1 %v2155_v6 }
  0xc2   : > { %2014 = vmatmul.mubr.msk.bf16.gmra.mrb[88].mxu0 %vm490_vm2, %v2120_v38  ;;  %2046 = vmatmul.mubr.msk.bf16.gmra.mrb[88].mxu1 %vm490_vm2, %v2120_v38 }
  0xc3   : > { %865 = vmatprep.mubr.bf16.mxu0 %v2155_v6  ;;  %1218 = vmatprep.mubr.bf16.mxu1 %v2155_v6 }
  0xca   : > { %2015 = vmatmul.mubr.msk.bf16.gmra.mrb[92].mxu0 %vm490_vm2, %v2121_v39  ;;  %2047 = vmatmul.mubr.msk.bf16.gmra.mrb[92].mxu1 %vm490_vm2, %v2121_v39 }
  0xcb   : > { %875 = vmatprep.mubr.bf16.mxu0 %v2155_v6  ;;  %1228 = vmatprep.mubr.bf16.mxu1 %v2155_v6 }
  0xd2   : > { %2016 = vmatmul.mubr.msk.bf16.gmra.mrb[96].mxu0 %vm490_vm2, %v2122_v40  ;;  %2048 = vmatmul.mubr.msk.bf16.gmra.mrb[96].mxu1 %vm490_vm2, %v2122_v40 }
  0xd3   : > { %885 = vmatprep.mubr.bf16.mxu0 %v2155_v6  ;;  %1238 = vmatprep.mubr.bf16.mxu1 %v2155_v6 }
  0xda   : > { %2017 = vmatmul.mubr.msk.bf16.gmra.mrb[100].mxu0 %vm490_vm2, %v2123_v41  ;;  %2049 = vmatmul.mubr.msk.bf16.gmra.mrb[100].mxu1 %vm490_vm2, %v2123_v41 }
  0xdb   : > { %895 = vmatprep.mubr.bf16.mxu0 %v2155_v6  ;;  %1248 = vmatprep.mubr.bf16.mxu1 %v2155_v6 }
  0xe2   : > { %2018 = vmatmul.mubr.msk.bf16.gmra.mrb[104].mxu0 %vm490_vm2, %v2124_v44  ;;  %2050 = vmatmul.mubr.msk.bf16.gmra.mrb[104].mxu1 %vm490_vm2, %v2124_v44 }
  0xe3   : > { %905 = vmatprep.mubr.bf16.mxu0 %v2155_v6  ;;  %1258 = vmatprep.mubr.bf16.mxu1 %v2155_v6 }
  0xe5   : > { %v637_v54 = vpop.f32.mrb[0].mxu0  ;;  %v990_v55 = vpop.f32.mrb[0].mxu1 }
  0xe6   : > { %v638_v56 = vadd.f32 %v637_v54, %v2373_v50  ;;  %v991_v57 = vadd.f32 %v990_v55, %v2375_v51  ;;  %v639_v58 = vpop.f32.mrb[1].mxu0  ;;  %v992_v59 = vpop.f32.mrb[1].mxu1 }
  0xe7   : > { %v640_v61 = vadd.f32 %v639_v58, %v2377_v52  ;;  %v993_v62 = vadd.f32 %v992_v59, %v2379_v53  ;;  %v641_v63 = vpop.f32.mrb[2].mxu0  ;;  %v994_v0 = vpop.f32.mrb[2].mxu1 }
  0xe8   : > { %v642_v1 = vadd.f32 %v641_v63, %v2373_v50  ;;  %v995_v2 = vadd.f32 %v994_v0, %v2375_v51  ;;  %v643_v3 = vpop.f32.mrb[3].mxu0  ;;  %v996_v4 = vpop.f32.mrb[3].mxu1  ;;  %v1309_v8 = vmax.f32 %v638_v56, 0.0  ;;  %v1311_v9 = vmax.f32 %v991_v57, 0.0 }
  0xe9   : > { %v644_v5 = vadd.f32 %v643_v3, %v2377_v52  ;;  %v997_v7 = vadd.f32 %v996_v4, %v2379_v53  ;;  %v1310_v12 = vmax.f32 %v640_v61, 0.0  ;;  %v1312_v13 = vmax.f32 %v993_v62, 0.0 }
  0xea   : > { %v1313_v10 = vmax.f32 %v642_v1, 0.0  ;;  %v1315_v11 = vmax.f32 %v995_v2, 0.0  ;;  %2019 = vmatmul.mubr.msk.bf16.gmra.mrb[108].mxu0 %vm490_vm2, %v2125_v60  ;;  %2051 = vmatmul.mubr.msk.bf16.gmra.mrb[108].mxu1 %vm490_vm2, %v2125_v60  ;;  %v2127_v1 = vld [vmem:[%s2228_s9 + $0xe8] sm:$0xff]  }
  0xeb   : > { %v1314_v14 = vmax.f32 %v644_v5, 0.0  ;;  %v1316_v15 = vmax.f32 %v997_v7, 0.0  ;;  %915 = vmatprep.mubr.bf16.mxu0 %v2155_v6  ;;  %1268 = vmatprep.mubr.bf16.mxu1 %v2155_v6 }
  0xec   : > { %v1566_v16 = vadd.f32 %v1313_v10, %v1309_v8  ;;  %v1704_v17 = vadd.f32 %v1315_v11, %v1311_v9 }
  0xed   : > { %v1635_v18 = vadd.f32 %v1314_v14, %v1310_v12  ;;  %v1773_v19 = vadd.f32 %v1316_v15, %v1312_v13  ;;  %v647_v20 = vpop.f32.mrb[4].mxu0  ;;  %v1000_v21 = vpop.f32.mrb[4].mxu1 }
  0xee   : > { %v648_v22 = vadd.f32 %v647_v20, %v2373_v50  ;;  %v1001_v23 = vadd.f32 %v1000_v21, %v2375_v51  ;;  %v649_v24 = vpop.f32.mrb[5].mxu0  ;;  %v1002_v25 = vpop.f32.mrb[5].mxu1 }
  0xef   : > { %v650_v27 = vadd.f32 %v649_v24, %v2377_v52  ;;  %v1003_v28 = vadd.f32 %v1002_v25, %v2379_v53  ;;  %v651_v29 = vpop.f32.mrb[6].mxu0  ;;  %v1004_v30 = vpop.f32.mrb[6].mxu1 }
  0xf0   : > { %v1317_v31 = vmax.f32 %v648_v22, 0.0  ;;  %v1319_v32 = vmax.f32 %v1001_v23, 0.0  ;;  %v652_v33 = vadd.f32 %v651_v29, %v2373_v50  ;;  %v1005_v34 = vadd.f32 %v1004_v30, %v2375_v51  ;;  %v653_v35 = vpop.f32.mrb[7].mxu0  ;;  %v1006_v36 = vpop.f32.mrb[7].mxu1 }
  0xf1   : > { %v1318_v37 = vmax.f32 %v650_v27, 0.0  ;;  %v1320_v38 = vmax.f32 %v1003_v28, 0.0  ;;  %v654_v39 = vadd.f32 %v653_v35, %v2377_v52  ;;  %v1007_v40 = vadd.f32 %v1006_v36, %v2379_v53  ;;  %v2128_v35 = vld [vmem:[%s2228_s9 + $0xf0] sm:$0xff]  }
  0xf2   : > { %v1567_v41 = vadd.f32 %v1566_v16, %v1317_v31  ;;  %v1705_v44 = vadd.f32 %v1704_v17, %v1319_v32  ;;  %v1321_v45 = vmax.f32 %v652_v33, 0.0  ;;  %v1323_v46 = vmax.f32 %v1005_v34, 0.0  ;;  %2020 = vmatmul.mubr.msk.bf16.gmra.mrb[112].mxu0 %vm490_vm2, %v2126_v26  ;;  %2052 = vmatmul.mubr.msk.bf16.gmra.mrb[112].mxu1 %vm490_vm2, %v2126_v26 }
  0xf3   : > { %v1636_v47 = vadd.f32 %v1635_v18, %v1318_v37  ;;  %v1774_v48 = vadd.f32 %v1773_v19, %v1320_v38  ;;  %v1322_v49 = vmax.f32 %v654_v39, 0.0  ;;  %v1324_v54 = vmax.f32 %v1007_v40, 0.0  ;;  %925 = vmatprep.mubr.bf16.mxu0 %v2155_v6  ;;  %1278 = vmatprep.mubr.bf16.mxu1 %v2155_v6 }
  0xf4   : > { %v1568_v55 = vadd.f32 %v1567_v41, %v1321_v45  ;;  %v1706_v56 = vadd.f32 %v1705_v44, %v1323_v46 }
  0xf5   : > { %v1637_v57 = vadd.f32 %v1636_v47, %v1322_v49  ;;  %v1775_v58 = vadd.f32 %v1774_v48, %v1324_v54  ;;  %v657_v59 = vpop.f32.mrb[8].mxu0  ;;  %v1010_v60 = vpop.f32.mrb[8].mxu1 }
  0xf6   : > { %v658_v61 = vadd.f32 %v657_v59, %v2373_v50  ;;  %v1011_v62 = vadd.f32 %v1010_v60, %v2375_v51  ;;  %v659_v63 = vpop.f32.mrb[9].mxu0  ;;  %v1012_v0 = vpop.f32.mrb[9].mxu1 }
  0xf7   : > { %v660_v2 = vadd.f32 %v659_v63, %v2377_v52  ;;  %v1013_v3 = vadd.f32 %v1012_v0, %v2379_v53  ;;  %v661_v4 = vpop.f32.mrb[10].mxu0  ;;  %v1014_v5 = vpop.f32.mrb[10].mxu1 }
  0xf8   : > { %v1325_v7 = vmax.f32 %v658_v61, 0.0  ;;  %v1327_v8 = vmax.f32 %v1011_v62, 0.0  ;;  %v662_v9 = vadd.f32 %v661_v4, %v2373_v50  ;;  %v1015_v10 = vadd.f32 %v1014_v5, %v2375_v51  ;;  %v663_v11 = vpop.f32.mrb[11].mxu0  ;;  %v1016_v12 = vpop.f32.mrb[11].mxu1 }
  0xf9   : > { %v1326_v13 = vmax.f32 %v660_v2, 0.0  ;;  %v1328_v14 = vmax.f32 %v1013_v3, 0.0  ;;  %v664_v15 = vadd.f32 %v663_v11, %v2377_v52  ;;  %v1017_v16 = vadd.f32 %v1016_v12, %v2379_v53  ;;  %v2129_v11 = vld [vmem:[%s2228_s9 + $0xf8] sm:$0xff]  }
  0xfa   : > { %v1569_v17 = vadd.f32 %v1568_v55, %v1325_v7  ;;  %v1707_v18 = vadd.f32 %v1706_v56, %v1327_v8  ;;  %v1329_v19 = vmax.f32 %v662_v9, 0.0  ;;  %v1331_v20 = vmax.f32 %v1015_v10, 0.0  ;;  %2021 = vmatmul.mubr.msk.bf16.gmra.mrb[116].mxu0 %vm490_vm2, %v2127_v1  ;;  %2053 = vmatmul.mubr.msk.bf16.gmra.mrb[116].mxu1 %vm490_vm2, %v2127_v1 }
  0xfb   : > { %v1638_v21 = vadd.f32 %v1637_v57, %v1326_v13  ;;  %v1776_v22 = vadd.f32 %v1775_v58, %v1328_v14  ;;  %v1330_v23 = vmax.f32 %v664_v15, 0.0  ;;  %v1332_v24 = vmax.f32 %v1017_v16, 0.0  ;;  %935 = vmatprep.mubr.bf16.mxu0 %v2155_v6  ;;  %1288 = vmatprep.mubr.bf16.mxu1 %v2155_v6 }
  0xfc   : > { %v1570_v25 = vadd.f32 %v1569_v17, %v1329_v19  ;;  %v1708_v26 = vadd.f32 %v1707_v18, %v1331_v20 }
  0xfd   : > { %v1639_v27 = vadd.f32 %v1638_v21, %v1330_v23  ;;  %v1777_v28 = vadd.f32 %v1776_v22, %v1332_v24  ;;  %v667_v29 = vpop.f32.mrb[12].mxu0  ;;  %v1020_v30 = vpop.f32.mrb[12].mxu1 }
  0xfe   : > { %v668_v31 = vadd.f32 %v667_v29, %v2373_v50  ;;  %v1021_v32 = vadd.f32 %v1020_v30, %v2375_v51  ;;  %v669_v33 = vpop.f32.mrb[13].mxu0  ;;  %v1022_v34 = vpop.f32.mrb[13].mxu1 }
  0xff   : > { %v670_v36 = vadd.f32 %v669_v33, %v2377_v52  ;;  %v1023_v37 = vadd.f32 %v1022_v34, %v2379_v53  ;;  %v671_v38 = vpop.f32.mrb[14].mxu0  ;;  %v1024_v39 = vpop.f32.mrb[14].mxu1 }
 0x100   : > { %v1333_v40 = vmax.f32 %v668_v31, 0.0  ;;  %v1335_v41 = vmax.f32 %v1021_v32, 0.0  ;;  %v672_v44 = vadd.f32 %v671_v38, %v2373_v50  ;;  %v1025_v45 = vadd.f32 %v1024_v39, %v2375_v51  ;;  %v673_v46 = vpop.f32.mrb[15].mxu0  ;;  %v1026_v47 = vpop.f32.mrb[15].mxu1 }
 0x101   : > { %v1334_v48 = vmax.f32 %v670_v36, 0.0  ;;  %v1336_v49 = vmax.f32 %v1023_v37, 0.0  ;;  %v674_v54 = vadd.f32 %v673_v46, %v2377_v52  ;;  %v1027_v55 = vadd.f32 %v1026_v47, %v2379_v53 }
 0x102   : > { %v1571_v56 = vadd.f32 %v1570_v25, %v1333_v40  ;;  %v1709_v57 = vadd.f32 %v1708_v26, %v1335_v41  ;;  %v1337_v58 = vmax.f32 %v672_v44, 0.0  ;;  %v1339_v59 = vmax.f32 %v1025_v45, 0.0  ;;  %2022 = vmatmul.mubr.msk.bf16.gmra.mrb[120].mxu0 %vm490_vm2, %v2128_v35  ;;  %2054 = vmatmul.mubr.msk.bf16.gmra.mrb[120].mxu1 %vm490_vm2, %v2128_v35 }
 0x103   : > { %v1640_v60 = vadd.f32 %v1639_v27, %v1334_v48  ;;  %v1778_v61 = vadd.f32 %v1777_v28, %v1336_v49  ;;  %v1338_v62 = vmax.f32 %v674_v54, 0.0  ;;  %v1340_v63 = vmax.f32 %v1027_v55, 0.0  ;;  %945 = vmatprep.mubr.bf16.mxu0 %v2155_v6  ;;  %1298 = vmatprep.mubr.bf16.mxu1 %v2155_v6 }
 0x104   : > { %v1572_v0 = vadd.f32 %v1571_v56, %v1337_v58  ;;  %v1710_v1 = vadd.f32 %v1709_v57, %v1339_v59 }
 0x105   : > { %v1641_v2 = vadd.f32 %v1640_v60, %v1338_v62  ;;  %v1779_v3 = vadd.f32 %v1778_v61, %v1340_v63  ;;  %v677_v4 = vpop.f32.mrb[16].mxu0  ;;  %v1030_v5 = vpop.f32.mrb[16].mxu1 }
 0x106   : > { %v678_v7 = vadd.f32 %v677_v4, %v2373_v50  ;;  %v1031_v8 = vadd.f32 %v1030_v5, %v2375_v51  ;;  %v679_v9 = vpop.f32.mrb[17].mxu0  ;;  %v1032_v10 = vpop.f32.mrb[17].mxu1 }
 0x107   : > { %v680_v12 = vadd.f32 %v679_v9, %v2377_v52  ;;  %v1033_v13 = vadd.f32 %v1032_v10, %v2379_v53  ;;  %v681_v14 = vpop.f32.mrb[18].mxu0  ;;  %v1034_v15 = vpop.f32.mrb[18].mxu1 }
 0x108   : > { %v1341_v6 = vmax.f32 %v678_v7, 0.0  ;;  %v1343_v16 = vmax.f32 %v1031_v8, 0.0  ;;  %v682_v17 = vadd.f32 %v681_v14, %v2373_v50  ;;  %v1035_v18 = vadd.f32 %v1034_v15, %v2375_v51  ;;  %v683_v19 = vpop.f32.mrb[19].mxu0  ;;  %v1036_v20 = vpop.f32.mrb[19].mxu1 }
 0x109   : > { %v1342_v21 = vmax.f32 %v680_v12, 0.0  ;;  %v1344_v22 = vmax.f32 %v1033_v13, 0.0  ;;  %v684_v23 = vadd.f32 %v683_v19, %v2377_v52  ;;  %v1037_v24 = vadd.f32 %v1036_v20, %v2379_v53 }
 0x10a   : > { %v1573_v25 = vadd.f32 %v1572_v0, %v1341_v6  ;;  %v1711_v26 = vadd.f32 %v1710_v1, %v1343_v16  ;;  %v1345_v27 = vmax.f32 %v682_v17, 0.0  ;;  %v1347_v28 = vmax.f32 %v1035_v18, 0.0  ;;  %2023 = vmatmul.mubr.msk.bf16.gmra.mrb[124].mxu0 %vm490_vm2, %v2129_v11  ;;  %2055 = vmatmul.mubr.msk.bf16.gmra.mrb[124].mxu1 %vm490_vm2, %v2129_v11 }
 0x10b   : > { %v1642_v29 = vadd.f32 %v1641_v2, %v1342_v21  ;;  %v1780_v30 = vadd.f32 %v1779_v3, %v1344_v22  ;;  %v1346_v31 = vmax.f32 %v684_v23, 0.0  ;;  %v1348_v32 = vmax.f32 %v1037_v24, 0.0 }
 0x10c   : > { %v1574_v33 = vadd.f32 %v1573_v25, %v1345_v27  ;;  %v1712_v34 = vadd.f32 %v1711_v26, %v1347_v28 }
 0x10d   : > { %v1643_v35 = vadd.f32 %v1642_v29, %v1346_v31  ;;  %v1781_v36 = vadd.f32 %v1780_v30, %v1348_v32  ;;  %v687_v37 = vpop.f32.mrb[20].mxu0  ;;  %v1040_v38 = vpop.f32.mrb[20].mxu1 }
 0x10e   : > { %v688_v39 = vadd.f32 %v687_v37, %v2373_v50  ;;  %v1041_v40 = vadd.f32 %v1040_v38, %v2375_v51  ;;  %v689_v41 = vpop.f32.mrb[21].mxu0  ;;  %v1042_v44 = vpop.f32.mrb[21].mxu1 }
 0x10f   : > { %v690_v45 = vadd.f32 %v689_v41, %v2377_v52  ;;  %v1043_v46 = vadd.f32 %v1042_v44, %v2379_v53  ;;  %v691_v47 = vpop.f32.mrb[22].mxu0  ;;  %v1044_v48 = vpop.f32.mrb[22].mxu1 }
 0x110   : > { %v1349_v49 = vmax.f32 %v688_v39, 0.0  ;;  %v1351_v54 = vmax.f32 %v1041_v40, 0.0  ;;  %v692_v55 = vadd.f32 %v691_v47, %v2373_v50  ;;  %v1045_v56 = vadd.f32 %v1044_v48, %v2375_v51  ;;  %v693_v57 = vpop.f32.mrb[23].mxu0  ;;  %v1046_v58 = vpop.f32.mrb[23].mxu1 }
 0x111   : > { %v1350_v59 = vmax.f32 %v690_v45, 0.0  ;;  %v1352_v60 = vmax.f32 %v1043_v46, 0.0  ;;  %v694_v61 = vadd.f32 %v693_v57, %v2377_v52  ;;  %v1047_v62 = vadd.f32 %v1046_v58, %v2379_v53 }
 0x112   : > { %v1575_v63 = vadd.f32 %v1574_v33, %v1349_v49  ;;  %v1713_v0 = vadd.f32 %v1712_v34, %v1351_v54  ;;  %v1353_v1 = vmax.f32 %v692_v55, 0.0  ;;  %v1355_v2 = vmax.f32 %v1045_v56, 0.0 }
 0x113   : > { %v1644_v3 = vadd.f32 %v1643_v35, %v1350_v59  ;;  %v1782_v4 = vadd.f32 %v1781_v36, %v1352_v60  ;;  %v1354_v5 = vmax.f32 %v694_v61, 0.0  ;;  %v1356_v7 = vmax.f32 %v1047_v62, 0.0 }
 0x114   : > { %v1576_v8 = vadd.f32 %v1575_v63, %v1353_v1  ;;  %v1714_v9 = vadd.f32 %v1713_v0, %v1355_v2 }
 0x115   : > { %v1645_v10 = vadd.f32 %v1644_v3, %v1354_v5  ;;  %v1783_v11 = vadd.f32 %v1782_v4, %v1356_v7  ;;  %v697_v12 = vpop.f32.mrb[24].mxu0  ;;  %v1050_v13 = vpop.f32.mrb[24].mxu1 }
 0x116   : > { %v698_v14 = vadd.f32 %v697_v12, %v2373_v50  ;;  %v1051_v15 = vadd.f32 %v1050_v13, %v2375_v51  ;;  %v699_v6 = vpop.f32.mrb[25].mxu0  ;;  %v1052_v16 = vpop.f32.mrb[25].mxu1 }
 0x117   : > { %v700_v17 = vadd.f32 %v699_v6, %v2377_v52  ;;  %v1053_v18 = vadd.f32 %v1052_v16, %v2379_v53  ;;  %v701_v19 = vpop.f32.mrb[26].mxu0  ;;  %v1054_v20 = vpop.f32.mrb[26].mxu1 }
 0x118   : > { %v1357_v21 = vmax.f32 %v698_v14, 0.0  ;;  %v1359_v22 = vmax.f32 %v1051_v15, 0.0  ;;  %v702_v23 = vadd.f32 %v701_v19, %v2373_v50  ;;  %v1055_v24 = vadd.f32 %v1054_v20, %v2375_v51  ;;  %v703_v25 = vpop.f32.mrb[27].mxu0  ;;  %v1056_v26 = vpop.f32.mrb[27].mxu1 }
 0x119   : > { %v1358_v27 = vmax.f32 %v700_v17, 0.0  ;;  %v1360_v28 = vmax.f32 %v1053_v18, 0.0  ;;  %v704_v29 = vadd.f32 %v703_v25, %v2377_v52  ;;  %v1057_v30 = vadd.f32 %v1056_v26, %v2379_v53 }
 0x11a   : > { %v1577_v31 = vadd.f32 %v1576_v8, %v1357_v21  ;;  %v1715_v32 = vadd.f32 %v1714_v9, %v1359_v22  ;;  %v1361_v33 = vmax.f32 %v702_v23, 0.0  ;;  %v1363_v34 = vmax.f32 %v1055_v24, 0.0 }
 0x11b   : > { %v1646_v35 = vadd.f32 %v1645_v10, %v1358_v27  ;;  %v1784_v36 = vadd.f32 %v1783_v11, %v1360_v28  ;;  %v1362_v37 = vmax.f32 %v704_v29, 0.0  ;;  %v1364_v38 = vmax.f32 %v1057_v30, 0.0 }
 0x11c   : > { %v1578_v39 = vadd.f32 %v1577_v31, %v1361_v33  ;;  %v1716_v40 = vadd.f32 %v1715_v32, %v1363_v34 }
 0x11d   : > { %v1647_v41 = vadd.f32 %v1646_v35, %v1362_v37  ;;  %v1785_v44 = vadd.f32 %v1784_v36, %v1364_v38  ;;  %v707_v45 = vpop.f32.mrb[28].mxu0  ;;  %v1060_v46 = vpop.f32.mrb[28].mxu1 }
 0x11e   : > { %v708_v47 = vadd.f32 %v707_v45, %v2373_v50  ;;  %v1061_v48 = vadd.f32 %v1060_v46, %v2375_v51  ;;  %v709_v49 = vpop.f32.mrb[29].mxu0  ;;  %v1062_v54 = vpop.f32.mrb[29].mxu1 }
 0x11f   : > { %v710_v55 = vadd.f32 %v709_v49, %v2377_v52  ;;  %v1063_v56 = vadd.f32 %v1062_v54, %v2379_v53  ;;  %v711_v57 = vpop.f32.mrb[30].mxu0  ;;  %v1064_v58 = vpop.f32.mrb[30].mxu1 }
 0x120   : > { %v1365_v59 = vmax.f32 %v708_v47, 0.0  ;;  %v1367_v60 = vmax.f32 %v1061_v48, 0.0  ;;  %v712_v61 = vadd.f32 %v711_v57, %v2373_v50  ;;  %v1065_v62 = vadd.f32 %v1064_v58, %v2375_v51  ;;  %v713_v63 = vpop.f32.mrb[31].mxu0  ;;  %v1066_v0 = vpop.f32.mrb[31].mxu1 }
 0x121   : > { %v1366_v1 = vmax.f32 %v710_v55, 0.0  ;;  %v1368_v2 = vmax.f32 %v1063_v56, 0.0  ;;  %v714_v3 = vadd.f32 %v713_v63, %v2377_v52  ;;  %v1067_v4 = vadd.f32 %v1066_v0, %v2379_v53 }
 0x122   : > { %v1579_v5 = vadd.f32 %v1578_v39, %v1365_v59  ;;  %v1717_v7 = vadd.f32 %v1716_v40, %v1367_v60  ;;  %v1369_v8 = vmax.f32 %v712_v61, 0.0  ;;  %v1371_v9 = vmax.f32 %v1065_v62, 0.0 }
 0x123   : > { %v1648_v10 = vadd.f32 %v1647_v41, %v1366_v1  ;;  %v1786_v11 = vadd.f32 %v1785_v44, %v1368_v2  ;;  %v1370_v12 = vmax.f32 %v714_v3, 0.0  ;;  %v1372_v13 = vmax.f32 %v1067_v4, 0.0 }
 0x124   : > { %v1580_v14 = vadd.f32 %v1579_v5, %v1369_v8  ;;  %v1718_v15 = vadd.f32 %v1717_v7, %v1371_v9 }
 0x125   : > { %v1649_v6 = vadd.f32 %v1648_v10, %v1370_v12  ;;  %v1787_v16 = vadd.f32 %v1786_v11, %v1372_v13  ;;  %v717_v17 = vpop.f32.mrb[32].mxu0  ;;  %v1070_v18 = vpop.f32.mrb[32].mxu1 }
 0x126   : > { %v718_v19 = vadd.f32 %v717_v17, %v2373_v50  ;;  %v1071_v20 = vadd.f32 %v1070_v18, %v2375_v51  ;;  %v719_v21 = vpop.f32.mrb[33].mxu0  ;;  %v1072_v22 = vpop.f32.mrb[33].mxu1 }
 0x127   : > { %v720_v23 = vadd.f32 %v719_v21, %v2377_v52  ;;  %v1073_v24 = vadd.f32 %v1072_v22, %v2379_v53  ;;  %v721_v25 = vpop.f32.mrb[34].mxu0  ;;  %v1074_v26 = vpop.f32.mrb[34].mxu1 }
 0x128   : > { %v1373_v27 = vmax.f32 %v718_v19, 0.0  ;;  %v1375_v28 = vmax.f32 %v1071_v20, 0.0  ;;  %v722_v29 = vadd.f32 %v721_v25, %v2373_v50  ;;  %v1075_v30 = vadd.f32 %v1074_v26, %v2375_v51  ;;  %v723_v31 = vpop.f32.mrb[35].mxu0  ;;  %v1076_v32 = vpop.f32.mrb[35].mxu1 }
 0x129   : > { %v1374_v33 = vmax.f32 %v720_v23, 0.0  ;;  %v1376_v34 = vmax.f32 %v1073_v24, 0.0  ;;  %v724_v35 = vadd.f32 %v723_v31, %v2377_v52  ;;  %v1077_v36 = vadd.f32 %v1076_v32, %v2379_v53 }
 0x12a   : > { %v1581_v37 = vadd.f32 %v1580_v14, %v1373_v27  ;;  %v1719_v38 = vadd.f32 %v1718_v15, %v1375_v28  ;;  %v1377_v39 = vmax.f32 %v722_v29, 0.0  ;;  %v1379_v40 = vmax.f32 %v1075_v30, 0.0 }
 0x12b   : > { %v1650_v41 = vadd.f32 %v1649_v6, %v1374_v33  ;;  %v1788_v44 = vadd.f32 %v1787_v16, %v1376_v34  ;;  %v1378_v45 = vmax.f32 %v724_v35, 0.0  ;;  %v1380_v46 = vmax.f32 %v1077_v36, 0.0 }
 0x12c   : > { %v1582_v47 = vadd.f32 %v1581_v37, %v1377_v39  ;;  %v1720_v48 = vadd.f32 %v1719_v38, %v1379_v40 }
 0x12d   : > { %v1651_v49 = vadd.f32 %v1650_v41, %v1378_v45  ;;  %v1789_v54 = vadd.f32 %v1788_v44, %v1380_v46  ;;  %v727_v55 = vpop.f32.mrb[36].mxu0  ;;  %v1080_v56 = vpop.f32.mrb[36].mxu1 }
 0x12e   : > { %v728_v57 = vadd.f32 %v727_v55, %v2373_v50  ;;  %v1081_v58 = vadd.f32 %v1080_v56, %v2375_v51  ;;  %v729_v59 = vpop.f32.mrb[37].mxu0  ;;  %v1082_v60 = vpop.f32.mrb[37].mxu1 }
 0x12f   : > { %v730_v61 = vadd.f32 %v729_v59, %v2377_v52  ;;  %v1083_v62 = vadd.f32 %v1082_v60, %v2379_v53  ;;  %v731_v63 = vpop.f32.mrb[38].mxu0  ;;  %v1084_v0 = vpop.f32.mrb[38].mxu1 }
 0x130   : > { %v1381_v1 = vmax.f32 %v728_v57, 0.0  ;;  %v1383_v2 = vmax.f32 %v1081_v58, 0.0  ;;  %v732_v3 = vadd.f32 %v731_v63, %v2373_v50  ;;  %v1085_v4 = vadd.f32 %v1084_v0, %v2375_v51  ;;  %v733_v5 = vpop.f32.mrb[39].mxu0  ;;  %v1086_v7 = vpop.f32.mrb[39].mxu1 }
 0x131   : > { %v1382_v8 = vmax.f32 %v730_v61, 0.0  ;;  %v1384_v9 = vmax.f32 %v1083_v62, 0.0  ;;  %v734_v10 = vadd.f32 %v733_v5, %v2377_v52  ;;  %v1087_v11 = vadd.f32 %v1086_v7, %v2379_v53 }
 0x132   : > { %v1583_v12 = vadd.f32 %v1582_v47, %v1381_v1  ;;  %v1721_v13 = vadd.f32 %v1720_v48, %v1383_v2  ;;  %v1385_v14 = vmax.f32 %v732_v3, 0.0  ;;  %v1387_v15 = vmax.f32 %v1085_v4, 0.0 }
 0x133   : > { %v1652_v6 = vadd.f32 %v1651_v49, %v1382_v8  ;;  %v1790_v16 = vadd.f32 %v1789_v54, %v1384_v9  ;;  %v1386_v17 = vmax.f32 %v734_v10, 0.0  ;;  %v1388_v18 = vmax.f32 %v1087_v11, 0.0 }
 0x134   : > { %v1584_v19 = vadd.f32 %v1583_v12, %v1385_v14  ;;  %v1722_v20 = vadd.f32 %v1721_v13, %v1387_v15 }
 0x135   : > { %v1653_v21 = vadd.f32 %v1652_v6, %v1386_v17  ;;  %v1791_v22 = vadd.f32 %v1790_v16, %v1388_v18  ;;  %v737_v23 = vpop.f32.mrb[40].mxu0  ;;  %v1090_v24 = vpop.f32.mrb[40].mxu1 }
 0x136   : > { %v738_v25 = vadd.f32 %v737_v23, %v2373_v50  ;;  %v1091_v26 = vadd.f32 %v1090_v24, %v2375_v51  ;;  %v739_v27 = vpop.f32.mrb[41].mxu0  ;;  %v1092_v28 = vpop.f32.mrb[41].mxu1 }
 0x137   : > { %v740_v29 = vadd.f32 %v739_v27, %v2377_v52  ;;  %v1093_v30 = vadd.f32 %v1092_v28, %v2379_v53  ;;  %v741_v31 = vpop.f32.mrb[42].mxu0  ;;  %v1094_v32 = vpop.f32.mrb[42].mxu1 }
 0x138   : > { %v1389_v33 = vmax.f32 %v738_v25, 0.0  ;;  %v1391_v34 = vmax.f32 %v1091_v26, 0.0  ;;  %v742_v35 = vadd.f32 %v741_v31, %v2373_v50  ;;  %v1095_v36 = vadd.f32 %v1094_v32, %v2375_v51  ;;  %v743_v37 = vpop.f32.mrb[43].mxu0  ;;  %v1096_v38 = vpop.f32.mrb[43].mxu1 }
 0x139   : > { %v1390_v39 = vmax.f32 %v740_v29, 0.0  ;;  %v1392_v40 = vmax.f32 %v1093_v30, 0.0  ;;  %v744_v41 = vadd.f32 %v743_v37, %v2377_v52  ;;  %v1097_v44 = vadd.f32 %v1096_v38, %v2379_v53 }
 0x13a   : > { %v1585_v45 = vadd.f32 %v1584_v19, %v1389_v33  ;;  %v1723_v46 = vadd.f32 %v1722_v20, %v1391_v34  ;;  %v1393_v47 = vmax.f32 %v742_v35, 0.0  ;;  %v1395_v48 = vmax.f32 %v1095_v36, 0.0 }
 0x13b   : > { %v1654_v49 = vadd.f32 %v1653_v21, %v1390_v39  ;;  %v1792_v54 = vadd.f32 %v1791_v22, %v1392_v40  ;;  %v1394_v55 = vmax.f32 %v744_v41, 0.0  ;;  %v1396_v56 = vmax.f32 %v1097_v44, 0.0 }
 0x13c   : > { %v1586_v57 = vadd.f32 %v1585_v45, %v1393_v47  ;;  %v1724_v58 = vadd.f32 %v1723_v46, %v1395_v48 }
 0x13d   : > { %v1655_v59 = vadd.f32 %v1654_v49, %v1394_v55  ;;  %v1793_v60 = vadd.f32 %v1792_v54, %v1396_v56  ;;  %v747_v61 = vpop.f32.mrb[44].mxu0  ;;  %v1100_v62 = vpop.f32.mrb[44].mxu1 }
 0x13e   : > { %v748_v63 = vadd.f32 %v747_v61, %v2373_v50  ;;  %v1101_v0 = vadd.f32 %v1100_v62, %v2375_v51  ;;  %v749_v1 = vpop.f32.mrb[45].mxu0  ;;  %v1102_v2 = vpop.f32.mrb[45].mxu1 }
 0x13f   : > { %v750_v3 = vadd.f32 %v749_v1, %v2377_v52  ;;  %v1103_v4 = vadd.f32 %v1102_v2, %v2379_v53  ;;  %v751_v5 = vpop.f32.mrb[46].mxu0  ;;  %v1104_v7 = vpop.f32.mrb[46].mxu1 }
 0x140   : > { %v1397_v8 = vmax.f32 %v748_v63, 0.0  ;;  %v1399_v9 = vmax.f32 %v1101_v0, 0.0  ;;  %v752_v10 = vadd.f32 %v751_v5, %v2373_v50  ;;  %v1105_v11 = vadd.f32 %v1104_v7, %v2375_v51  ;;  %v753_v12 = vpop.f32.mrb[47].mxu0  ;;  %v1106_v13 = vpop.f32.mrb[47].mxu1 }
 0x141   : > { %v1398_v14 = vmax.f32 %v750_v3, 0.0  ;;  %v1400_v15 = vmax.f32 %v1103_v4, 0.0  ;;  %v754_v6 = vadd.f32 %v753_v12, %v2377_v52  ;;  %v1107_v16 = vadd.f32 %v1106_v13, %v2379_v53 }
 0x142   : > { %v1587_v17 = vadd.f32 %v1586_v57, %v1397_v8  ;;  %v1725_v18 = vadd.f32 %v1724_v58, %v1399_v9  ;;  %v1401_v19 = vmax.f32 %v752_v10, 0.0  ;;  %v1403_v20 = vmax.f32 %v1105_v11, 0.0 }
 0x143   : > { %v1656_v21 = vadd.f32 %v1655_v59, %v1398_v14  ;;  %v1794_v22 = vadd.f32 %v1793_v60, %v1400_v15  ;;  %v1402_v23 = vmax.f32 %v754_v6, 0.0  ;;  %v1404_v24 = vmax.f32 %v1107_v16, 0.0 }
 0x144   : > { %v1588_v25 = vadd.f32 %v1587_v17, %v1401_v19  ;;  %v1726_v26 = vadd.f32 %v1725_v18, %v1403_v20 }
 0x145   : > { %v1657_v27 = vadd.f32 %v1656_v21, %v1402_v23  ;;  %v1795_v28 = vadd.f32 %v1794_v22, %v1404_v24  ;;  %v757_v29 = vpop.f32.mrb[48].mxu0  ;;  %v1110_v30 = vpop.f32.mrb[48].mxu1 }
 0x146   : > { %v758_v31 = vadd.f32 %v757_v29, %v2373_v50  ;;  %v1111_v32 = vadd.f32 %v1110_v30, %v2375_v51  ;;  %v759_v33 = vpop.f32.mrb[49].mxu0  ;;  %v1112_v34 = vpop.f32.mrb[49].mxu1 }
 0x147   : > { %v760_v35 = vadd.f32 %v759_v33, %v2377_v52  ;;  %v1113_v36 = vadd.f32 %v1112_v34, %v2379_v53  ;;  %v761_v37 = vpop.f32.mrb[50].mxu0  ;;  %v1114_v38 = vpop.f32.mrb[50].mxu1 }
 0x148   : > { %v1405_v39 = vmax.f32 %v758_v31, 0.0  ;;  %v1407_v40 = vmax.f32 %v1111_v32, 0.0  ;;  %v762_v41 = vadd.f32 %v761_v37, %v2373_v50  ;;  %v1115_v44 = vadd.f32 %v1114_v38, %v2375_v51  ;;  %v763_v45 = vpop.f32.mrb[51].mxu0  ;;  %v1116_v46 = vpop.f32.mrb[51].mxu1 }
 0x149   : > { %v1406_v47 = vmax.f32 %v760_v35, 0.0  ;;  %v1408_v48 = vmax.f32 %v1113_v36, 0.0  ;;  %v764_v49 = vadd.f32 %v763_v45, %v2377_v52  ;;  %v1117_v54 = vadd.f32 %v1116_v46, %v2379_v53 }
 0x14a   : > { %v1589_v55 = vadd.f32 %v1588_v25, %v1405_v39  ;;  %v1727_v56 = vadd.f32 %v1726_v26, %v1407_v40  ;;  %v1409_v57 = vmax.f32 %v762_v41, 0.0  ;;  %v1411_v58 = vmax.f32 %v1115_v44, 0.0 }
 0x14b   : > { %v1658_v59 = vadd.f32 %v1657_v27, %v1406_v47  ;;  %v1796_v60 = vadd.f32 %v1795_v28, %v1408_v48  ;;  %v1410_v61 = vmax.f32 %v764_v49, 0.0  ;;  %v1412_v62 = vmax.f32 %v1117_v54, 0.0 }
 0x14c   : > { %v1590_v63 = vadd.f32 %v1589_v55, %v1409_v57  ;;  %v1728_v0 = vadd.f32 %v1727_v56, %v1411_v58 }
 0x14d   : > { %v1659_v1 = vadd.f32 %v1658_v59, %v1410_v61  ;;  %v1797_v2 = vadd.f32 %v1796_v60, %v1412_v62  ;;  %v767_v3 = vpop.f32.mrb[52].mxu0  ;;  %v1120_v4 = vpop.f32.mrb[52].mxu1 }
 0x14e   : > { %v768_v5 = vadd.f32 %v767_v3, %v2373_v50  ;;  %v1121_v7 = vadd.f32 %v1120_v4, %v2375_v51  ;;  %v769_v8 = vpop.f32.mrb[53].mxu0  ;;  %v1122_v9 = vpop.f32.mrb[53].mxu1 }
 0x14f   : > { %v770_v10 = vadd.f32 %v769_v8, %v2377_v52  ;;  %v1123_v11 = vadd.f32 %v1122_v9, %v2379_v53  ;;  %v771_v12 = vpop.f32.mrb[54].mxu0  ;;  %v1124_v13 = vpop.f32.mrb[54].mxu1 }
 0x150   : > { %v1413_v14 = vmax.f32 %v768_v5, 0.0  ;;  %v1415_v15 = vmax.f32 %v1121_v7, 0.0  ;;  %v772_v6 = vadd.f32 %v771_v12, %v2373_v50  ;;  %v1125_v16 = vadd.f32 %v1124_v13, %v2375_v51  ;;  %v773_v17 = vpop.f32.mrb[55].mxu0  ;;  %v1126_v18 = vpop.f32.mrb[55].mxu1 }
 0x151   : > { %v1414_v19 = vmax.f32 %v770_v10, 0.0  ;;  %v1416_v20 = vmax.f32 %v1123_v11, 0.0  ;;  %v774_v21 = vadd.f32 %v773_v17, %v2377_v52  ;;  %v1127_v22 = vadd.f32 %v1126_v18, %v2379_v53 }
 0x152   : > { %v1591_v23 = vadd.f32 %v1590_v63, %v1413_v14  ;;  %v1729_v24 = vadd.f32 %v1728_v0, %v1415_v15  ;;  %v1417_v25 = vmax.f32 %v772_v6, 0.0  ;;  %v1419_v26 = vmax.f32 %v1125_v16, 0.0 }
 0x153   : > { %v1660_v27 = vadd.f32 %v1659_v1, %v1414_v19  ;;  %v1798_v28 = vadd.f32 %v1797_v2, %v1416_v20  ;;  %v1418_v29 = vmax.f32 %v774_v21, 0.0  ;;  %v1420_v30 = vmax.f32 %v1127_v22, 0.0 }
 0x154   : > { %v1592_v31 = vadd.f32 %v1591_v23, %v1417_v25  ;;  %v1730_v32 = vadd.f32 %v1729_v24, %v1419_v26 }
 0x155   : > { %v1661_v33 = vadd.f32 %v1660_v27, %v1418_v29  ;;  %v1799_v34 = vadd.f32 %v1798_v28, %v1420_v30  ;;  %v777_v35 = vpop.f32.mrb[56].mxu0  ;;  %v1130_v36 = vpop.f32.mrb[56].mxu1 }
 0x156   : > { %v778_v37 = vadd.f32 %v777_v35, %v2373_v50  ;;  %v1131_v38 = vadd.f32 %v1130_v36, %v2375_v51  ;;  %v779_v39 = vpop.f32.mrb[57].mxu0  ;;  %v1132_v40 = vpop.f32.mrb[57].mxu1 }
 0x157   : > { %v780_v41 = vadd.f32 %v779_v39, %v2377_v52  ;;  %v1133_v44 = vadd.f32 %v1132_v40, %v2379_v53  ;;  %v781_v45 = vpop.f32.mrb[58].mxu0  ;;  %v1134_v46 = vpop.f32.mrb[58].mxu1 }
 0x158   : > { %v1421_v47 = vmax.f32 %v778_v37, 0.0  ;;  %v1423_v48 = vmax.f32 %v1131_v38, 0.0  ;;  %v782_v49 = vadd.f32 %v781_v45, %v2373_v50  ;;  %v1135_v54 = vadd.f32 %v1134_v46, %v2375_v51  ;;  %v783_v55 = vpop.f32.mrb[59].mxu0  ;;  %v1136_v56 = vpop.f32.mrb[59].mxu1 }
 0x159   : > { %v1422_v57 = vmax.f32 %v780_v41, 0.0  ;;  %v1424_v58 = vmax.f32 %v1133_v44, 0.0  ;;  %v784_v59 = vadd.f32 %v783_v55, %v2377_v52  ;;  %v1137_v60 = vadd.f32 %v1136_v56, %v2379_v53 }
 0x15a   : > { %v1593_v61 = vadd.f32 %v1592_v31, %v1421_v47  ;;  %v1731_v62 = vadd.f32 %v1730_v32, %v1423_v48  ;;  %v1425_v63 = vmax.f32 %v782_v49, 0.0  ;;  %v1427_v0 = vmax.f32 %v1135_v54, 0.0 }
 0x15b   : > { %v1662_v1 = vadd.f32 %v1661_v33, %v1422_v57  ;;  %v1800_v2 = vadd.f32 %v1799_v34, %v1424_v58  ;;  %v1426_v3 = vmax.f32 %v784_v59, 0.0  ;;  %v1428_v4 = vmax.f32 %v1137_v60, 0.0 }
 0x15c   : > { %v1594_v5 = vadd.f32 %v1593_v61, %v1425_v63  ;;  %v1732_v7 = vadd.f32 %v1731_v62, %v1427_v0 }
 0x15d   : > { %v1663_v8 = vadd.f32 %v1662_v1, %v1426_v3  ;;  %v1801_v9 = vadd.f32 %v1800_v2, %v1428_v4  ;;  %v787_v10 = vpop.f32.mrb[60].mxu0  ;;  %v1140_v11 = vpop.f32.mrb[60].mxu1 }
 0x15e   : > { %v788_v12 = vadd.f32 %v787_v10, %v2373_v50  ;;  %v1141_v13 = vadd.f32 %v1140_v11, %v2375_v51  ;;  %v789_v14 = vpop.f32.mrb[61].mxu0  ;;  %v1142_v15 = vpop.f32.mrb[61].mxu1 }
 0x15f   : > { %v790_v6 = vadd.f32 %v789_v14, %v2377_v52  ;;  %v1143_v16 = vadd.f32 %v1142_v15, %v2379_v53  ;;  %v791_v17 = vpop.f32.mrb[62].mxu0  ;;  %v1144_v18 = vpop.f32.mrb[62].mxu1 }
 0x160   : > { %v1429_v19 = vmax.f32 %v788_v12, 0.0  ;;  %v1431_v20 = vmax.f32 %v1141_v13, 0.0  ;;  %v792_v21 = vadd.f32 %v791_v17, %v2373_v50  ;;  %v1145_v22 = vadd.f32 %v1144_v18, %v2375_v51  ;;  %v793_v23 = vpop.f32.mrb[63].mxu0  ;;  %v1146_v24 = vpop.f32.mrb[63].mxu1 }
 0x161   : > { %v1430_v25 = vmax.f32 %v790_v6, 0.0  ;;  %v1432_v26 = vmax.f32 %v1143_v16, 0.0  ;;  %v794_v27 = vadd.f32 %v793_v23, %v2377_v52  ;;  %v1147_v28 = vadd.f32 %v1146_v24, %v2379_v53 }
 0x162   : > { %v1595_v29 = vadd.f32 %v1594_v5, %v1429_v19  ;;  %v1733_v30 = vadd.f32 %v1732_v7, %v1431_v20  ;;  %v1433_v31 = vmax.f32 %v792_v21, 0.0  ;;  %v1435_v32 = vmax.f32 %v1145_v22, 0.0 }
 0x163   : > { %v1664_v33 = vadd.f32 %v1663_v8, %v1430_v25  ;;  %v1802_v34 = vadd.f32 %v1801_v9, %v1432_v26  ;;  %v1434_v35 = vmax.f32 %v794_v27, 0.0  ;;  %v1436_v36 = vmax.f32 %v1147_v28, 0.0 }
 0x164   : > { %v1596_v37 = vadd.f32 %v1595_v29, %v1433_v31  ;;  %v1734_v38 = vadd.f32 %v1733_v30, %v1435_v32 }
 0x165   : > { %v1665_v39 = vadd.f32 %v1664_v33, %v1434_v35  ;;  %v1803_v40 = vadd.f32 %v1802_v34, %v1436_v36  ;;  %v797_v41 = vpop.f32.mrb[64].mxu0  ;;  %v1150_v44 = vpop.f32.mrb[64].mxu1 }
 0x166   : > { %v798_v45 = vadd.f32 %v797_v41, %v2373_v50  ;;  %v1151_v46 = vadd.f32 %v1150_v44, %v2375_v51  ;;  %v799_v47 = vpop.f32.mrb[65].mxu0  ;;  %v1152_v48 = vpop.f32.mrb[65].mxu1 }
 0x167   : > { %v800_v49 = vadd.f32 %v799_v47, %v2377_v52  ;;  %v1153_v54 = vadd.f32 %v1152_v48, %v2379_v53  ;;  %v801_v55 = vpop.f32.mrb[66].mxu0  ;;  %v1154_v56 = vpop.f32.mrb[66].mxu1 }
 0x168   : > { %v1437_v57 = vmax.f32 %v798_v45, 0.0  ;;  %v1439_v58 = vmax.f32 %v1151_v46, 0.0  ;;  %v802_v59 = vadd.f32 %v801_v55, %v2373_v50  ;;  %v1155_v60 = vadd.f32 %v1154_v56, %v2375_v51  ;;  %v803_v61 = vpop.f32.mrb[67].mxu0  ;;  %v1156_v62 = vpop.f32.mrb[67].mxu1 }
 0x169   : > { %v1438_v63 = vmax.f32 %v800_v49, 0.0  ;;  %v1440_v0 = vmax.f32 %v1153_v54, 0.0  ;;  %v804_v1 = vadd.f32 %v803_v61, %v2377_v52  ;;  %v1157_v2 = vadd.f32 %v1156_v62, %v2379_v53 }
 0x16a   : > { %v1597_v3 = vadd.f32 %v1596_v37, %v1437_v57  ;;  %v1735_v4 = vadd.f32 %v1734_v38, %v1439_v58  ;;  %v1441_v5 = vmax.f32 %v802_v59, 0.0  ;;  %v1443_v7 = vmax.f32 %v1155_v60, 0.0 }
 0x16b   : > { %v1666_v8 = vadd.f32 %v1665_v39, %v1438_v63  ;;  %v1804_v9 = vadd.f32 %v1803_v40, %v1440_v0  ;;  %v1442_v10 = vmax.f32 %v804_v1, 0.0  ;;  %v1444_v11 = vmax.f32 %v1157_v2, 0.0 }
 0x16c   : > { %v1598_v12 = vadd.f32 %v1597_v3, %v1441_v5  ;;  %v1736_v13 = vadd.f32 %v1735_v4, %v1443_v7  ;;  %v2156_v60 = vmov 0.0  }
 0x16d   : > { %v1667_v14 = vadd.f32 %v1666_v8, %v1442_v10  ;;  %v1805_v15 = vadd.f32 %v1804_v9, %v1444_v11  ;;  %v807_v6 = vpop.f32.mrb[68].mxu0  ;;  %v1160_v16 = vpop.f32.mrb[68].mxu1  ;;  %199 = vst.msk [vmem:[#allocation2] sm:$0xf] %vm2551_vm3, %v2156_v60 }
 0x16e   : > { %v808_v17 = vadd.f32 %v807_v6, %v2373_v50  ;;  %v1161_v18 = vadd.f32 %v1160_v16, %v2375_v51  ;;  %v809_v19 = vpop.f32.mrb[69].mxu0  ;;  %v1162_v20 = vpop.f32.mrb[69].mxu1 }
 0x16f   : > { %v810_v21 = vadd.f32 %v809_v19, %v2377_v52  ;;  %v1163_v22 = vadd.f32 %v1162_v20, %v2379_v53  ;;  %v811_v23 = vpop.f32.mrb[70].mxu0  ;;  %v1164_v24 = vpop.f32.mrb[70].mxu1 }
 0x170   : > { %v1445_v25 = vmax.f32 %v808_v17, 0.0  ;;  %v1447_v26 = vmax.f32 %v1161_v18, 0.0  ;;  %v812_v27 = vadd.f32 %v811_v23, %v2373_v50  ;;  %v1165_v28 = vadd.f32 %v1164_v24, %v2375_v51  ;;  %v813_v29 = vpop.f32.mrb[71].mxu0  ;;  %v1166_v30 = vpop.f32.mrb[71].mxu1 }
 0x171   : > { %v1446_v31 = vmax.f32 %v810_v21, 0.0  ;;  %v1448_v32 = vmax.f32 %v1163_v22, 0.0  ;;  %v814_v33 = vadd.f32 %v813_v29, %v2377_v52  ;;  %v1167_v34 = vadd.f32 %v1166_v30, %v2379_v53 }
 0x172   : > { %v1599_v35 = vadd.f32 %v1598_v12, %v1445_v25  ;;  %v1737_v36 = vadd.f32 %v1736_v13, %v1447_v26  ;;  %v1449_v37 = vmax.f32 %v812_v27, 0.0  ;;  %v1451_v38 = vmax.f32 %v1165_v28, 0.0 }
 0x173   : > { %v1668_v39 = vadd.f32 %v1667_v14, %v1446_v31  ;;  %v1806_v40 = vadd.f32 %v1805_v15, %v1448_v32  ;;  %v1450_v41 = vmax.f32 %v814_v33, 0.0  ;;  %v1452_v44 = vmax.f32 %v1167_v34, 0.0 }
 0x174   : > { %v1600_v45 = vadd.f32 %v1599_v35, %v1449_v37  ;;  %v1738_v46 = vadd.f32 %v1737_v36, %v1451_v38 }
 0x175   : > { %v1669_v48 = vadd.f32 %v1668_v39, %v1450_v41  ;;  %v1807_v49 = vadd.f32 %v1806_v40, %v1452_v44  ;;  %v817_v54 = vpop.f32.mrb[72].mxu0  ;;  %v1170_v55 = vpop.f32.mrb[72].mxu1 }
 0x176   : > { %v818_v56 = vadd.f32 %v817_v54, %v2373_v50  ;;  %v1171_v57 = vadd.f32 %v1170_v55, %v2375_v51  ;;  %v819_v58 = vpop.f32.mrb[73].mxu0  ;;  %v1172_v59 = vpop.f32.mrb[73].mxu1 }
 0x177   : > { %v820_v61 = vadd.f32 %v819_v58, %v2377_v52  ;;  %v1173_v42 = vadd.f32 %v1172_v59, %v2379_v53  ;;  %v821_v62 = vpop.f32.mrb[74].mxu0  ;;  %v1174_v63 = vpop.f32.mrb[74].mxu1 }
 0x178   : > { %v1453_v0 = vmax.f32 %v818_v56, 0.0  ;;  %v1455_v1 = vmax.f32 %v1171_v57, 0.0  ;;  %v822_v2 = vadd.f32 %v821_v62, %v2373_v50  ;;  %v1175_v3 = vadd.f32 %v1174_v63, %v2375_v51  ;;  %v823_v4 = vpop.f32.mrb[75].mxu0  ;;  %v1176_v5 = vpop.f32.mrb[75].mxu1 }
 0x179   : > { %v1454_v7 = vmax.f32 %v820_v61, 0.0  ;;  %v1456_v8 = vmax.f32 %v1173_v42, 0.0  ;;  %v824_v9 = vadd.f32 %v823_v4, %v2377_v52  ;;  %v1177_v10 = vadd.f32 %v1176_v5, %v2379_v53 }
 0x17a   : > { %v1601_v11 = vadd.f32 %v1600_v45, %v1453_v0  ;;  %v1739_v12 = vadd.f32 %v1738_v46, %v1455_v1  ;;  %v1457_v13 = vmax.f32 %v822_v2, 0.0  ;;  %v1459_v14 = vmax.f32 %v1175_v3, 0.0 }
 0x17b   : > { %v1670_v15 = vadd.f32 %v1669_v48, %v1454_v7  ;;  %v1808_v6 = vadd.f32 %v1807_v49, %v1456_v8  ;;  %v1458_v16 = vmax.f32 %v824_v9, 0.0  ;;  %v1460_v17 = vmax.f32 %v1177_v10, 0.0 }
 0x17c   : > { %v1602_v18 = vadd.f32 %v1601_v11, %v1457_v13  ;;  %v1740_v19 = vadd.f32 %v1739_v12, %v1459_v14 }
 0x17d   : > { %v1671_v20 = vadd.f32 %v1670_v15, %v1458_v16  ;;  %v1809_v21 = vadd.f32 %v1808_v6, %v1460_v17  ;;  %v827_v22 = vpop.f32.mrb[76].mxu0  ;;  %v1180_v23 = vpop.f32.mrb[76].mxu1 }
 0x17e   : > { %v828_v24 = vadd.f32 %v827_v22, %v2373_v50  ;;  %v1181_v25 = vadd.f32 %v1180_v23, %v2375_v51  ;;  %v829_v26 = vpop.f32.mrb[77].mxu0  ;;  %v1182_v27 = vpop.f32.mrb[77].mxu1 }
 0x17f   : > { %v830_v28 = vadd.f32 %v829_v26, %v2377_v52  ;;  %v1183_v29 = vadd.f32 %v1182_v27, %v2379_v53  ;;  %v831_v30 = vpop.f32.mrb[78].mxu0  ;;  %v1184_v31 = vpop.f32.mrb[78].mxu1 }
 0x180   : > { %v1461_v32 = vmax.f32 %v828_v24, 0.0  ;;  %v1463_v33 = vmax.f32 %v1181_v25, 0.0  ;;  %v832_v34 = vadd.f32 %v831_v30, %v2373_v50  ;;  %v1185_v35 = vadd.f32 %v1184_v31, %v2375_v51  ;;  %v833_v36 = vpop.f32.mrb[79].mxu0  ;;  %v1186_v37 = vpop.f32.mrb[79].mxu1 }
 0x181   : > { %v1462_v38 = vmax.f32 %v830_v28, 0.0  ;;  %v1464_v39 = vmax.f32 %v1183_v29, 0.0  ;;  %v834_v40 = vadd.f32 %v833_v36, %v2377_v52  ;;  %v1187_v41 = vadd.f32 %v1186_v37, %v2379_v53 }
 0x182   : > { %v1603_v44 = vadd.f32 %v1602_v18, %v1461_v32  ;;  %v1741_v45 = vadd.f32 %v1740_v19, %v1463_v33  ;;  %v1465_v46 = vmax.f32 %v832_v34, 0.0  ;;  %v1467_v48 = vmax.f32 %v1185_v35, 0.0 }
 0x183   : > { %v1672_v49 = vadd.f32 %v1671_v20, %v1462_v38  ;;  %v1810_v54 = vadd.f32 %v1809_v21, %v1464_v39  ;;  %v1466_v55 = vmax.f32 %v834_v40, 0.0  ;;  %v1468_v56 = vmax.f32 %v1187_v41, 0.0 }
 0x184   : > { %v1604_v57 = vadd.f32 %v1603_v44, %v1465_v46  ;;  %v1742_v58 = vadd.f32 %v1741_v45, %v1467_v48 }
 0x185   : > { %v1673_v59 = vadd.f32 %v1672_v49, %v1466_v55  ;;  %v1811_v60 = vadd.f32 %v1810_v54, %v1468_v56  ;;  %v837_v61 = vpop.f32.mrb[80].mxu0  ;;  %v1190_v42 = vpop.f32.mrb[80].mxu1 }
 0x186   : > { %v838_v62 = vadd.f32 %v837_v61, %v2373_v50  ;;  %v1191_v63 = vadd.f32 %v1190_v42, %v2375_v51  ;;  %v839_v0 = vpop.f32.mrb[81].mxu0  ;;  %v1192_v1 = vpop.f32.mrb[81].mxu1 }
 0x187   : > { %v840_v2 = vadd.f32 %v839_v0, %v2377_v52  ;;  %v1193_v3 = vadd.f32 %v1192_v1, %v2379_v53  ;;  %v841_v4 = vpop.f32.mrb[82].mxu0  ;;  %v1194_v5 = vpop.f32.mrb[82].mxu1 }
 0x188   : > { %v1469_v7 = vmax.f32 %v838_v62, 0.0  ;;  %v1471_v8 = vmax.f32 %v1191_v63, 0.0  ;;  %v842_v9 = vadd.f32 %v841_v4, %v2373_v50  ;;  %v1195_v10 = vadd.f32 %v1194_v5, %v2375_v51  ;;  %v843_v11 = vpop.f32.mrb[83].mxu0  ;;  %v1196_v12 = vpop.f32.mrb[83].mxu1 }
 0x189   : > { %v1470_v13 = vmax.f32 %v840_v2, 0.0  ;;  %v1472_v14 = vmax.f32 %v1193_v3, 0.0  ;;  %v844_v15 = vadd.f32 %v843_v11, %v2377_v52  ;;  %v1197_v6 = vadd.f32 %v1196_v12, %v2379_v53 }
 0x18a   : > { %v1605_v16 = vadd.f32 %v1604_v57, %v1469_v7  ;;  %v1743_v17 = vadd.f32 %v1742_v58, %v1471_v8  ;;  %v1473_v18 = vmax.f32 %v842_v9, 0.0  ;;  %v1475_v19 = vmax.f32 %v1195_v10, 0.0 }
 0x18b   : > { %v1674_v20 = vadd.f32 %v1673_v59, %v1470_v13  ;;  %v1812_v21 = vadd.f32 %v1811_v60, %v1472_v14  ;;  %v1474_v22 = vmax.f32 %v844_v15, 0.0  ;;  %v1476_v23 = vmax.f32 %v1197_v6, 0.0 }
 0x18c   : > { %v1606_v24 = vadd.f32 %v1605_v16, %v1473_v18  ;;  %v1744_v25 = vadd.f32 %v1743_v17, %v1475_v19 }
 0x18d   : > { %v1675_v26 = vadd.f32 %v1674_v20, %v1474_v22  ;;  %v1813_v27 = vadd.f32 %v1812_v21, %v1476_v23  ;;  %v847_v28 = vpop.f32.mrb[84].mxu0  ;;  %v1200_v29 = vpop.f32.mrb[84].mxu1 }
 0x18e   : > { %v848_v30 = vadd.f32 %v847_v28, %v2373_v50  ;;  %v1201_v31 = vadd.f32 %v1200_v29, %v2375_v51  ;;  %v849_v32 = vpop.f32.mrb[85].mxu0  ;;  %v1202_v33 = vpop.f32.mrb[85].mxu1 }
 0x18f   : > { %v850_v34 = vadd.f32 %v849_v32, %v2377_v52  ;;  %v1203_v35 = vadd.f32 %v1202_v33, %v2379_v53  ;;  %v851_v36 = vpop.f32.mrb[86].mxu0  ;;  %v1204_v37 = vpop.f32.mrb[86].mxu1 }
 0x190   : > { %v1477_v38 = vmax.f32 %v848_v30, 0.0  ;;  %v1479_v39 = vmax.f32 %v1201_v31, 0.0  ;;  %v852_v40 = vadd.f32 %v851_v36, %v2373_v50  ;;  %v1205_v41 = vadd.f32 %v1204_v37, %v2375_v51  ;;  %v853_v44 = vpop.f32.mrb[87].mxu0  ;;  %v1206_v45 = vpop.f32.mrb[87].mxu1 }
 0x191   : > { %v1478_v46 = vmax.f32 %v850_v34, 0.0  ;;  %v1480_v48 = vmax.f32 %v1203_v35, 0.0  ;;  %v854_v49 = vadd.f32 %v853_v44, %v2377_v52  ;;  %v1207_v54 = vadd.f32 %v1206_v45, %v2379_v53 }
 0x192   : > { %v1607_v55 = vadd.f32 %v1606_v24, %v1477_v38  ;;  %v1745_v56 = vadd.f32 %v1744_v25, %v1479_v39  ;;  %v1481_v57 = vmax.f32 %v852_v40, 0.0  ;;  %v1483_v58 = vmax.f32 %v1205_v41, 0.0 }
 0x193   : > { %v1676_v59 = vadd.f32 %v1675_v26, %v1478_v46  ;;  %v1814_v60 = vadd.f32 %v1813_v27, %v1480_v48  ;;  %v1482_v61 = vmax.f32 %v854_v49, 0.0  ;;  %v1484_v42 = vmax.f32 %v1207_v54, 0.0 }
 0x194   : > { %v1608_v62 = vadd.f32 %v1607_v55, %v1481_v57  ;;  %v1746_v63 = vadd.f32 %v1745_v56, %v1483_v58 }
 0x195   : > { %v1677_v0 = vadd.f32 %v1676_v59, %v1482_v61  ;;  %v1815_v1 = vadd.f32 %v1814_v60, %v1484_v42  ;;  %v857_v2 = vpop.f32.mrb[88].mxu0  ;;  %v1210_v3 = vpop.f32.mrb[88].mxu1 }
 0x196   : > { %v858_v4 = vadd.f32 %v857_v2, %v2373_v50  ;;  %v1211_v5 = vadd.f32 %v1210_v3, %v2375_v51  ;;  %v859_v7 = vpop.f32.mrb[89].mxu0  ;;  %v1212_v8 = vpop.f32.mrb[89].mxu1 }
 0x197   : > { %v860_v9 = vadd.f32 %v859_v7, %v2377_v52  ;;  %v1213_v10 = vadd.f32 %v1212_v8, %v2379_v53  ;;  %v861_v11 = vpop.f32.mrb[90].mxu0  ;;  %v1214_v12 = vpop.f32.mrb[90].mxu1 }
 0x198   : > { %v1485_v13 = vmax.f32 %v858_v4, 0.0  ;;  %v1487_v14 = vmax.f32 %v1211_v5, 0.0  ;;  %v862_v15 = vadd.f32 %v861_v11, %v2373_v50  ;;  %v1215_v6 = vadd.f32 %v1214_v12, %v2375_v51  ;;  %v863_v16 = vpop.f32.mrb[91].mxu0  ;;  %v1216_v17 = vpop.f32.mrb[91].mxu1 }
 0x199   : > { %v1486_v18 = vmax.f32 %v860_v9, 0.0  ;;  %v1488_v19 = vmax.f32 %v1213_v10, 0.0  ;;  %v864_v20 = vadd.f32 %v863_v16, %v2377_v52  ;;  %v1217_v21 = vadd.f32 %v1216_v17, %v2379_v53 }
 0x19a   : > { %v1609_v22 = vadd.f32 %v1608_v62, %v1485_v13  ;;  %v1747_v23 = vadd.f32 %v1746_v63, %v1487_v14  ;;  %v1489_v24 = vmax.f32 %v862_v15, 0.0  ;;  %v1491_v25 = vmax.f32 %v1215_v6, 0.0 }
 0x19b   : > { %v1678_v26 = vadd.f32 %v1677_v0, %v1486_v18  ;;  %v1816_v27 = vadd.f32 %v1815_v1, %v1488_v19  ;;  %v1490_v28 = vmax.f32 %v864_v20, 0.0  ;;  %v1492_v29 = vmax.f32 %v1217_v21, 0.0 }
 0x19c   : > { %v1610_v30 = vadd.f32 %v1609_v22, %v1489_v24  ;;  %v1748_v31 = vadd.f32 %v1747_v23, %v1491_v25 }
 0x19d   : > { %v1679_v32 = vadd.f32 %v1678_v26, %v1490_v28  ;;  %v1817_v33 = vadd.f32 %v1816_v27, %v1492_v29  ;;  %v867_v34 = vpop.f32.mrb[92].mxu0  ;;  %v1220_v35 = vpop.f32.mrb[92].mxu1 }
 0x19e   : > { %v868_v36 = vadd.f32 %v867_v34, %v2373_v50  ;;  %v1221_v37 = vadd.f32 %v1220_v35, %v2375_v51  ;;  %v869_v38 = vpop.f32.mrb[93].mxu0  ;;  %v1222_v39 = vpop.f32.mrb[93].mxu1 }
 0x19f   : > { %v870_v40 = vadd.f32 %v869_v38, %v2377_v52  ;;  %v1223_v41 = vadd.f32 %v1222_v39, %v2379_v53  ;;  %v871_v44 = vpop.f32.mrb[94].mxu0  ;;  %v1224_v45 = vpop.f32.mrb[94].mxu1 }
 0x1a0   : > { %v1493_v46 = vmax.f32 %v868_v36, 0.0  ;;  %v1495_v48 = vmax.f32 %v1221_v37, 0.0  ;;  %v872_v49 = vadd.f32 %v871_v44, %v2373_v50  ;;  %v1225_v54 = vadd.f32 %v1224_v45, %v2375_v51  ;;  %v873_v55 = vpop.f32.mrb[95].mxu0  ;;  %v1226_v56 = vpop.f32.mrb[95].mxu1 }
 0x1a1   : > { %v1494_v57 = vmax.f32 %v870_v40, 0.0  ;;  %v1496_v58 = vmax.f32 %v1223_v41, 0.0  ;;  %v874_v59 = vadd.f32 %v873_v55, %v2377_v52  ;;  %v1227_v60 = vadd.f32 %v1226_v56, %v2379_v53 }
 0x1a2   : > { %v1611_v61 = vadd.f32 %v1610_v30, %v1493_v46  ;;  %v1749_v42 = vadd.f32 %v1748_v31, %v1495_v48  ;;  %v1497_v62 = vmax.f32 %v872_v49, 0.0  ;;  %v1499_v63 = vmax.f32 %v1225_v54, 0.0 }
 0x1a3   : > { %v1680_v0 = vadd.f32 %v1679_v32, %v1494_v57  ;;  %v1818_v1 = vadd.f32 %v1817_v33, %v1496_v58  ;;  %v1498_v2 = vmax.f32 %v874_v59, 0.0  ;;  %v1500_v3 = vmax.f32 %v1227_v60, 0.0 }
 0x1a4   : > { %v1612_v4 = vadd.f32 %v1611_v61, %v1497_v62  ;;  %v1750_v5 = vadd.f32 %v1749_v42, %v1499_v63 }
 0x1a5   : > { %v1681_v7 = vadd.f32 %v1680_v0, %v1498_v2  ;;  %v1819_v8 = vadd.f32 %v1818_v1, %v1500_v3  ;;  %v877_v9 = vpop.f32.mrb[96].mxu0  ;;  %v1230_v10 = vpop.f32.mrb[96].mxu1 }
 0x1a6   : > { %v878_v11 = vadd.f32 %v877_v9, %v2373_v50  ;;  %v1231_v12 = vadd.f32 %v1230_v10, %v2375_v51  ;;  %v879_v13 = vpop.f32.mrb[97].mxu0  ;;  %v1232_v14 = vpop.f32.mrb[97].mxu1 }
 0x1a7   : > { %v880_v15 = vadd.f32 %v879_v13, %v2377_v52  ;;  %v1233_v6 = vadd.f32 %v1232_v14, %v2379_v53  ;;  %v881_v16 = vpop.f32.mrb[98].mxu0  ;;  %v1234_v17 = vpop.f32.mrb[98].mxu1 }
 0x1a8   : > { %v1501_v18 = vmax.f32 %v878_v11, 0.0  ;;  %v1503_v19 = vmax.f32 %v1231_v12, 0.0  ;;  %v882_v20 = vadd.f32 %v881_v16, %v2373_v50  ;;  %v1235_v21 = vadd.f32 %v1234_v17, %v2375_v51  ;;  %v883_v22 = vpop.f32.mrb[99].mxu0  ;;  %v1236_v23 = vpop.f32.mrb[99].mxu1 }
 0x1a9   : > { %v1502_v24 = vmax.f32 %v880_v15, 0.0  ;;  %v1504_v25 = vmax.f32 %v1233_v6, 0.0  ;;  %v884_v26 = vadd.f32 %v883_v22, %v2377_v52  ;;  %v1237_v27 = vadd.f32 %v1236_v23, %v2379_v53 }
 0x1aa   : > { %v1613_v28 = vadd.f32 %v1612_v4, %v1501_v18  ;;  %v1751_v29 = vadd.f32 %v1750_v5, %v1503_v19  ;;  %v1505_v30 = vmax.f32 %v882_v20, 0.0  ;;  %v1507_v31 = vmax.f32 %v1235_v21, 0.0 }
 0x1ab   : > { %v1682_v32 = vadd.f32 %v1681_v7, %v1502_v24  ;;  %v1820_v33 = vadd.f32 %v1819_v8, %v1504_v25  ;;  %v1506_v34 = vmax.f32 %v884_v26, 0.0  ;;  %v1508_v35 = vmax.f32 %v1237_v27, 0.0 }
 0x1ac   : > { %v1614_v36 = vadd.f32 %v1613_v28, %v1505_v30  ;;  %v1752_v37 = vadd.f32 %v1751_v29, %v1507_v31 }
 0x1ad   : > { %v1683_v38 = vadd.f32 %v1682_v32, %v1506_v34  ;;  %v1821_v39 = vadd.f32 %v1820_v33, %v1508_v35  ;;  %v887_v40 = vpop.f32.mrb[100].mxu0  ;;  %v1240_v41 = vpop.f32.mrb[100].mxu1 }
 0x1ae   : > { %v888_v44 = vadd.f32 %v887_v40, %v2373_v50  ;;  %v1241_v45 = vadd.f32 %v1240_v41, %v2375_v51  ;;  %v889_v46 = vpop.f32.mrb[101].mxu0  ;;  %v1242_v48 = vpop.f32.mrb[101].mxu1 }
 0x1af   : > { %v890_v49 = vadd.f32 %v889_v46, %v2377_v52  ;;  %v1243_v54 = vadd.f32 %v1242_v48, %v2379_v53  ;;  %v891_v55 = vpop.f32.mrb[102].mxu0  ;;  %v1244_v56 = vpop.f32.mrb[102].mxu1 }
 0x1b0   : > { %v1509_v57 = vmax.f32 %v888_v44, 0.0  ;;  %v1511_v58 = vmax.f32 %v1241_v45, 0.0  ;;  %v892_v59 = vadd.f32 %v891_v55, %v2373_v50  ;;  %v1245_v60 = vadd.f32 %v1244_v56, %v2375_v51  ;;  %v893_v61 = vpop.f32.mrb[103].mxu0  ;;  %v1246_v42 = vpop.f32.mrb[103].mxu1 }
 0x1b1   : > { %v1510_v62 = vmax.f32 %v890_v49, 0.0  ;;  %v1512_v63 = vmax.f32 %v1243_v54, 0.0  ;;  %v894_v0 = vadd.f32 %v893_v61, %v2377_v52  ;;  %v1247_v1 = vadd.f32 %v1246_v42, %v2379_v53 }
 0x1b2   : > { %v1615_v2 = vadd.f32 %v1614_v36, %v1509_v57  ;;  %v1753_v3 = vadd.f32 %v1752_v37, %v1511_v58  ;;  %v1513_v4 = vmax.f32 %v892_v59, 0.0  ;;  %v1515_v5 = vmax.f32 %v1245_v60, 0.0 }
 0x1b3   : > { %v1684_v7 = vadd.f32 %v1683_v38, %v1510_v62  ;;  %v1822_v8 = vadd.f32 %v1821_v39, %v1512_v63  ;;  %v1514_v9 = vmax.f32 %v894_v0, 0.0  ;;  %v1516_v10 = vmax.f32 %v1247_v1, 0.0 }
 0x1b4   : > { %v1616_v11 = vadd.f32 %v1615_v2, %v1513_v4  ;;  %v1754_v12 = vadd.f32 %v1753_v3, %v1515_v5 }
 0x1b5   : > { %v1685_v13 = vadd.f32 %v1684_v7, %v1514_v9  ;;  %v1823_v14 = vadd.f32 %v1822_v8, %v1516_v10  ;;  %v897_v15 = vpop.f32.mrb[104].mxu0  ;;  %v1250_v6 = vpop.f32.mrb[104].mxu1 }
 0x1b6   : > { %v898_v16 = vadd.f32 %v897_v15, %v2373_v50  ;;  %v1251_v17 = vadd.f32 %v1250_v6, %v2375_v51  ;;  %v899_v18 = vpop.f32.mrb[105].mxu0  ;;  %v1252_v19 = vpop.f32.mrb[105].mxu1 }
 0x1b7   : > { %v900_v20 = vadd.f32 %v899_v18, %v2377_v52  ;;  %v1253_v21 = vadd.f32 %v1252_v19, %v2379_v53  ;;  %v901_v22 = vpop.f32.mrb[106].mxu0  ;;  %v1254_v23 = vpop.f32.mrb[106].mxu1 }
 0x1b8   : > { %v1517_v24 = vmax.f32 %v898_v16, 0.0  ;;  %v1519_v25 = vmax.f32 %v1251_v17, 0.0  ;;  %v902_v26 = vadd.f32 %v901_v22, %v2373_v50  ;;  %v1255_v27 = vadd.f32 %v1254_v23, %v2375_v51  ;;  %v903_v28 = vpop.f32.mrb[107].mxu0  ;;  %v1256_v29 = vpop.f32.mrb[107].mxu1 }
 0x1b9   : > { %v1518_v30 = vmax.f32 %v900_v20, 0.0  ;;  %v1520_v31 = vmax.f32 %v1253_v21, 0.0  ;;  %v904_v32 = vadd.f32 %v903_v28, %v2377_v52  ;;  %v1257_v33 = vadd.f32 %v1256_v29, %v2379_v53 }
 0x1ba   : > { %v1617_v34 = vadd.f32 %v1616_v11, %v1517_v24  ;;  %v1755_v35 = vadd.f32 %v1754_v12, %v1519_v25  ;;  %v1521_v36 = vmax.f32 %v902_v26, 0.0  ;;  %v1523_v37 = vmax.f32 %v1255_v27, 0.0 }
 0x1bb   : > { %v1686_v38 = vadd.f32 %v1685_v13, %v1518_v30  ;;  %v1824_v39 = vadd.f32 %v1823_v14, %v1520_v31  ;;  %v1522_v40 = vmax.f32 %v904_v32, 0.0  ;;  %v1524_v41 = vmax.f32 %v1257_v33, 0.0 }
 0x1bc   : > { %v1618_v44 = vadd.f32 %v1617_v34, %v1521_v36  ;;  %v1756_v45 = vadd.f32 %v1755_v35, %v1523_v37 }
 0x1bd   : > { %v1687_v46 = vadd.f32 %v1686_v38, %v1522_v40  ;;  %v1825_v48 = vadd.f32 %v1824_v39, %v1524_v41  ;;  %v907_v49 = vpop.f32.mrb[108].mxu0  ;;  %v1260_v54 = vpop.f32.mrb[108].mxu1 }
 0x1be   : > { %v908_v55 = vadd.f32 %v907_v49, %v2373_v50  ;;  %v1261_v56 = vadd.f32 %v1260_v54, %v2375_v51  ;;  %v909_v57 = vpop.f32.mrb[109].mxu0  ;;  %v1262_v58 = vpop.f32.mrb[109].mxu1 }
 0x1bf   : > { %v910_v59 = vadd.f32 %v909_v57, %v2377_v52  ;;  %v1263_v60 = vadd.f32 %v1262_v58, %v2379_v53  ;;  %v911_v61 = vpop.f32.mrb[110].mxu0  ;;  %v1264_v42 = vpop.f32.mrb[110].mxu1 }
 0x1c0   : > { %v1525_v62 = vmax.f32 %v908_v55, 0.0  ;;  %v1527_v63 = vmax.f32 %v1261_v56, 0.0  ;;  %v912_v0 = vadd.f32 %v911_v61, %v2373_v50  ;;  %v1265_v1 = vadd.f32 %v1264_v42, %v2375_v51  ;;  %v913_v2 = vpop.f32.mrb[111].mxu0  ;;  %v1266_v3 = vpop.f32.mrb[111].mxu1 }
 0x1c1   : > { %v1526_v4 = vmax.f32 %v910_v59, 0.0  ;;  %v1528_v5 = vmax.f32 %v1263_v60, 0.0  ;;  %v914_v7 = vadd.f32 %v913_v2, %v2377_v52  ;;  %v1267_v8 = vadd.f32 %v1266_v3, %v2379_v53 }
 0x1c2   : > { %v1619_v9 = vadd.f32 %v1618_v44, %v1525_v62  ;;  %v1757_v10 = vadd.f32 %v1756_v45, %v1527_v63  ;;  %v1529_v11 = vmax.f32 %v912_v0, 0.0  ;;  %v1531_v12 = vmax.f32 %v1265_v1, 0.0 }
 0x1c3   : > { %v1688_v13 = vadd.f32 %v1687_v46, %v1526_v4  ;;  %v1826_v14 = vadd.f32 %v1825_v48, %v1528_v5  ;;  %v1530_v15 = vmax.f32 %v914_v7, 0.0  ;;  %v1532_v6 = vmax.f32 %v1267_v8, 0.0 }
 0x1c4   : > { %v1620_v16 = vadd.f32 %v1619_v9, %v1529_v11  ;;  %v1758_v17 = vadd.f32 %v1757_v10, %v1531_v12 }
 0x1c5   : > { %v1689_v18 = vadd.f32 %v1688_v13, %v1530_v15  ;;  %v1827_v19 = vadd.f32 %v1826_v14, %v1532_v6  ;;  %v917_v20 = vpop.f32.mrb[112].mxu0  ;;  %v1270_v21 = vpop.f32.mrb[112].mxu1 }
 0x1c6   : > { %v918_v22 = vadd.f32 %v917_v20, %v2373_v50  ;;  %v1271_v23 = vadd.f32 %v1270_v21, %v2375_v51  ;;  %v919_v24 = vpop.f32.mrb[113].mxu0  ;;  %v1272_v25 = vpop.f32.mrb[113].mxu1 }
 0x1c7   : > { %v920_v26 = vadd.f32 %v919_v24, %v2377_v52  ;;  %v1273_v27 = vadd.f32 %v1272_v25, %v2379_v53  ;;  %v921_v28 = vpop.f32.mrb[114].mxu0  ;;  %v1274_v29 = vpop.f32.mrb[114].mxu1 }
 0x1c8   : > { %v1533_v30 = vmax.f32 %v918_v22, 0.0  ;;  %v1535_v31 = vmax.f32 %v1271_v23, 0.0  ;;  %v922_v32 = vadd.f32 %v921_v28, %v2373_v50  ;;  %v1275_v33 = vadd.f32 %v1274_v29, %v2375_v51  ;;  %v923_v34 = vpop.f32.mrb[115].mxu0  ;;  %v1276_v35 = vpop.f32.mrb[115].mxu1 }
 0x1c9   : > { %v1534_v36 = vmax.f32 %v920_v26, 0.0  ;;  %v1536_v37 = vmax.f32 %v1273_v27, 0.0  ;;  %v924_v38 = vadd.f32 %v923_v34, %v2377_v52  ;;  %v1277_v39 = vadd.f32 %v1276_v35, %v2379_v53 }
 0x1ca   : > { %v1621_v40 = vadd.f32 %v1620_v16, %v1533_v30  ;;  %v1759_v41 = vadd.f32 %v1758_v17, %v1535_v31  ;;  %v1537_v44 = vmax.f32 %v922_v32, 0.0  ;;  %v1539_v45 = vmax.f32 %v1275_v33, 0.0 }
 0x1cb   : > { %v1690_v46 = vadd.f32 %v1689_v18, %v1534_v36  ;;  %v1828_v48 = vadd.f32 %v1827_v19, %v1536_v37  ;;  %v1538_v49 = vmax.f32 %v924_v38, 0.0  ;;  %v1540_v54 = vmax.f32 %v1277_v39, 0.0 }
 0x1cc   : > { %v1622_v55 = vadd.f32 %v1621_v40, %v1537_v44  ;;  %v1760_v56 = vadd.f32 %v1759_v41, %v1539_v45 }
 0x1cd   : > { %v1691_v57 = vadd.f32 %v1690_v46, %v1538_v49  ;;  %v1829_v58 = vadd.f32 %v1828_v48, %v1540_v54  ;;  %v927_v59 = vpop.f32.mrb[116].mxu0  ;;  %v1280_v60 = vpop.f32.mrb[116].mxu1 }
 0x1ce   : > { %v928_v61 = vadd.f32 %v927_v59, %v2373_v50  ;;  %v1281_v42 = vadd.f32 %v1280_v60, %v2375_v51  ;;  %v929_v62 = vpop.f32.mrb[117].mxu0  ;;  %v1282_v63 = vpop.f32.mrb[117].mxu1 }
 0x1cf   : > { %v930_v0 = vadd.f32 %v929_v62, %v2377_v52  ;;  %v1283_v1 = vadd.f32 %v1282_v63, %v2379_v53  ;;  %v931_v2 = vpop.f32.mrb[118].mxu0  ;;  %v1284_v3 = vpop.f32.mrb[118].mxu1 }
 0x1d0   : > { %v1541_v4 = vmax.f32 %v928_v61, 0.0  ;;  %v1543_v5 = vmax.f32 %v1281_v42, 0.0  ;;  %v932_v7 = vadd.f32 %v931_v2, %v2373_v50  ;;  %v1285_v8 = vadd.f32 %v1284_v3, %v2375_v51  ;;  %v933_v9 = vpop.f32.mrb[119].mxu0  ;;  %v1286_v10 = vpop.f32.mrb[119].mxu1 }
 0x1d1   : > { %v1542_v11 = vmax.f32 %v930_v0, 0.0  ;;  %v1544_v12 = vmax.f32 %v1283_v1, 0.0  ;;  %v934_v13 = vadd.f32 %v933_v9, %v2377_v52  ;;  %v1287_v14 = vadd.f32 %v1286_v10, %v2379_v53 }
 0x1d2   : > { %v1623_v15 = vadd.f32 %v1622_v55, %v1541_v4  ;;  %v1761_v6 = vadd.f32 %v1760_v56, %v1543_v5  ;;  %v1545_v16 = vmax.f32 %v932_v7, 0.0  ;;  %v1547_v17 = vmax.f32 %v1285_v8, 0.0 }
 0x1d3   : > { %v1692_v18 = vadd.f32 %v1691_v57, %v1542_v11  ;;  %v1830_v19 = vadd.f32 %v1829_v58, %v1544_v12  ;;  %v1546_v20 = vmax.f32 %v934_v13, 0.0  ;;  %v1548_v21 = vmax.f32 %v1287_v14, 0.0 }
 0x1d4   : > { %v1624_v22 = vadd.f32 %v1623_v15, %v1545_v16  ;;  %v1762_v23 = vadd.f32 %v1761_v6, %v1547_v17 }
 0x1d5   : > { %v1693_v24 = vadd.f32 %v1692_v18, %v1546_v20  ;;  %v1831_v25 = vadd.f32 %v1830_v19, %v1548_v21  ;;  %v937_v26 = vpop.f32.mrb[120].mxu0  ;;  %v1290_v27 = vpop.f32.mrb[120].mxu1 }
 0x1d6   : > { %v938_v28 = vadd.f32 %v937_v26, %v2373_v50  ;;  %v1291_v29 = vadd.f32 %v1290_v27, %v2375_v51  ;;  %v939_v30 = vpop.f32.mrb[121].mxu0  ;;  %v1292_v31 = vpop.f32.mrb[121].mxu1 }
 0x1d7   : > { %v940_v32 = vadd.f32 %v939_v30, %v2377_v52  ;;  %v1293_v33 = vadd.f32 %v1292_v31, %v2379_v53  ;;  %v941_v34 = vpop.f32.mrb[122].mxu0  ;;  %v1294_v35 = vpop.f32.mrb[122].mxu1 }
 0x1d8   : > { %v1549_v36 = vmax.f32 %v938_v28, 0.0  ;;  %v1551_v37 = vmax.f32 %v1291_v29, 0.0  ;;  %v942_v38 = vadd.f32 %v941_v34, %v2373_v50  ;;  %v1295_v39 = vadd.f32 %v1294_v35, %v2375_v51  ;;  %v943_v40 = vpop.f32.mrb[123].mxu0  ;;  %v1296_v41 = vpop.f32.mrb[123].mxu1 }
 0x1d9   : > { %v1550_v44 = vmax.f32 %v940_v32, 0.0  ;;  %v1552_v45 = vmax.f32 %v1293_v33, 0.0  ;;  %v944_v46 = vadd.f32 %v943_v40, %v2377_v52  ;;  %v1297_v48 = vadd.f32 %v1296_v41, %v2379_v53 }
 0x1da   : > { %v1625_v49 = vadd.f32 %v1624_v22, %v1549_v36  ;;  %v1763_v54 = vadd.f32 %v1762_v23, %v1551_v37  ;;  %v1553_v55 = vmax.f32 %v942_v38, 0.0  ;;  %v1555_v56 = vmax.f32 %v1295_v39, 0.0 }
 0x1db   : > { %v1694_v57 = vadd.f32 %v1693_v24, %v1550_v44  ;;  %v1832_v58 = vadd.f32 %v1831_v25, %v1552_v45  ;;  %v1554_v59 = vmax.f32 %v944_v46, 0.0  ;;  %v1556_v60 = vmax.f32 %v1297_v48, 0.0 }
 0x1dc   : > { %v1626_v61 = vadd.f32 %v1625_v49, %v1553_v55  ;;  %v1764_v42 = vadd.f32 %v1763_v54, %v1555_v56 }
 0x1dd   : > { %v1695_v62 = vadd.f32 %v1694_v57, %v1554_v59  ;;  %v1833_v63 = vadd.f32 %v1832_v58, %v1556_v60  ;;  %v947_v0 = vpop.f32.mrb[124].mxu0  ;;  %v1300_v1 = vpop.f32.mrb[124].mxu1 }
 0x1de   : > { %v948_v2 = vadd.f32 %v947_v0, %v2373_v50  ;;  %v1301_v3 = vadd.f32 %v1300_v1, %v2375_v51  ;;  %v949_v4 = vpop.f32.mrb[125].mxu0  ;;  %v1302_v5 = vpop.f32.mrb[125].mxu1 }
 0x1df   : > { %v950_v7 = vadd.f32 %v949_v4, %v2377_v52  ;;  %v1303_v8 = vadd.f32 %v1302_v5, %v2379_v53  ;;  %v951_v9 = vpop.f32.mrb[126].mxu0  ;;  %v1304_v10 = vpop.f32.mrb[126].mxu1 }
 0x1e0   : > { %v1557_v11 = vmax.f32 %v948_v2, 0.0  ;;  %v1559_v12 = vmax.f32 %v1301_v3, 0.0  ;;  %v952_v13 = vadd.f32 %v951_v9, %v2373_v50  ;;  %v1305_v14 = vadd.f32 %v1304_v10, %v2375_v51  ;;  %v953_v15 = vpop.f32.mrb[127].mxu0  ;;  %v1306_v6 = vpop.f32.mrb[127].mxu1  ;;  %v1565_v3 = vld [vmem:[#allocation2] sm:$0xf] }
 0x1e1   : > { %v1558_v16 = vmax.f32 %v950_v7, 0.0  ;;  %v1560_v17 = vmax.f32 %v1303_v8, 0.0  ;;  %v954_v18 = vadd.f32 %v953_v15, %v2377_v52  ;;  %v1307_v19 = vadd.f32 %v1306_v6, %v2379_v53 }
 0x1e2   : > { %v1627_v20 = vadd.f32 %v1626_v61, %v1557_v11  ;;  %v1765_v21 = vadd.f32 %v1764_v42, %v1559_v12  ;;  %v1561_v22 = vmax.f32 %v952_v13, 0.0  ;;  %v1563_v23 = vmax.f32 %v1305_v14, 0.0 }
 0x1e3   : > { %v1696_v24 = vadd.f32 %v1695_v62, %v1558_v16  ;;  %v1834_v25 = vadd.f32 %v1833_v63, %v1560_v17  ;;  %v1562_v26 = vmax.f32 %v954_v18, 0.0  ;;  %v1564_v27 = vmax.f32 %v1307_v19, 0.0 }
 0x1e4   : > { %v1628_v28 = vadd.f32 %v1627_v20, %v1561_v22  ;;  %v1766_v50 = vadd.f32 %v1765_v21, %v1563_v23  ;;  %v2157_v53 = vmov 1966171168  }
 0x1e5   : > { %v1697_v29 = vadd.f32 %v1696_v24, %v1562_v26  ;;  %v1835_v51 = vadd.f32 %v1834_v25, %v1564_v27  ;;  %v1849_v36 = vunpack.c.l.s4 %v2157_v53 }
 0x1e6   : > { %v1629_v30 = vrot.slane %v1628_v28, 4  ;;  %v1767_v31 = vrot.slane %v1766_v50, 4 }
 0x1e7   : > { %v1698_v32 = vrot.slane %v1697_v29, 4  ;;  %v1836_v33 = vrot.slane %v1835_v51, 4  ;;  %v1850_v48 = vunpack.c.0.s8 %v1849_v36 }
 0x1e8   : > { %v1630_v34 = vadd.f32 %v1629_v30, %v1628_v28  ;;  %v1768_v52 = vadd.f32 %v1767_v31, %v1766_v50 }
 0x1e9   : > { %v1699_v35 = vadd.f32 %v1698_v32, %v1697_v29  ;;  %v1837_v37 = vadd.f32 %v1836_v33, %v1835_v51  ;;  %v1853_v61 = vsub.s32 %v1850_v48, %v2359_v43 }
 0x1ea   : > { %v1631_v38 = vrot.slane %v1630_v34, 2  ;;  %v1769_v39 = vrot.slane %v1768_v52, 2 }
 0x1eb   : > { %v1700_v40 = vrot.slane %v1699_v35, 2  ;;  %v1838_v41 = vrot.slane %v1837_v37, 2 }
 0x1ec   : > { %v1632_v44 = vadd.f32 %v1631_v38, %v1630_v34  ;;  %v1770_v45 = vadd.f32 %v1769_v39, %v1768_v52 }
 0x1ed   : > { %v1701_v46 = vadd.f32 %v1700_v40, %v1699_v35  ;;  %v1839_v49 = vadd.f32 %v1838_v41, %v1837_v37 }
 0x1ee   : > { %v1633_v54 = vrot.slane %v1632_v44, 1  ;;  %v1771_v55 = vrot.slane %v1770_v45, 1 }
 0x1ef   : > { %v1702_v56 = vrot.slane %v1701_v46, 1  ;;  %v1840_v57 = vrot.slane %v1839_v49, 1 }
 0x1f0   : > { %v1634_v58 = vadd.f32 %v1633_v54, %v1632_v44  ;;  %v1772_v59 = vadd.f32 %v1771_v55, %v1770_v45 }
 0x1f1   : > { %v1703_v60 = vadd.f32 %v1702_v56, %v1701_v46  ;;  %v1841_v42 = vadd.f32 %v1840_v57, %v1839_v49 }
 0x1f3   : > { %v1846_v62 = vcombine.low %v1634_v58, %v1703_v60  ;;  %v1847_v63 = vcombine.low %v1772_v59, %v1841_v42 }
 0x1f5   : > { %v1854_v0 = vrot.slane %v1846_v62, %v1853_v61  ;;  %v1861_v1 = vrot.slane %v1847_v63, %v1853_v61 }
 0x1f7   : > { %v1862_v2 = vcombine.low %v1854_v0, %v1861_v1 }
 0x1f9   : > { %v1869_v4 = vrot.slane %v1862_v2, %v1853_v61 }
 0x1fb   : > { %v1871_v5 = vadd.f32 %v1869_v4, %v1565_v3 }
 0x1fd   : > { %1876 = vst.msk [vmem:[#allocation2] sm:$0xf] %vm2551_vm3, %v1871_v5 }
 0x204   : > { %v1880_v43 = vld [vmem:[#allocation2] sm:$0xf] }
 0x205   : > { %v1881_v7 = vmul.f32 0.001953125, %v1880_v43 }
 0x207   : > { %1882 = vst.msk [vmem:[%s189_s19] sm:$0xf] %vm2551_vm3, %v1881_v7 }
 0x208 PF: > { %s13_s14 = sadd.s32 1, %s2152_s14   ;;  %s2694_s12 = smov %s2148_s13 }
 0x209   : > { %p10_p6 = scmp.ge.s32.totalorder %s13_s14, 4   ;;  %s2695_s13 = smov %s2697_s15 }
 0x20b   :  { %12 = sbr.rel (!%p10_p6) target bundleno = 2 (0x2), region = 70 }

// kernel: forward.7
= control target key start
LH: loop header
LB: loop body
LE: loop exit
PB: predicated region body
PF: predicated region fallthrough
CT: control target
= control target key end

     0   :  { %v5313_v36 = vmov 1966171168   ;;  %v458_v38 = vlaneseq  ;;  %s6991_s0 = inlined_call_operand.vmem [shape: bf16[2,1664], index: 0, kind: input, shape index: {}]   ;;  %s6992_s1 = inlined_call_operand.vmem [shape: bf16[1664,512], index: 1, kind: input, shape index: {}]   ;;  %s6993_s2 = inlined_call_operand.vmem [shape: f32[1,512], index: 2, kind: input, shape index: {}]   ;;  %s6994_s3 = inlined_call_operand.vmem [shape: bf16[512,256], index: 3, kind: input, shape index: {}]   ;;  %s6995_s4 = inlined_call_operand.vmem [shape: f32[1,256], index: 4, kind: input, shape index: {}]   ;;  %s6996_s5 = inlined_call_operand.vmem [shape: bf16[256,2], index: 5, kind: input, shape index: {}]   ;;  %s6997_s6 = inlined_call_operand.vmem [shape: f32[1,2], index: 6, kind: input, shape index: {}]   ;;  %s6998_s7 = inlined_call_operand.hbm [shape: f32[2,2], index: 7, kind: output, shape index: {}]  }
   0x1   :  { %v4549_v0 = vld [vmem:[%s6992_s1 + $0x4] ss:$16 sps:$4 sm:$0xff]   ;;  %v4553_v2 = vld [vmem:[%s6992_s1] ss:$16 sps:$4 sm:$0xff]   ;;  %v456_v37 = vunpack.c.l.s4 %v5313_v36  ;;  %v4672_v36 = vld [vmem:[%s6992_s1 + $0x88] ss:$16 sps:$4 sm:$0xff]  }
   0x2   :  { %v4551_v1 = vld [vmem:[%s6992_s1 + $0x204] ss:$16 sps:$4 sm:$0xff]   ;;  %2635 = vmatprep.subr.bf16.mxu1 %v4549_v0  ;;  %v4554_v3 = vld [vmem:[%s6992_s1 + $0x200] ss:$16 sps:$4 sm:$0xff]   ;;  %v5474_v43 = vshrl.u32 %v458_v38, 7 }
   0x3   :  { %2676 = vmatprep.subr.bf16.mxu0 %v4551_v1  ;;  %v4555_v4 = vld [vmem:[%s6992_s1 + $0x24] ss:$16 sps:$4 sm:$0xff]   ;;  %2636 = vmatpush1.bf16.msra.mxu1 %v4553_v2  ;;  %v4559_v6 = vld [vmem:[%s6992_s1 + $0x20] ss:$16 sps:$4 sm:$0xff]   ;;  %v457_v42 = vunpack.c.0.s8 %v456_v37  ;;  %v4680_v38 = vld [vmem:[%s6992_s1 + $0xac] ss:$16 sps:$4 sm:$0xff]  }
   0x4   :  { %2677 = vmatpush1.bf16.msra.mxu0 %v4554_v3  ;;  %v4557_v5 = vld [vmem:[%s6992_s1 + $0x224] ss:$16 sps:$4 sm:$0xff]   ;;  %2637 = vmatprep.subr.bf16.mxu1 %v4555_v4  ;;  %v4560_v7 = vld [vmem:[%s6992_s1 + $0x220] ss:$16 sps:$4 sm:$0xff]  }
   0x5   :  { %2678 = vmatprep.subr.bf16.mxu0 %v4557_v5  ;;  %v4561_v8 = vld [vmem:[%s6992_s1 + $0x44] ss:$16 sps:$4 sm:$0xff]   ;;  %v4565_v10 = vld [vmem:[%s6992_s1 + $0x40] ss:$16 sps:$4 sm:$0xff]   ;;  %v5492_v49 = vsub.s32 %v457_v42, %v5474_v43  ;;  %v4686_v42 = vld [vmem:[%s6992_s1 + $0xcc] ss:$16 sps:$4 sm:$0xff]  }
   0x6   :  { %v4563_v9 = vld [vmem:[%s6992_s1 + $0x244] ss:$16 sps:$4 sm:$0xff]   ;;  %v4566_v11 = vld [vmem:[%s6992_s1 + $0x240] ss:$16 sps:$4 sm:$0xff]  }
   0x7   :  { %2638 = vmatpush1.bf16.msra.mxu1 %v4559_v6  ;;  %v4567_v12 = vld [vmem:[%s6992_s1 + $0x64] ss:$16 sps:$4 sm:$0xff]   ;;  %v4571_v14 = vld [vmem:[%s6992_s1 + $0x60] ss:$16 sps:$4 sm:$0xff]  }
   0x8   :  { %2679 = vmatpush1.bf16.msra.mxu0 %v4560_v7  ;;  %2639 = vmatprep.subr.bf16.mxu1 %v4561_v8  ;;  %v4569_v13 = vld [vmem:[%s6992_s1 + $0x264] ss:$16 sps:$4 sm:$0xff]   ;;  %v4572_v15 = vld [vmem:[%s6992_s1 + $0x260] ss:$16 sps:$4 sm:$0xff]  }
   0x9   :  { %2680 = vmatprep.subr.bf16.mxu0 %v4563_v9  ;;  %v4573_v16 = vld [vmem:[%s6992_s1 + $0x84] ss:$16 sps:$4 sm:$0xff]   ;;  %v4577_v18 = vld [vmem:[%s6992_s1 + $0x80] ss:$16 sps:$4 sm:$0xff]  }
   0xa   :  { %v4575_v17 = vld [vmem:[%s6992_s1 + $0x284] ss:$16 sps:$4 sm:$0xff]   ;;  %v4578_v19 = vld [vmem:[%s6992_s1 + $0x280] ss:$16 sps:$4 sm:$0xff]  }
   0xb   :  { %2640 = vmatpush1.bf16.msra.mxu1 %v4565_v10  ;;  %v4579_v20 = vld [vmem:[%s6992_s1 + $0xa4] ss:$16 sps:$4 sm:$0xff]   ;;  %v4583_v22 = vld [vmem:[%s6992_s1 + $0xa0] ss:$16 sps:$4 sm:$0xff]  }
   0xc   :  { %2681 = vmatpush1.bf16.msra.mxu0 %v4566_v11  ;;  %2641 = vmatprep.subr.bf16.mxu1 %v4567_v12  ;;  %v4581_v21 = vld [vmem:[%s6992_s1 + $0x2a4] ss:$16 sps:$4 sm:$0xff]   ;;  %v4584_v23 = vld [vmem:[%s6992_s1 + $0x2a0] ss:$16 sps:$4 sm:$0xff]  }
   0xd   :  { %2682 = vmatprep.subr.bf16.mxu0 %v4569_v13  ;;  %v4585_v24 = vld [vmem:[%s6992_s1 + $0xc4] ss:$16 sps:$4 sm:$0xff]   ;;  %v4589_v26 = vld [vmem:[%s6992_s1 + $0xc0] ss:$16 sps:$4 sm:$0xff]  }
   0xe   :  { %v4587_v25 = vld [vmem:[%s6992_s1 + $0x2c4] ss:$16 sps:$4 sm:$0xff]   ;;  %v4590_v27 = vld [vmem:[%s6992_s1 + $0x2c0] ss:$16 sps:$4 sm:$0xff]  }
   0xf   :  { %2642 = vmatpush1.bf16.msra.mxu1 %v4571_v14  ;;  %v4591_v28 = vld [vmem:[%s6992_s1 + $0xe4] ss:$16 sps:$4 sm:$0xff]   ;;  %v4595_v30 = vld [vmem:[%s6992_s1 + $0xe0] ss:$16 sps:$4 sm:$0xff]  }
  0x10   :  { %2683 = vmatpush1.bf16.msra.mxu0 %v4572_v15  ;;  %2643 = vmatprep.subr.bf16.mxu1 %v4573_v16  ;;  %v4593_v29 = vld [vmem:[%s6992_s1 + $0x2e4] ss:$16 sps:$4 sm:$0xff]   ;;  %v4596_v31 = vld [vmem:[%s6992_s1 + $0x2e0] ss:$16 sps:$4 sm:$0xff]   ;;  %v4650_v15 = vld [vmem:[%s6992_s1 + $0xc] ss:$16 sps:$4 sm:$0xff]  }
  0x11   :  { %2684 = vmatprep.subr.bf16.mxu0 %v4575_v17  ;;  %v4597_v32 = vld [vmem:[%s6992_s1 + $0x104] ss:$16 sps:$4 sm:$0xff]   ;;  %v4601_v34 = vld [vmem:[%s6992_s1 + $0x100] ss:$16 sps:$4 sm:$0xff]  }
  0x12   :  { %v4599_v33 = vld [vmem:[%s6992_s1 + $0x304] ss:$16 sps:$4 sm:$0xff]   ;;  %v4602_v35 = vld [vmem:[%s6992_s1 + $0x300] ss:$16 sps:$4 sm:$0xff]  }
  0x13   :  { %2644 = vmatpush1.bf16.msra.mxu1 %v4577_v18  ;;  %v4603_v39 = vld [vmem:[%s6992_s1 + $0x124] ss:$16 sps:$4 sm:$0xff]   ;;  %v4607_v41 = vld [vmem:[%s6992_s1 + $0x120] ss:$16 sps:$4 sm:$0xff]  }
  0x14   :  { %2685 = vmatpush1.bf16.msra.mxu0 %v4578_v19  ;;  %2645 = vmatprep.subr.bf16.mxu1 %v4579_v20  ;;  %v4605_v40 = vld [vmem:[%s6992_s1 + $0x324] ss:$16 sps:$4 sm:$0xff]   ;;  %v4608_v44 = vld [vmem:[%s6992_s1 + $0x320] ss:$16 sps:$4 sm:$0xff]   ;;  %v4648_v19 = vld [vmem:[%s6992_s1 + $0x8] ss:$16 sps:$4 sm:$0xff]  }
  0x15   :  { %2686 = vmatprep.subr.bf16.mxu0 %v4581_v21  ;;  %v4609_v45 = vld [vmem:[%s6992_s1 + $0x144] ss:$16 sps:$4 sm:$0xff]   ;;  %v4613_v47 = vld [vmem:[%s6992_s1 + $0x140] ss:$16 sps:$4 sm:$0xff]   ;;  %v4656_v21 = vld [vmem:[%s6992_s1 + $0x2c] ss:$16 sps:$4 sm:$0xff]  }
  0x16   :  { %v4611_v46 = vld [vmem:[%s6992_s1 + $0x344] ss:$16 sps:$4 sm:$0xff]   ;;  %v4614_v48 = vld [vmem:[%s6992_s1 + $0x340] ss:$16 sps:$4 sm:$0xff]  }
  0x17   :  { %2646 = vmatpush1.bf16.msra.mxu1 %v4583_v22  ;;  %v4615_v50 = vld [vmem:[%s6992_s1 + $0x164] ss:$16 sps:$4 sm:$0xff]   ;;  %v4619_v53 = vld [vmem:[%s6992_s1 + $0x160] ss:$16 sps:$4 sm:$0xff]  }
  0x18   :  { %2687 = vmatpush1.bf16.msra.mxu0 %v4584_v23  ;;  %2647 = vmatprep.subr.bf16.mxu1 %v4585_v24  ;;  %v4617_v51 = vld [vmem:[%s6992_s1 + $0x364] ss:$16 sps:$4 sm:$0xff]   ;;  %v4620_v55 = vld [vmem:[%s6992_s1 + $0x360] ss:$16 sps:$4 sm:$0xff]   ;;  %v4654_v24 = vld [vmem:[%s6992_s1 + $0x28] ss:$16 sps:$4 sm:$0xff]  }
  0x19   :  { %2688 = vmatprep.subr.bf16.mxu0 %v4587_v25  ;;  %v34_v52 = vld [vmem:[%s6991_s0] sm:$0xff] }
  0x1a   :  { %v461_v54 = vrot.slane %v34_v52, %v5492_v49  ;;  %v4621_v56 = vld [vmem:[%s6992_s1 + $0x184] ss:$16 sps:$4 sm:$0xff]   ;;  %v4625_v59 = vld [vmem:[%s6992_s1 + $0x180] ss:$16 sps:$4 sm:$0xff]   ;;  %v454_v5 = vcombine.high %v34_v52, %v34_v52  ;;  %v4698_v52 = vld [vmem:[%s6992_s1 + $0x10c] ss:$16 sps:$4 sm:$0xff]  }
  0x1b   :  { %2648 = vmatpush1.bf16.msra.mxu1 %v4589_v26  ;;  %v4623_v57 = vld [vmem:[%s6992_s1 + $0x384] ss:$16 sps:$4 sm:$0xff]   ;;  %v4626_v61 = vld [vmem:[%s6992_s1 + $0x380] ss:$16 sps:$4 sm:$0xff]   ;;  %v4662_v26 = vld [vmem:[%s6992_s1 + $0x4c] ss:$16 sps:$4 sm:$0xff]  }
  0x1c   :  { %2689 = vmatpush1.bf16.msra.mxu0 %v4590_v27  ;;  %2649 = vmatprep.subr.bf16.mxu1 %v4591_v28  ;;  %v469_v58 = vcombine.high %v461_v54, %v461_v54  ;;  %v4627_v62 = vld [vmem:[%s6992_s1 + $0x1a4] ss:$16 sps:$4 sm:$0xff]   ;;  %v4631_v1 = vld [vmem:[%s6992_s1 + $0x1a0] ss:$16 sps:$4 sm:$0xff]   ;;  %v5557_v10 = vrot.slane %v454_v5, %v5492_v49  ;;  %v5563_v12 = vrot.slane %v461_v54, %v5492_v49  ;;  %v4660_v28 = vld [vmem:[%s6992_s1 + $0x48] ss:$16 sps:$4 sm:$0xff]  }
  0x1d   :  { %2690 = vmatprep.subr.bf16.mxu0 %v4593_v29  ;;  %v4629_v63 = vld [vmem:[%s6992_s1 + $0x3a4] ss:$16 sps:$4 sm:$0xff]   ;;  %v4632_v2 = vld [vmem:[%s6992_s1 + $0x3a0] ss:$16 sps:$4 sm:$0xff]   ;;  %v4696_v54 = vld [vmem:[%s6992_s1 + $0x108] ss:$16 sps:$4 sm:$0xff]  }
  0x1e   :  { %v491_v60 = vrot.slane %v469_v58, %v5492_v49  ;;  %v4633_v3 = vld [vmem:[%s6992_s1 + $0x1c4] ss:$16 sps:$4 sm:$0xff]   ;;  %v4637_v6 = vld [vmem:[%s6992_s1 + $0x1c0] ss:$16 sps:$4 sm:$0xff]   ;;  %v470_v16 = vcombine.high %v5557_v10, %v5557_v10  ;;  %v5581_v18 = vcombine.high %v5563_v12, %v5563_v12  ;;  %v4702_v58 = vld [vmem:[%s6992_s1 + $0x128] ss:$16 sps:$4 sm:$0xff]  }
  0x1f   :  { %2650 = vmatpush1.bf16.msra.mxu1 %v4595_v30  ;;  %v4635_v4 = vld [vmem:[%s6992_s1 + $0x3c4] ss:$16 sps:$4 sm:$0xff]   ;;  %v4638_v7 = vld [vmem:[%s6992_s1 + $0x3c0] ss:$16 sps:$4 sm:$0xff]   ;;  %v4668_v30 = vld [vmem:[%s6992_s1 + $0x6c] ss:$16 sps:$4 sm:$0xff]  }
  0x20   :  { %2691 = vmatpush1.bf16.msra.mxu0 %v4596_v31  ;;  %2651 = vmatprep.subr.bf16.mxu1 %v4597_v32  ;;  %v5529_v0 = vcombine.high %v491_v60, %v491_v60  ;;  %v4639_v8 = vld [vmem:[%s6992_s1 + $0x1e4] ss:$16 sps:$4 sm:$0xff]   ;;  %v4643_v11 = vld [vmem:[%s6992_s1 + $0x1e0] ss:$16 sps:$4 sm:$0xff]   ;;  %v5593_v22 = vrot.slane %v470_v16, %v5492_v49  ;;  %v4666_v32 = vld [vmem:[%s6992_s1 + $0x68] ss:$16 sps:$4 sm:$0xff]  }
  0x21   :  { %2692 = vmatprep.subr.bf16.mxu0 %v4599_v33  ;;  %2667 = vmatprep.mubr.bf16.mxu1 %v491_v60  ;;  %v4641_v9 = vld [vmem:[%s6992_s1 + $0x3e4] ss:$16 sps:$4 sm:$0xff]   ;;  %v4644_v13 = vld [vmem:[%s6992_s1 + $0x3e0] ss:$16 sps:$4 sm:$0xff]   ;;  %v4722_v5 = vld [vmem:[%s6992_s1 + $0x18c] ss:$16 sps:$4 sm:$0xff]  }
  0x22   :  { %2708 = vmatprep.mubr.bf16.mxu0 %v5529_v0  ;;  %v4647_v14 = vld [vmem:[%s6992_s1 + $0x404] ss:$16 sps:$4 sm:$0xff]   ;;  %v4645_v17 = vld [vmem:[%s6992_s1 + $0x400] ss:$16 sps:$4 sm:$0xff]  }
  0x23   :  { %2652 = vmatpush1.bf16.msra.mxu1 %v4601_v34  ;;  %v4653_v20 = vld [vmem:[%s6992_s1 + $0x424] ss:$16 sps:$4 sm:$0xff]   ;;  %v4651_v23 = vld [vmem:[%s6992_s1 + $0x420] ss:$16 sps:$4 sm:$0xff]   ;;  %v4674_v34 = vld [vmem:[%s6992_s1 + $0x8c] ss:$16 sps:$4 sm:$0xff]  }
  0x24   :  { %2693 = vmatpush1.bf16.msra.mxu0 %v4602_v35  ;;  %2653 = vmatprep.subr.bf16.mxu1 %v4603_v39  ;;  %v4659_v25 = vld [vmem:[%s6992_s1 + $0x444] ss:$16 sps:$4 sm:$0xff]   ;;  %v4657_v27 = vld [vmem:[%s6992_s1 + $0x440] ss:$16 sps:$4 sm:$0xff]  }
  0x25   :  { %2694 = vmatprep.subr.bf16.mxu0 %v4605_v40  ;;  %v4665_v29 = vld [vmem:[%s6992_s1 + $0x464] ss:$16 sps:$4 sm:$0xff]   ;;  %v4663_v31 = vld [vmem:[%s6992_s1 + $0x460] ss:$16 sps:$4 sm:$0xff]   ;;  %v4678_v40 = vld [vmem:[%s6992_s1 + $0xa8] ss:$16 sps:$4 sm:$0xff]  }
  0x26   :  { %v4671_v33 = vld [vmem:[%s6992_s1 + $0x484] ss:$16 sps:$4 sm:$0xff]   ;;  %v4669_v35 = vld [vmem:[%s6992_s1 + $0x480] ss:$16 sps:$4 sm:$0xff]  }
  0x27   :  { %2654 = vmatpush1.bf16.msra.mxu1 %v4607_v41  ;;  %v4677_v37 = vld [vmem:[%s6992_s1 + $0x4a4] ss:$16 sps:$4 sm:$0xff]   ;;  %v4675_v39 = vld [vmem:[%s6992_s1 + $0x4a0] ss:$16 sps:$4 sm:$0xff]  }
  0x28   :  { %2695 = vmatpush1.bf16.msra.mxu0 %v4608_v44  ;;  %2655 = vmatprep.subr.bf16.mxu1 %v4609_v45  ;;  %v4683_v41 = vld [vmem:[%s6992_s1 + $0x4c4] ss:$16 sps:$4 sm:$0xff]   ;;  %v4681_v44 = vld [vmem:[%s6992_s1 + $0x4c0] ss:$16 sps:$4 sm:$0xff]   ;;  %v4684_v45 = vld [vmem:[%s6992_s1 + $0xc8] ss:$16 sps:$4 sm:$0xff]  }
  0x29   :  { %2696 = vmatprep.subr.bf16.mxu0 %v4611_v46  ;;  %v4689_v46 = vld [vmem:[%s6992_s1 + $0x4e4] ss:$16 sps:$4 sm:$0xff]   ;;  %v4729_v16 = vld [vmem:[%s6992_s1 + $0x5c0] ss:$16 sps:$4 sm:$0xff]  }
  0x2b   :  { %2656 = vmatpush1.bf16.msra.mxu1 %v4613_v47  ;;  %v4692_v47 = vld [vmem:[%s6992_s1 + $0xec] ss:$16 sps:$4 sm:$0xff]  }
  0x2c   :  { %2697 = vmatpush1.bf16.msra.mxu0 %v4614_v48  ;;  %2657 = vmatprep.subr.bf16.mxu1 %v4615_v50  ;;  %v4687_v48 = vld [vmem:[%s6992_s1 + $0x4e0] ss:$16 sps:$4 sm:$0xff]   ;;  %v4690_v50 = vld [vmem:[%s6992_s1 + $0xe8] ss:$16 sps:$4 sm:$0xff]  }
  0x2d   :  { %2698 = vmatprep.subr.bf16.mxu0 %v4617_v51  ;;  %v4695_v51 = vld [vmem:[%s6992_s1 + $0x504] ss:$16 sps:$4 sm:$0xff]  }
  0x2f   :  { %2658 = vmatpush1.bf16.msra.mxu1 %v4619_v53  ;;  %v4693_v53 = vld [vmem:[%s6992_s1 + $0x500] ss:$16 sps:$4 sm:$0xff]  }
  0x30   :  { %2699 = vmatpush1.bf16.msra.mxu0 %v4620_v55  ;;  %2659 = vmatprep.subr.bf16.mxu1 %v4621_v56  ;;  %v4701_v55 = vld [vmem:[%s6992_s1 + $0x524] ss:$16 sps:$4 sm:$0xff]   ;;  %v4704_v56 = vld [vmem:[%s6992_s1 + $0x12c] ss:$16 sps:$4 sm:$0xff]  }
  0x31   :  { %2700 = vmatprep.subr.bf16.mxu0 %v4623_v57  ;;  %v4699_v57 = vld [vmem:[%s6992_s1 + $0x520] ss:$16 sps:$4 sm:$0xff]  }
  0x33   :  { %2660 = vmatpush1.bf16.msra.mxu1 %v4625_v59  ;;  %v4707_v59 = vld [vmem:[%s6992_s1 + $0x544] ss:$16 sps:$4 sm:$0xff]  }
  0x34   :  { %2701 = vmatpush1.bf16.msra.mxu0 %v4626_v61  ;;  %2661 = vmatprep.subr.bf16.mxu1 %v4627_v62  ;;  %v4705_v61 = vld [vmem:[%s6992_s1 + $0x540] ss:$16 sps:$4 sm:$0xff]   ;;  %v4708_v62 = vld [vmem:[%s6992_s1 + $0x148] ss:$16 sps:$4 sm:$0xff]  }
  0x35   :  { %2702 = vmatprep.subr.bf16.mxu0 %v4629_v63  ;;  %v4713_v63 = vld [vmem:[%s6992_s1 + $0x564] ss:$16 sps:$4 sm:$0xff]  }
  0x37   :  { %2662 = vmatpush1.bf16.msra.mxu1 %v4631_v1  ;;  %v4716_v1 = vld [vmem:[%s6992_s1 + $0x16c] ss:$16 sps:$4 sm:$0xff]  }
  0x38   :  { %2703 = vmatpush1.bf16.msra.mxu0 %v4632_v2  ;;  %2663 = vmatprep.subr.bf16.mxu1 %v4633_v3  ;;  %v4711_v2 = vld [vmem:[%s6992_s1 + $0x560] ss:$16 sps:$4 sm:$0xff]   ;;  %v4714_v3 = vld [vmem:[%s6992_s1 + $0x168] ss:$16 sps:$4 sm:$0xff]  }
  0x39   :  { %2704 = vmatprep.subr.bf16.mxu0 %v4635_v4  ;;  %v4719_v4 = vld [vmem:[%s6992_s1 + $0x584] ss:$16 sps:$4 sm:$0xff]  }
  0x3b   :  { %2664 = vmatpush1.bf16.msra.mxu1 %v4637_v6  ;;  %v4717_v6 = vld [vmem:[%s6992_s1 + $0x580] ss:$16 sps:$4 sm:$0xff]  }
  0x3c   :  { %2705 = vmatpush1.bf16.msra.mxu0 %v4638_v7  ;;  %2665 = vmatprep.subr.bf16.mxu1 %v4639_v8  ;;  %v4720_v7 = vld [vmem:[%s6992_s1 + $0x188] ss:$16 sps:$4 sm:$0xff]   ;;  %v4725_v8 = vld [vmem:[%s6992_s1 + $0x5a4] ss:$16 sps:$4 sm:$0xff]  }
  0x3d   :  { %2706 = vmatprep.subr.bf16.mxu0 %v4641_v9  ;;  %v4728_v9 = vld [vmem:[%s6992_s1 + $0x1ac] ss:$16 sps:$4 sm:$0xff]  }
  0x3f   :  { %2666 = vmatpush1.bf16.msra.mxu1 %v4643_v11  ;;  %v4723_v11 = vld [vmem:[%s6992_s1 + $0x5a0] ss:$16 sps:$4 sm:$0xff]  }
  0x40   :  { %2707 = vmatpush1.bf16.msra.mxu0 %v4644_v13  ;;  %2922 = vmatprep.subr.bf16.mxu1 %v4650_v15  ;;  %v4726_v13 = vld [vmem:[%s6992_s1 + $0x1a8] ss:$16 sps:$4 sm:$0xff]   ;;  %v4734_v15 = vld [vmem:[%s6992_s1 + $0x1cc] ss:$16 sps:$4 sm:$0xff]  }
  0x41   :  { %2717 = vmatprep.subr.bf16.mxu0 %v4647_v14  ;;  %v4731_v14 = vld [vmem:[%s6992_s1 + $0x5c4] ss:$16 sps:$4 sm:$0xff]  }
  0x42   :  { %2668 = vmatmul.mubr.bf16.vlgmr.msra.gmra.mrb[0].mxu1 %v5563_v12 }
  0x43   :  { %2709 = vmatmul.mubr.bf16.vlgmr.msra.gmra.mrb[0].mxu0 %v5581_v18  ;;  %2923 = vmatpush1.bf16.msra.mxu1 %v4648_v19  ;;  %v4737_v19 = vld [vmem:[%s6992_s1 + $0x5e4] ss:$16 sps:$4 sm:$0xff]  }
  0x44   :  { %2718 = vmatpush1.bf16.msra.mxu0 %v4645_v17  ;;  %2924 = vmatprep.subr.bf16.mxu1 %v4656_v21  ;;  %v4732_v17 = vld [vmem:[%s6992_s1 + $0x1c8] ss:$16 sps:$4 sm:$0xff]   ;;  %v4735_v21 = vld [vmem:[%s6992_s1 + $0x5e0] ss:$16 sps:$4 sm:$0xff]  }
  0x45   :  { %2719 = vmatprep.subr.bf16.mxu0 %v4653_v20  ;;  %2749 = vmatprep.mubr.bf16.mxu0 %v5593_v22  ;;  %v4740_v20 = vld [vmem:[%s6992_s1 + $0x1ec] ss:$16 sps:$4 sm:$0xff]  }
  0x46   :  { %2954 = vmatprep.mubr.bf16.mxu1 %v491_v60  ;;  %v4710_v60 = vld [vmem:[%s6992_s1 + $0x14c] ss:$16 sps:$4 sm:$0xff]  }
  0x47   :  { %2925 = vmatpush1.bf16.msra.mxu1 %v4654_v24  ;;  %v4744_v24 = vld [vmem:[%s6992_s1 + $0x604] ss:$16 sps:$4 sm:$0xff]  }
  0x48   :  { %2720 = vmatpush1.bf16.msra.mxu0 %v4651_v23  ;;  %2926 = vmatprep.subr.bf16.mxu1 %v4662_v26  ;;  %v4738_v23 = vld [vmem:[%s6992_s1 + $0x1e8] ss:$16 sps:$4 sm:$0xff]   ;;  %v4742_v26 = vld [vmem:[%s6992_s1 + $0x600] ss:$16 sps:$4 sm:$0xff]  }
  0x49   :  { %2721 = vmatprep.subr.bf16.mxu0 %v4659_v25  ;;  %v4747_v25 = vld [vmem:[%s6992_s1 + $0x20c] ss:$16 sps:$4 sm:$0xff]  }
  0x4b   :  { %2927 = vmatpush1.bf16.msra.mxu1 %v4660_v28  ;;  %v4745_v28 = vld [vmem:[%s6992_s1 + $0x208] ss:$16 sps:$4 sm:$0xff]  }
  0x4c   :  { %2722 = vmatpush1.bf16.msra.mxu0 %v4657_v27  ;;  %2928 = vmatprep.subr.bf16.mxu1 %v4668_v30  ;;  %v5783_v27 = vrot.slane %v5557_v10, %v5492_v49  ;;  %v4753_v30 = vld [vmem:[%s6992_s1 + $0x22c] ss:$16 sps:$4 sm:$0xff]   ;;  %v5796_v10 = vcombine.high %v5593_v22, %v5593_v22 }
  0x4d   :  { %2723 = vmatprep.subr.bf16.mxu0 %v4665_v29  ;;  %v4750_v29 = vld [vmem:[%s6992_s1 + $0x624] ss:$16 sps:$4 sm:$0xff]  }
  0x4f   :  { %2929 = vmatpush1.bf16.msra.mxu1 %v4666_v32  ;;  %v4751_v32 = vld [vmem:[%s6992_s1 + $0x228] ss:$16 sps:$4 sm:$0xff]  }
  0x50   :  { %2724 = vmatpush1.bf16.msra.mxu0 %v4663_v31  ;;  %2930 = vmatprep.subr.bf16.mxu1 %v4674_v34  ;;  %v4748_v31 = vld [vmem:[%s6992_s1 + $0x620] ss:$16 sps:$4 sm:$0xff]  }
  0x51   :  { %2725 = vmatprep.subr.bf16.mxu0 %v4671_v33  ;;  %v4756_v33 = vld [vmem:[%s6992_s1 + $0x644] ss:$16 sps:$4 sm:$0xff]   ;;  %v4754_v34 = vld [vmem:[%s6992_s1 + $0x640] ss:$16 sps:$4 sm:$0xff]  }
  0x53   :  { %2931 = vmatpush1.bf16.msra.mxu1 %v4672_v36  ;;  %v4762_v36 = vld [vmem:[%s6992_s1 + $0x664] ss:$16 sps:$4 sm:$0xff]  }
  0x54   :  { %2726 = vmatpush1.bf16.msra.mxu0 %v4669_v35  ;;  %2932 = vmatprep.subr.bf16.mxu1 %v4680_v38  ;;  %v4757_v35 = vld [vmem:[%s6992_s1 + $0x248] ss:$16 sps:$4 sm:$0xff]  }
  0x55   :  { %2727 = vmatprep.subr.bf16.mxu0 %v4677_v37  ;;  %v4760_v37 = vld [vmem:[%s6992_s1 + $0x660] ss:$16 sps:$4 sm:$0xff]   ;;  %v4763_v38 = vld [vmem:[%s6992_s1 + $0x268] ss:$16 sps:$4 sm:$0xff]  }
  0x57   :  { %2933 = vmatpush1.bf16.msra.mxu1 %v4678_v40  ;;  %v4771_v40 = vld [vmem:[%s6992_s1 + $0x28c] ss:$16 sps:$4 sm:$0xff]  }
  0x58   :  { %2728 = vmatpush1.bf16.msra.mxu0 %v4675_v39  ;;  %2934 = vmatprep.subr.bf16.mxu1 %v4686_v42  ;;  %v4768_v39 = vld [vmem:[%s6992_s1 + $0x684] ss:$16 sps:$4 sm:$0xff]   ;;  %v4769_v42 = vld [vmem:[%s6992_s1 + $0x288] ss:$16 sps:$4 sm:$0xff]  }
  0x59   :  { %2729 = vmatprep.subr.bf16.mxu0 %v4683_v41  ;;  %v4766_v41 = vld [vmem:[%s6992_s1 + $0x680] ss:$16 sps:$4 sm:$0xff]  }
  0x5b   :  { %2935 = vmatpush1.bf16.msra.mxu1 %v4684_v45  ;;  %v4777_v45 = vld [vmem:[%s6992_s1 + $0x2ac] ss:$16 sps:$4 sm:$0xff]  }
  0x5c   :  { %2730 = vmatpush1.bf16.msra.mxu0 %v4681_v44  ;;  %2936 = vmatprep.subr.bf16.mxu1 %v4692_v47  ;;  %v4774_v44 = vld [vmem:[%s6992_s1 + $0x6a4] ss:$16 sps:$4 sm:$0xff]   ;;  %v4775_v47 = vld [vmem:[%s6992_s1 + $0x2a8] ss:$16 sps:$4 sm:$0xff]  }
  0x5d   :  { %2731 = vmatprep.subr.bf16.mxu0 %v4689_v46  ;;  %v4772_v46 = vld [vmem:[%s6992_s1 + $0x6a0] ss:$16 sps:$4 sm:$0xff]  }
  0x5f   :  { %2937 = vmatpush1.bf16.msra.mxu1 %v4690_v50  ;;  %v4783_v50 = vld [vmem:[%s6992_s1 + $0x2cc] ss:$16 sps:$4 sm:$0xff]  }
  0x60   :  { %2732 = vmatpush1.bf16.msra.mxu0 %v4687_v48  ;;  %2938 = vmatprep.subr.bf16.mxu1 %v4698_v52  ;;  %v4780_v48 = vld [vmem:[%s6992_s1 + $0x6c4] ss:$16 sps:$4 sm:$0xff]   ;;  %v4781_v52 = vld [vmem:[%s6992_s1 + $0x2c8] ss:$16 sps:$4 sm:$0xff]  }
  0x61   :  { %2733 = vmatprep.subr.bf16.mxu0 %v4695_v51  ;;  %v4778_v51 = vld [vmem:[%s6992_s1 + $0x6c0] ss:$16 sps:$4 sm:$0xff]  }
  0x63   :  { %2939 = vmatpush1.bf16.msra.mxu1 %v4696_v54  ;;  %v4789_v54 = vld [vmem:[%s6992_s1 + $0x2ec] ss:$16 sps:$4 sm:$0xff]  }
  0x64   :  { %2734 = vmatpush1.bf16.msra.mxu0 %v4693_v53  ;;  %2940 = vmatprep.subr.bf16.mxu1 %v4704_v56  ;;  %v4786_v53 = vld [vmem:[%s6992_s1 + $0x6e4] ss:$16 sps:$4 sm:$0xff]   ;;  %v4787_v56 = vld [vmem:[%s6992_s1 + $0x2e8] ss:$16 sps:$4 sm:$0xff]  }
  0x65   :  { %2735 = vmatprep.subr.bf16.mxu0 %v4701_v55  ;;  %v4784_v55 = vld [vmem:[%s6992_s1 + $0x6e0] ss:$16 sps:$4 sm:$0xff]  }
  0x67   :  { %2941 = vmatpush1.bf16.msra.mxu1 %v4702_v58  ;;  %v4795_v58 = vld [vmem:[%s6992_s1 + $0x30c] ss:$16 sps:$4 sm:$0xff]  }
  0x68   :  { %2736 = vmatpush1.bf16.msra.mxu0 %v4699_v57  ;;  %2942 = vmatprep.subr.bf16.mxu1 %v4710_v60  ;;  %v4792_v57 = vld [vmem:[%s6992_s1 + $0x704] ss:$16 sps:$4 sm:$0xff]   ;;  %v4793_v60 = vld [vmem:[%s6992_s1 + $0x308] ss:$16 sps:$4 sm:$0xff]  }
  0x69   :  { %2737 = vmatprep.subr.bf16.mxu0 %v4707_v59  ;;  %v4790_v59 = vld [vmem:[%s6992_s1 + $0x700] ss:$16 sps:$4 sm:$0xff]  }
  0x6b   :  { %2943 = vmatpush1.bf16.msra.mxu1 %v4708_v62  ;;  %v4801_v62 = vld [vmem:[%s6992_s1 + $0x32c] ss:$16 sps:$4 sm:$0xff]  }
  0x6c   :  { %2738 = vmatpush1.bf16.msra.mxu0 %v4705_v61  ;;  %2944 = vmatprep.subr.bf16.mxu1 %v4716_v1  ;;  %v4798_v61 = vld [vmem:[%s6992_s1 + $0x724] ss:$16 sps:$4 sm:$0xff]   ;;  %v4799_v1 = vld [vmem:[%s6992_s1 + $0x328] ss:$16 sps:$4 sm:$0xff]  }
  0x6d   :  { %2739 = vmatprep.subr.bf16.mxu0 %v4713_v63  ;;  %v4796_v63 = vld [vmem:[%s6992_s1 + $0x720] ss:$16 sps:$4 sm:$0xff]  }
  0x6f   :  { %2945 = vmatpush1.bf16.msra.mxu1 %v4714_v3  ;;  %v4807_v3 = vld [vmem:[%s6992_s1 + $0x34c] ss:$16 sps:$4 sm:$0xff]  }
  0x70   :  { %2740 = vmatpush1.bf16.msra.mxu0 %v4711_v2  ;;  %2946 = vmatprep.subr.bf16.mxu1 %v4722_v5  ;;  %v4804_v2 = vld [vmem:[%s6992_s1 + $0x744] ss:$16 sps:$4 sm:$0xff]   ;;  %v4805_v5 = vld [vmem:[%s6992_s1 + $0x348] ss:$16 sps:$4 sm:$0xff]  }
  0x71   :  { %2741 = vmatprep.subr.bf16.mxu0 %v4719_v4  ;;  %v4802_v4 = vld [vmem:[%s6992_s1 + $0x740] ss:$16 sps:$4 sm:$0xff]  }
  0x73   :  { %2947 = vmatpush1.bf16.msra.mxu1 %v4720_v7  ;;  %v4813_v7 = vld [vmem:[%s6992_s1 + $0x36c] ss:$16 sps:$4 sm:$0xff]  }
  0x74   :  { %2742 = vmatpush1.bf16.msra.mxu0 %v4717_v6  ;;  %2948 = vmatprep.subr.bf16.mxu1 %v4728_v9  ;;  %v4810_v6 = vld [vmem:[%s6992_s1 + $0x764] ss:$16 sps:$4 sm:$0xff]   ;;  %v4811_v9 = vld [vmem:[%s6992_s1 + $0x368] ss:$16 sps:$4 sm:$0xff]  }
  0x75   :  { %2743 = vmatprep.subr.bf16.mxu0 %v4725_v8  ;;  %v4808_v8 = vld [vmem:[%s6992_s1 + $0x760] ss:$16 sps:$4 sm:$0xff]  }
  0x77   :  { %2949 = vmatpush1.bf16.msra.mxu1 %v4726_v13  ;;  %v4819_v13 = vld [vmem:[%s6992_s1 + $0x38c] ss:$16 sps:$4 sm:$0xff]  }
  0x78   :  { %2744 = vmatpush1.bf16.msra.mxu0 %v4723_v11  ;;  %2950 = vmatprep.subr.bf16.mxu1 %v4734_v15  ;;  %v4816_v11 = vld [vmem:[%s6992_s1 + $0x784] ss:$16 sps:$4 sm:$0xff]   ;;  %v4817_v15 = vld [vmem:[%s6992_s1 + $0x388] ss:$16 sps:$4 sm:$0xff]  }
  0x79   :  { %2745 = vmatprep.subr.bf16.mxu0 %v4731_v14  ;;  %v4814_v14 = vld [vmem:[%s6992_s1 + $0x780] ss:$16 sps:$4 sm:$0xff]  }
  0x7b   :  { %2951 = vmatpush1.bf16.msra.mxu1 %v4732_v17  ;;  %v4825_v17 = vld [vmem:[%s6992_s1 + $0x3ac] ss:$16 sps:$4 sm:$0xff]  }
  0x7c   :  { %2746 = vmatpush1.bf16.msra.mxu0 %v4729_v16  ;;  %2952 = vmatprep.subr.bf16.mxu1 %v4740_v20  ;;  %v4822_v16 = vld [vmem:[%s6992_s1 + $0x7a4] ss:$16 sps:$4 sm:$0xff]   ;;  %v4823_v20 = vld [vmem:[%s6992_s1 + $0x3a8] ss:$16 sps:$4 sm:$0xff]  }
  0x7d   :  { %2747 = vmatprep.subr.bf16.mxu0 %v4737_v19  ;;  %v4820_v19 = vld [vmem:[%s6992_s1 + $0x7a0] ss:$16 sps:$4 sm:$0xff]  }
  0x7f   :  { %2953 = vmatpush1.bf16.msra.mxu1 %v4738_v23  ;;  %v4831_v23 = vld [vmem:[%s6992_s1 + $0x3cc] ss:$16 sps:$4 sm:$0xff]  }
  0x80   :  { %2748 = vmatpush1.bf16.msra.mxu0 %v4735_v21  ;;  %2963 = vmatprep.subr.bf16.mxu1 %v4747_v25  ;;  %v4828_v21 = vld [vmem:[%s6992_s1 + $0x7c4] ss:$16 sps:$4 sm:$0xff]   ;;  %v4826_v25 = vld [vmem:[%s6992_s1 + $0x7c0] ss:$16 sps:$4 sm:$0xff]  }
  0x81   :  { %2758 = vmatprep.subr.bf16.mxu0 %v4744_v24  ;;  %v5961_v24 = vld.sshfl [vmem:[%s6991_s0 + $0x8] sm:$0x37 pattern:$0x75316420] }
  0x82   :  { %2955 = vmatmul.mubr.bf16.vlgmr.msra.gmra.mrb[4].mxu1 %v5563_v12  ;;  %v4759_v12 = vld [vmem:[%s6992_s1 + $0x24c] ss:$16 sps:$4 sm:$0xff]  }
  0x83   :  { %2750 = vmatmul.mubr.bf16.vlgmr.msra.gmra.mrb[0].mxu0 %v5783_v27  ;;  %2964 = vmatpush1.bf16.msra.mxu1 %v4745_v28  ;;  %v4834_v28 = vld [vmem:[%s6992_s1 + $0x7e4] ss:$16 sps:$4 sm:$0xff]  }
  0x84   :  { %2759 = vmatpush1.bf16.msra.mxu0 %v4742_v26  ;;  %2965 = vmatprep.subr.bf16.mxu1 %v4753_v30  ;;  %v4829_v26 = vld [vmem:[%s6992_s1 + $0x3c8] ss:$16 sps:$4 sm:$0xff]   ;;  %v4832_v30 = vld [vmem:[%s6992_s1 + $0x7e0] ss:$16 sps:$4 sm:$0xff]  }
  0x85   :  { %2760 = vmatprep.subr.bf16.mxu0 %v4750_v29  ;;  %2790 = vmatprep.mubr.bf16.mxu0 %v5796_v10  ;;  %v4837_v29 = vld [vmem:[%s6992_s1 + $0x3ec] ss:$16 sps:$4 sm:$0xff]  }
  0x86   :  { %2995 = vmatprep.mubr.bf16.mxu1 %v5529_v0  ;;  %v4765_v0 = vld [vmem:[%s6992_s1 + $0x26c] ss:$16 sps:$4 sm:$0xff]  }
  0x87   :  { %2966 = vmatpush1.bf16.msra.mxu1 %v4751_v32  ;;  %v4840_v32 = vld [vmem:[%s6992_s1 + $0x804] ss:$16 sps:$4 sm:$0xff]  }
  0x88   :  { %2761 = vmatpush1.bf16.msra.mxu0 %v4748_v31  ;;  %2967 = vmatprep.subr.bf16.mxu1 %v4759_v12  ;;  %v4835_v31 = vld [vmem:[%s6992_s1 + $0x3e8] ss:$16 sps:$4 sm:$0xff]   ;;  %v518_v12 = vcombine.high %v5961_v24, %v5961_v24 }
  0x89   :  { %2762 = vmatprep.subr.bf16.mxu0 %v4756_v33  ;;  %v4843_v33 = vld [vmem:[%s6992_s1 + $0x40c] ss:$16 sps:$4 sm:$0xff]  }
  0x8b   :  { %2968 = vmatpush1.bf16.msra.mxu1 %v4757_v35  ;;  %v4838_v35 = vld [vmem:[%s6992_s1 + $0x800] ss:$16 sps:$4 sm:$0xff]  }
  0x8c   :  { %2763 = vmatpush1.bf16.msra.mxu0 %v4754_v34  ;;  %2969 = vmatprep.subr.bf16.mxu1 %v4765_v0  ;;  %v5991_v34 = vcombine.high %v5783_v27, %v5783_v27  ;;  %v4846_v0 = vld [vmem:[%s6992_s1 + $0x824] ss:$16 sps:$4 sm:$0xff]  }
  0x8d   :  { %2764 = vmatprep.subr.bf16.mxu0 %v4762_v36  ;;  %v4841_v36 = vld [vmem:[%s6992_s1 + $0x408] ss:$16 sps:$4 sm:$0xff]  }
  0x8f   :  { %2970 = vmatpush1.bf16.msra.mxu1 %v4763_v38  ;;  %v6006_v38 = vrot.slane %v518_v12, %v5492_v49  ;;  %v4922_v12 = vld [vmem:[%s6992_s1 + $0x9c0] ss:$16 sps:$4 sm:$0xff]  }
  0x90   :  { %2765 = vmatpush1.bf16.msra.mxu0 %v4760_v37  ;;  %2971 = vmatprep.subr.bf16.mxu1 %v4771_v40  ;;  %v4849_v37 = vld [vmem:[%s6992_s1 + $0x42c] ss:$16 sps:$4 sm:$0xff]   ;;  %v4847_v40 = vld [vmem:[%s6992_s1 + $0x428] ss:$16 sps:$4 sm:$0xff]  }
  0x91   :  { %2766 = vmatprep.subr.bf16.mxu0 %v4768_v39  ;;  %v4844_v39 = vld [vmem:[%s6992_s1 + $0x820] ss:$16 sps:$4 sm:$0xff]  }
  0x93   :  { %2972 = vmatpush1.bf16.msra.mxu1 %v4769_v42  ;;  %v4850_v42 = vld [vmem:[%s6992_s1 + $0x840] ss:$16 sps:$4 sm:$0xff]  }
  0x94   :  { %2767 = vmatpush1.bf16.msra.mxu0 %v4766_v41  ;;  %2973 = vmatprep.subr.bf16.mxu1 %v4777_v45  ;;  %v4852_v41 = vld [vmem:[%s6992_s1 + $0x844] ss:$16 sps:$4 sm:$0xff]  }
  0x95   :  { %2768 = vmatprep.subr.bf16.mxu0 %v4774_v44  ;;  %v4853_v44 = vld [vmem:[%s6992_s1 + $0x448] ss:$16 sps:$4 sm:$0xff]   ;;  %v4858_v45 = vld [vmem:[%s6992_s1 + $0x864] ss:$16 sps:$4 sm:$0xff]  }
  0x97   :  { %2974 = vmatpush1.bf16.msra.mxu1 %v4775_v47  ;;  %v4859_v47 = vld [vmem:[%s6992_s1 + $0x468] ss:$16 sps:$4 sm:$0xff]  }
  0x98   :  { %2769 = vmatpush1.bf16.msra.mxu0 %v4772_v46  ;;  %2975 = vmatprep.subr.bf16.mxu1 %v4783_v50  ;;  %v4856_v46 = vld [vmem:[%s6992_s1 + $0x860] ss:$16 sps:$4 sm:$0xff]   ;;  %v4867_v50 = vld [vmem:[%s6992_s1 + $0x48c] ss:$16 sps:$4 sm:$0xff]  }
  0x99   :  { %2770 = vmatprep.subr.bf16.mxu0 %v4780_v48  ;;  %v4864_v48 = vld [vmem:[%s6992_s1 + $0x884] ss:$16 sps:$4 sm:$0xff]  }
  0x9b   :  { %2976 = vmatpush1.bf16.msra.mxu1 %v4781_v52  ;;  %v4865_v52 = vld [vmem:[%s6992_s1 + $0x488] ss:$16 sps:$4 sm:$0xff]  }
  0x9c   :  { %2771 = vmatpush1.bf16.msra.mxu0 %v4778_v51  ;;  %2977 = vmatprep.subr.bf16.mxu1 %v4789_v54  ;;  %v4862_v51 = vld [vmem:[%s6992_s1 + $0x880] ss:$16 sps:$4 sm:$0xff]   ;;  %v4873_v54 = vld [vmem:[%s6992_s1 + $0x4ac] ss:$16 sps:$4 sm:$0xff]  }
  0x9d   :  { %2772 = vmatprep.subr.bf16.mxu0 %v4786_v53  ;;  %v4870_v53 = vld [vmem:[%s6992_s1 + $0x8a4] ss:$16 sps:$4 sm:$0xff]  }
  0x9f   :  { %2978 = vmatpush1.bf16.msra.mxu1 %v4787_v56  ;;  %v4871_v56 = vld [vmem:[%s6992_s1 + $0x4a8] ss:$16 sps:$4 sm:$0xff]  }
  0xa0   :  { %2773 = vmatpush1.bf16.msra.mxu0 %v4784_v55  ;;  %2979 = vmatprep.subr.bf16.mxu1 %v4795_v58  ;;  %v4868_v55 = vld [vmem:[%s6992_s1 + $0x8a0] ss:$16 sps:$4 sm:$0xff]   ;;  %v4879_v58 = vld [vmem:[%s6992_s1 + $0x4cc] ss:$16 sps:$4 sm:$0xff]  }
  0xa1   :  { %2774 = vmatprep.subr.bf16.mxu0 %v4792_v57  ;;  %v4876_v57 = vld [vmem:[%s6992_s1 + $0x8c4] ss:$16 sps:$4 sm:$0xff]  }
  0xa3   :  { %2980 = vmatpush1.bf16.msra.mxu1 %v4793_v60  ;;  %v4877_v60 = vld [vmem:[%s6992_s1 + $0x4c8] ss:$16 sps:$4 sm:$0xff]  }
  0xa4   :  { %2775 = vmatpush1.bf16.msra.mxu0 %v4790_v59  ;;  %2981 = vmatprep.subr.bf16.mxu1 %v4801_v62  ;;  %v4874_v59 = vld [vmem:[%s6992_s1 + $0x8c0] ss:$16 sps:$4 sm:$0xff]   ;;  %v4885_v62 = vld [vmem:[%s6992_s1 + $0x4ec] ss:$16 sps:$4 sm:$0xff]  }
  0xa5   :  { %2776 = vmatprep.subr.bf16.mxu0 %v4798_v61  ;;  %v4882_v61 = vld [vmem:[%s6992_s1 + $0x8e4] ss:$16 sps:$4 sm:$0xff]  }
  0xa7   :  { %2982 = vmatpush1.bf16.msra.mxu1 %v4799_v1  ;;  %v4883_v1 = vld [vmem:[%s6992_s1 + $0x4e8] ss:$16 sps:$4 sm:$0xff]  }
  0xa8   :  { %2777 = vmatpush1.bf16.msra.mxu0 %v4796_v63  ;;  %2983 = vmatprep.subr.bf16.mxu1 %v4807_v3  ;;  %v4880_v63 = vld [vmem:[%s6992_s1 + $0x8e0] ss:$16 sps:$4 sm:$0xff]   ;;  %v4891_v3 = vld [vmem:[%s6992_s1 + $0x50c] ss:$16 sps:$4 sm:$0xff]  }
  0xa9   :  { %2778 = vmatprep.subr.bf16.mxu0 %v4804_v2  ;;  %v4888_v2 = vld [vmem:[%s6992_s1 + $0x904] ss:$16 sps:$4 sm:$0xff]  }
  0xab   :  { %2984 = vmatpush1.bf16.msra.mxu1 %v4805_v5  ;;  %v4889_v5 = vld [vmem:[%s6992_s1 + $0x508] ss:$16 sps:$4 sm:$0xff]  }
  0xac   :  { %2779 = vmatpush1.bf16.msra.mxu0 %v4802_v4  ;;  %2985 = vmatprep.subr.bf16.mxu1 %v4813_v7  ;;  %v4886_v4 = vld [vmem:[%s6992_s1 + $0x900] ss:$16 sps:$4 sm:$0xff]   ;;  %v4897_v7 = vld [vmem:[%s6992_s1 + $0x52c] ss:$16 sps:$4 sm:$0xff]  }
  0xad   :  { %2780 = vmatprep.subr.bf16.mxu0 %v4810_v6  ;;  %v4894_v6 = vld [vmem:[%s6992_s1 + $0x924] ss:$16 sps:$4 sm:$0xff]  }
  0xaf   :  { %2986 = vmatpush1.bf16.msra.mxu1 %v4811_v9  ;;  %v4895_v9 = vld [vmem:[%s6992_s1 + $0x528] ss:$16 sps:$4 sm:$0xff]  }
  0xb0   :  { %2781 = vmatpush1.bf16.msra.mxu0 %v4808_v8  ;;  %2987 = vmatprep.subr.bf16.mxu1 %v4819_v13  ;;  %v4892_v8 = vld [vmem:[%s6992_s1 + $0x920] ss:$16 sps:$4 sm:$0xff]   ;;  %v4903_v13 = vld [vmem:[%s6992_s1 + $0x54c] ss:$16 sps:$4 sm:$0xff]  }
  0xb1   :  { %2782 = vmatprep.subr.bf16.mxu0 %v4816_v11  ;;  %v4900_v11 = vld [vmem:[%s6992_s1 + $0x944] ss:$16 sps:$4 sm:$0xff]  }
  0xb3   :  { %2988 = vmatpush1.bf16.msra.mxu1 %v4817_v15  ;;  %v4901_v15 = vld [vmem:[%s6992_s1 + $0x548] ss:$16 sps:$4 sm:$0xff]  }
  0xb4   :  { %2783 = vmatpush1.bf16.msra.mxu0 %v4814_v14  ;;  %2989 = vmatprep.subr.bf16.mxu1 %v4825_v17  ;;  %v4898_v14 = vld [vmem:[%s6992_s1 + $0x940] ss:$16 sps:$4 sm:$0xff]   ;;  %v4909_v17 = vld [vmem:[%s6992_s1 + $0x56c] ss:$16 sps:$4 sm:$0xff]  }
  0xb5   :  { %2784 = vmatprep.subr.bf16.mxu0 %v4822_v16  ;;  %v4906_v16 = vld [vmem:[%s6992_s1 + $0x964] ss:$16 sps:$4 sm:$0xff]  }
  0xb7   :  { %2990 = vmatpush1.bf16.msra.mxu1 %v4823_v20  ;;  %v4907_v20 = vld [vmem:[%s6992_s1 + $0x568] ss:$16 sps:$4 sm:$0xff]  }
  0xb8   :  { %2785 = vmatpush1.bf16.msra.mxu0 %v4820_v19  ;;  %2991 = vmatprep.subr.bf16.mxu1 %v4831_v23  ;;  %v4904_v19 = vld [vmem:[%s6992_s1 + $0x960] ss:$16 sps:$4 sm:$0xff]   ;;  %v4915_v23 = vld [vmem:[%s6992_s1 + $0x58c] ss:$16 sps:$4 sm:$0xff]  }
  0xb9   :  { %2786 = vmatprep.subr.bf16.mxu0 %v4828_v21  ;;  %v4912_v21 = vld [vmem:[%s6992_s1 + $0x984] ss:$16 sps:$4 sm:$0xff]  }
  0xbb   :  { %2992 = vmatpush1.bf16.msra.mxu1 %v4829_v26  ;;  %v4913_v26 = vld [vmem:[%s6992_s1 + $0x588] ss:$16 sps:$4 sm:$0xff]  }
  0xbc   :  { %2787 = vmatpush1.bf16.msra.mxu0 %v4826_v25  ;;  %2993 = vmatprep.subr.bf16.mxu1 %v4837_v29  ;;  %v4910_v25 = vld [vmem:[%s6992_s1 + $0x980] ss:$16 sps:$4 sm:$0xff]   ;;  %v4921_v29 = vld [vmem:[%s6992_s1 + $0x5ac] ss:$16 sps:$4 sm:$0xff]  }
  0xbd   :  { %2788 = vmatprep.subr.bf16.mxu0 %v4834_v28  ;;  %v4918_v28 = vld [vmem:[%s6992_s1 + $0x9a4] ss:$16 sps:$4 sm:$0xff]  }
  0xbf   :  { %2994 = vmatpush1.bf16.msra.mxu1 %v4835_v31  ;;  %v4919_v31 = vld [vmem:[%s6992_s1 + $0x5a8] ss:$16 sps:$4 sm:$0xff]  }
  0xc0   :  { %2789 = vmatpush1.bf16.msra.mxu0 %v4832_v30  ;;  %3004 = vmatprep.subr.bf16.mxu1 %v4843_v33  ;;  %v4916_v30 = vld [vmem:[%s6992_s1 + $0x9a0] ss:$16 sps:$4 sm:$0xff]   ;;  %v4927_v33 = vld [vmem:[%s6992_s1 + $0x5cc] ss:$16 sps:$4 sm:$0xff]  }
  0xc1   :  { %2799 = vmatprep.subr.bf16.mxu0 %v4840_v32  ;;  %v4924_v32 = vld [vmem:[%s6992_s1 + $0x9c4] ss:$16 sps:$4 sm:$0xff]  }
  0xc2   :  { %2996 = vmatmul.mubr.bf16.vlgmr.msra.gmra.mrb[4].mxu1 %v5581_v18  ;;  %v4855_v18 = vld [vmem:[%s6992_s1 + $0x44c] ss:$16 sps:$4 sm:$0xff]  }
  0xc3   :  { %2791 = vmatmul.mubr.bf16.vlgmr.msra.gmra.mrb[0].mxu0 %v5991_v34  ;;  %3005 = vmatpush1.bf16.msra.mxu1 %v4841_v36  ;;  %v4930_v36 = vld [vmem:[%s6992_s1 + $0x9e4] ss:$16 sps:$4 sm:$0xff]  }
  0xc4   :  { %2800 = vmatpush1.bf16.msra.mxu0 %v4838_v35  ;;  %3006 = vmatprep.subr.bf16.mxu1 %v4849_v37  ;;  %v4925_v35 = vld [vmem:[%s6992_s1 + $0x5c8] ss:$16 sps:$4 sm:$0xff]   ;;  %v4928_v37 = vld [vmem:[%s6992_s1 + $0x9e0] ss:$16 sps:$4 sm:$0xff]  }
  0xc5   :  { %2801 = vmatprep.subr.bf16.mxu0 %v4846_v0  ;;  %2831 = vmatprep.mubr.bf16.mxu0 %v6006_v38  ;;  %v4933_v0 = vld [vmem:[%s6992_s1 + $0x5ec] ss:$16 sps:$4 sm:$0xff]  }
  0xc6   :  { %3036 = vmatprep.mubr.bf16.mxu1 %v5593_v22  ;;  %v4861_v22 = vld [vmem:[%s6992_s1 + $0x46c] ss:$16 sps:$4 sm:$0xff]  }
  0xc7   :  { %3007 = vmatpush1.bf16.msra.mxu1 %v4847_v40  ;;  %v4937_v40 = vld [vmem:[%s6992_s1 + $0xa04] ss:$16 sps:$4 sm:$0xff]  }
  0xc8   :  { %2802 = vmatpush1.bf16.msra.mxu0 %v4844_v39  ;;  %3008 = vmatprep.subr.bf16.mxu1 %v4855_v18  ;;  %v4931_v39 = vld [vmem:[%s6992_s1 + $0x5e8] ss:$16 sps:$4 sm:$0xff]   ;;  %v4935_v18 = vld [vmem:[%s6992_s1 + $0xa00] ss:$16 sps:$4 sm:$0xff]  }
  0xc9   :  { %2803 = vmatprep.subr.bf16.mxu0 %v4852_v41  ;;  %v4940_v41 = vld [vmem:[%s6992_s1 + $0x60c] ss:$16 sps:$4 sm:$0xff]  }
  0xcb   :  { %3009 = vmatpush1.bf16.msra.mxu1 %v4853_v44  ;;  %v6200_v44 = vrot.slane %v5961_v24, %v5492_v49  ;;  %v4944_v24 = vld [vmem:[%s6992_s1 + $0x628] ss:$16 sps:$4 sm:$0xff]  }
  0xcc   :  { %2804 = vmatpush1.bf16.msra.mxu0 %v4850_v42  ;;  %3010 = vmatprep.subr.bf16.mxu1 %v4861_v22  ;;  %v4938_v42 = vld [vmem:[%s6992_s1 + $0x608] ss:$16 sps:$4 sm:$0xff]   ;;  %v4946_v22 = vld [vmem:[%s6992_s1 + $0x62c] ss:$16 sps:$4 sm:$0xff]  }
  0xcd   :  { %2805 = vmatprep.subr.bf16.mxu0 %v4858_v45  ;;  %v4943_v45 = vld [vmem:[%s6992_s1 + $0xa24] ss:$16 sps:$4 sm:$0xff]  }
  0xcf   :  { %3011 = vmatpush1.bf16.msra.mxu1 %v4859_v47  ;;  %v6216_v47 = vcombine.high %v6006_v38, %v6006_v38 }
  0xd0   :  { %2806 = vmatpush1.bf16.msra.mxu0 %v4856_v46  ;;  %3012 = vmatprep.subr.bf16.mxu1 %v4867_v50  ;;  %v4941_v46 = vld [vmem:[%s6992_s1 + $0xa20] ss:$16 sps:$4 sm:$0xff]   ;;  %v4952_v50 = vld [vmem:[%s6992_s1 + $0x64c] ss:$16 sps:$4 sm:$0xff]  }
  0xd1   :  { %2807 = vmatprep.subr.bf16.mxu0 %v4864_v48  ;;  %v4949_v48 = vld [vmem:[%s6992_s1 + $0xa44] ss:$16 sps:$4 sm:$0xff]  }
  0xd3   :  { %3013 = vmatpush1.bf16.msra.mxu1 %v4865_v52  ;;  %v4955_v52 = vld [vmem:[%s6992_s1 + $0xa64] ss:$16 sps:$4 sm:$0xff]  }
  0xd4   :  { %2808 = vmatpush1.bf16.msra.mxu0 %v4862_v51  ;;  %3014 = vmatprep.subr.bf16.mxu1 %v4873_v54  ;;  %v4947_v51 = vld [vmem:[%s6992_s1 + $0xa40] ss:$16 sps:$4 sm:$0xff]  }
  0xd5   :  { %2809 = vmatprep.subr.bf16.mxu0 %v4870_v53  ;;  %v4958_v53 = vld [vmem:[%s6992_s1 + $0x66c] ss:$16 sps:$4 sm:$0xff]   ;;  %v4953_v54 = vld [vmem:[%s6992_s1 + $0xa60] ss:$16 sps:$4 sm:$0xff]  }
  0xd7   :  { %3015 = vmatpush1.bf16.msra.mxu1 %v4871_v56  ;;  %v4964_v56 = vld [vmem:[%s6992_s1 + $0x68c] ss:$16 sps:$4 sm:$0xff]  }
  0xd8   :  { %2810 = vmatpush1.bf16.msra.mxu0 %v4868_v55  ;;  %3016 = vmatprep.subr.bf16.mxu1 %v4879_v58  ;;  %v4961_v55 = vld [vmem:[%s6992_s1 + $0xa84] ss:$16 sps:$4 sm:$0xff]   ;;  %v4962_v58 = vld [vmem:[%s6992_s1 + $0x688] ss:$16 sps:$4 sm:$0xff]  }
  0xd9   :  { %2811 = vmatprep.subr.bf16.mxu0 %v4876_v57  ;;  %v4959_v57 = vld [vmem:[%s6992_s1 + $0xa80] ss:$16 sps:$4 sm:$0xff]  }
  0xdb   :  { %3017 = vmatpush1.bf16.msra.mxu1 %v4877_v60  ;;  %v4970_v60 = vld [vmem:[%s6992_s1 + $0x6ac] ss:$16 sps:$4 sm:$0xff]  }
  0xdc   :  { %2812 = vmatpush1.bf16.msra.mxu0 %v4874_v59  ;;  %3018 = vmatprep.subr.bf16.mxu1 %v4885_v62  ;;  %v4967_v59 = vld [vmem:[%s6992_s1 + $0xaa4] ss:$16 sps:$4 sm:$0xff]   ;;  %v4968_v62 = vld [vmem:[%s6992_s1 + $0x6a8] ss:$16 sps:$4 sm:$0xff]  }
  0xdd   :  { %2813 = vmatprep.subr.bf16.mxu0 %v4882_v61  ;;  %v4965_v61 = vld [vmem:[%s6992_s1 + $0xaa0] ss:$16 sps:$4 sm:$0xff]  }
  0xdf   :  { %3019 = vmatpush1.bf16.msra.mxu1 %v4883_v1  ;;  %v4976_v1 = vld [vmem:[%s6992_s1 + $0x6cc] ss:$16 sps:$4 sm:$0xff]  }
  0xe0   :  { %2814 = vmatpush1.bf16.msra.mxu0 %v4880_v63  ;;  %3020 = vmatprep.subr.bf16.mxu1 %v4891_v3  ;;  %v4973_v63 = vld [vmem:[%s6992_s1 + $0xac4] ss:$16 sps:$4 sm:$0xff]   ;;  %v4971_v3 = vld [vmem:[%s6992_s1 + $0xac0] ss:$16 sps:$4 sm:$0xff]  }
  0xe1   :  { %2815 = vmatprep.subr.bf16.mxu0 %v4888_v2 }
  0xe3   :  { %3021 = vmatpush1.bf16.msra.mxu1 %v4889_v5 }
  0xe4   :  { %2816 = vmatpush1.bf16.msra.mxu0 %v4886_v4  ;;  %3022 = vmatprep.subr.bf16.mxu1 %v4897_v7  ;;  %v4974_v4 = vld [vmem:[%s6992_s1 + $0x6c8] ss:$16 sps:$4 sm:$0xff]   ;;  %v4979_v7 = vld [vmem:[%s6992_s1 + $0xae4] ss:$16 sps:$4 sm:$0xff]  }
  0xe5   :  { %2817 = vmatprep.subr.bf16.mxu0 %v4894_v6 }
  0xe7   :  { %3023 = vmatpush1.bf16.msra.mxu1 %v4895_v9 }
  0xe8   :  { %2818 = vmatpush1.bf16.msra.mxu0 %v4892_v8  ;;  %3024 = vmatprep.subr.bf16.mxu1 %v4903_v13  ;;  %v4982_v8 = vld [vmem:[%s6992_s1 + $0x6ec] ss:$16 sps:$4 sm:$0xff]   ;;  %v4980_v13 = vld [vmem:[%s6992_s1 + $0x6e8] ss:$16 sps:$4 sm:$0xff]  }
  0xe9   :  { %2819 = vmatprep.subr.bf16.mxu0 %v4900_v11  ;;  %v4977_v11 = vld [vmem:[%s6992_s1 + $0xae0] ss:$16 sps:$4 sm:$0xff]  }
  0xeb   :  { %3025 = vmatpush1.bf16.msra.mxu1 %v4901_v15  ;;  %v4988_v15 = vld [vmem:[%s6992_s1 + $0x70c] ss:$16 sps:$4 sm:$0xff]  }
  0xec   :  { %2820 = vmatpush1.bf16.msra.mxu0 %v4898_v14  ;;  %3026 = vmatprep.subr.bf16.mxu1 %v4909_v17  ;;  %v4985_v14 = vld [vmem:[%s6992_s1 + $0xb04] ss:$16 sps:$4 sm:$0xff]   ;;  %v4986_v17 = vld [vmem:[%s6992_s1 + $0x708] ss:$16 sps:$4 sm:$0xff]  }
  0xed   :  { %2821 = vmatprep.subr.bf16.mxu0 %v4906_v16  ;;  %v4983_v16 = vld [vmem:[%s6992_s1 + $0xb00] ss:$16 sps:$4 sm:$0xff]  }
  0xef   :  { %3027 = vmatpush1.bf16.msra.mxu1 %v4907_v20  ;;  %v4994_v20 = vld [vmem:[%s6992_s1 + $0x72c] ss:$16 sps:$4 sm:$0xff]  }
  0xf0   :  { %2822 = vmatpush1.bf16.msra.mxu0 %v4904_v19  ;;  %3028 = vmatprep.subr.bf16.mxu1 %v4915_v23  ;;  %v4991_v19 = vld [vmem:[%s6992_s1 + $0xb24] ss:$16 sps:$4 sm:$0xff]   ;;  %v4992_v23 = vld [vmem:[%s6992_s1 + $0x728] ss:$16 sps:$4 sm:$0xff]  }
  0xf1   :  { %2823 = vmatprep.subr.bf16.mxu0 %v4912_v21  ;;  %v4989_v21 = vld [vmem:[%s6992_s1 + $0xb20] ss:$16 sps:$4 sm:$0xff]  }
  0xf3   :  { %3029 = vmatpush1.bf16.msra.mxu1 %v4913_v26  ;;  %v5000_v26 = vld [vmem:[%s6992_s1 + $0x74c] ss:$16 sps:$4 sm:$0xff]  }
  0xf4   :  { %2824 = vmatpush1.bf16.msra.mxu0 %v4910_v25  ;;  %3030 = vmatprep.subr.bf16.mxu1 %v4921_v29  ;;  %v4997_v25 = vld [vmem:[%s6992_s1 + $0xb44] ss:$16 sps:$4 sm:$0xff]   ;;  %v4998_v29 = vld [vmem:[%s6992_s1 + $0x748] ss:$16 sps:$4 sm:$0xff]  }
  0xf5   :  { %2825 = vmatprep.subr.bf16.mxu0 %v4918_v28  ;;  %v4995_v28 = vld [vmem:[%s6992_s1 + $0xb40] ss:$16 sps:$4 sm:$0xff]  }
  0xf7   :  { %3031 = vmatpush1.bf16.msra.mxu1 %v4919_v31  ;;  %v5006_v31 = vld [vmem:[%s6992_s1 + $0x76c] ss:$16 sps:$4 sm:$0xff]  }
  0xf8   :  { %2826 = vmatpush1.bf16.msra.mxu0 %v4916_v30  ;;  %3032 = vmatprep.subr.bf16.mxu1 %v4927_v33  ;;  %v5003_v30 = vld [vmem:[%s6992_s1 + $0xb64] ss:$16 sps:$4 sm:$0xff]   ;;  %v5004_v33 = vld [vmem:[%s6992_s1 + $0x768] ss:$16 sps:$4 sm:$0xff]  }
  0xf9   :  { %2827 = vmatprep.subr.bf16.mxu0 %v4924_v32  ;;  %v5001_v32 = vld [vmem:[%s6992_s1 + $0xb60] ss:$16 sps:$4 sm:$0xff]  }
  0xfb   :  { %3033 = vmatpush1.bf16.msra.mxu1 %v4925_v35  ;;  %v5012_v35 = vld [vmem:[%s6992_s1 + $0x78c] ss:$16 sps:$4 sm:$0xff]  }
  0xfc   :  { %2828 = vmatpush1.bf16.msra.mxu0 %v4922_v12  ;;  %3034 = vmatprep.subr.bf16.mxu1 %v4933_v0  ;;  %v5009_v12 = vld [vmem:[%s6992_s1 + $0xb84] ss:$16 sps:$4 sm:$0xff]  }
  0xfd   :  { %2829 = vmatprep.subr.bf16.mxu0 %v4930_v36 }
  0xff   :  { %3035 = vmatpush1.bf16.msra.mxu1 %v4931_v39 }
 0x100   :  { %2830 = vmatpush1.bf16.msra.mxu0 %v4928_v37  ;;  %3045 = vmatprep.subr.bf16.mxu1 %v4940_v41 }
 0x101   :  { %2840 = vmatprep.subr.bf16.mxu0 %v4937_v40 }
 0x102   :  { %3037 = vmatmul.mubr.bf16.vlgmr.msra.gmra.mrb[4].mxu1 %v5783_v27  ;;  %v4950_v27 = vld [vmem:[%s6992_s1 + $0x648] ss:$16 sps:$4 sm:$0xff]  }
 0x103   :  { %2832 = vmatmul.mubr.bf16.vlgmr.msra.gmra.mrb[0].mxu0 %v6200_v44  ;;  %3046 = vmatpush1.bf16.msra.mxu1 %v4938_v42 }
 0x104   :  { %2841 = vmatpush1.bf16.msra.mxu0 %v4935_v18  ;;  %3047 = vmatprep.subr.bf16.mxu1 %v4946_v22 }
 0x105   :  { %2842 = vmatprep.subr.bf16.mxu0 %v4943_v45  ;;  %2872 = vmatprep.mubr.bf16.mxu0 %v6216_v47 }
 0x106   :  { %3077 = vmatprep.mubr.bf16.mxu1 %v5796_v10  ;;  %v4956_v10 = vld [vmem:[%s6992_s1 + $0x668] ss:$16 sps:$4 sm:$0xff]  }
 0x107   :  { %3048 = vmatpush1.bf16.msra.mxu1 %v4944_v24 }
 0x108   :  { %2843 = vmatpush1.bf16.msra.mxu0 %v4941_v46  ;;  %3049 = vmatprep.subr.bf16.mxu1 %v4952_v50 }
 0x109   :  { %2844 = vmatprep.subr.bf16.mxu0 %v4949_v48 }
 0x10b   :  { %3050 = vmatpush1.bf16.msra.mxu1 %v4950_v27 }
 0x10c   :  { %2845 = vmatpush1.bf16.msra.mxu0 %v4947_v51  ;;  %3051 = vmatprep.subr.bf16.mxu1 %v4958_v53 }
 0x10d   :  { %2846 = vmatprep.subr.bf16.mxu0 %v4955_v52 }
 0x10f   :  { %3052 = vmatpush1.bf16.msra.mxu1 %v4956_v10 }
 0x110   :  { %2847 = vmatpush1.bf16.msra.mxu0 %v4953_v54  ;;  %3053 = vmatprep.subr.bf16.mxu1 %v4964_v56 }
 0x111   :  { %2848 = vmatprep.subr.bf16.mxu0 %v4961_v55 }
 0x113   :  { %3054 = vmatpush1.bf16.msra.mxu1 %v4962_v58 }
 0x114   :  { %2849 = vmatpush1.bf16.msra.mxu0 %v4959_v57  ;;  %3055 = vmatprep.subr.bf16.mxu1 %v4970_v60 }
 0x115   :  { %2850 = vmatprep.subr.bf16.mxu0 %v4967_v59  ;;  %v6276_v2 = vpop.f32.mrb[0].mxu1 }
 0x116   :  { %v6284_v5 = vpop.f32.mrb[1].mxu1 }
 0x117   :  { %v2673_v6 = vpop.f32.mrb[2].mxu1  ;;  %3056 = vmatpush1.bf16.msra.mxu1 %v4968_v62 }
 0x118   :  { %2851 = vmatpush1.bf16.msra.mxu0 %v4965_v61  ;;  %v2674_v9 = vpop.f32.mrb[3].mxu1  ;;  %3057 = vmatprep.subr.bf16.mxu1 %v4976_v1 }
 0x119   :  { %2852 = vmatprep.subr.bf16.mxu0 %v4973_v63 }
 0x11b   :  { %3058 = vmatpush1.bf16.msra.mxu1 %v4974_v4 }
 0x11c   :  { %2853 = vmatpush1.bf16.msra.mxu0 %v4971_v3  ;;  %3059 = vmatprep.subr.bf16.mxu1 %v4982_v8 }
 0x11d   :  { %2854 = vmatprep.subr.bf16.mxu0 %v4979_v7 }
 0x11f   :  { %3060 = vmatpush1.bf16.msra.mxu1 %v4980_v13 }
 0x120   :  { %2855 = vmatpush1.bf16.msra.mxu0 %v4977_v11  ;;  %3061 = vmatprep.subr.bf16.mxu1 %v4988_v15 }
 0x121   :  { %2856 = vmatprep.subr.bf16.mxu0 %v4985_v14 }
 0x123   :  { %3062 = vmatpush1.bf16.msra.mxu1 %v4986_v17 }
 0x124   :  { %2857 = vmatpush1.bf16.msra.mxu0 %v4983_v16  ;;  %3063 = vmatprep.subr.bf16.mxu1 %v4994_v20 }
 0x125   :  { %2858 = vmatprep.subr.bf16.mxu0 %v4991_v19 }
 0x127   :  { %3064 = vmatpush1.bf16.msra.mxu1 %v4992_v23 }
 0x128   :  { %2859 = vmatpush1.bf16.msra.mxu0 %v4989_v21  ;;  %3065 = vmatprep.subr.bf16.mxu1 %v5000_v26 }
 0x129   :  { %2860 = vmatprep.subr.bf16.mxu0 %v4997_v25 }
 0x12b   :  { %3066 = vmatpush1.bf16.msra.mxu1 %v4998_v29 }
 0x12c   :  { %2861 = vmatpush1.bf16.msra.mxu0 %v4995_v28  ;;  %3067 = vmatprep.subr.bf16.mxu1 %v5006_v31 }
 0x12d   :  { %2862 = vmatprep.subr.bf16.mxu0 %v5003_v30 }
 0x12e   :  { %12 = vsyncpa [#allocation4], 0  ;;  %v5007_v36 = vld [vmem:[%s6992_s1 + $0xb80] ss:$16 sps:$4 sm:$0xff]   ;;  %v5010_v0 = vld [vmem:[%s6992_s1 + $0x788] ss:$16 sps:$4 sm:$0xff]   ;;  %v6402_v52 = vcombine.high %v6200_v44, %v6200_v44 }
 0x12f   :  { %3068 = vmatpush1.bf16.msra.mxu1 %v5004_v33  ;;  %v5015_v37 = vld [vmem:[%s6992_s1 + $0xba4] ss:$16 sps:$4 sm:$0xff]   ;;  %v5018_v39 = vld [vmem:[%s6992_s1 + $0x7ac] ss:$16 sps:$4 sm:$0xff]   ;;  %v5013_v40 = vld [vmem:[%s6992_s1 + $0xba0] ss:$16 sps:$4 sm:$0xff]  }
 0x130   :  { %2863 = vmatpush1.bf16.msra.mxu0 %v5001_v32  ;;  %3069 = vmatprep.subr.bf16.mxu1 %v5012_v35  ;;  %v5016_v41 = vld [vmem:[%s6992_s1 + $0x7a8] ss:$16 sps:$4 sm:$0xff]   ;;  %v5021_v18 = vld [vmem:[%s6992_s1 + $0xbc4] ss:$16 sps:$4 sm:$0xff]   ;;  %v5024_v42 = vld [vmem:[%s6992_s1 + $0x7cc] ss:$16 sps:$4 sm:$0xff]  }
 0x131   :  { %2864 = vmatprep.subr.bf16.mxu0 %v5009_v12  ;;  %v5019_v45 = vld [vmem:[%s6992_s1 + $0xbc0] ss:$16 sps:$4 sm:$0xff]   ;;  %v5022_v22 = vld [vmem:[%s6992_s1 + $0x7c8] ss:$16 sps:$4 sm:$0xff]   ;;  %v5027_v46 = vld [vmem:[%s6992_s1 + $0xbe4] ss:$16 sps:$4 sm:$0xff]  }
 0x132   :  { %v5030_v24 = vld [vmem:[%s6992_s1 + $0x7ec] ss:$16 sps:$4 sm:$0xff]   ;;  %v5025_v48 = vld [vmem:[%s6992_s1 + $0xbe0] ss:$16 sps:$4 sm:$0xff]   ;;  %v5028_v50 = vld [vmem:[%s6992_s1 + $0x7e8] ss:$16 sps:$4 sm:$0xff]  }
 0x133   :  { %3070 = vmatpush1.bf16.msra.mxu1 %v5010_v0  ;;  %v5033_v51 = vld [vmem:[%s6992_s1 + $0xc04] ss:$16 sps:$4 sm:$0xff]   ;;  %v5036_v27 = vld [vmem:[%s6992_s1 + $0x80c] ss:$16 sps:$4 sm:$0xff]   ;;  %v5031_v53 = vld [vmem:[%s6992_s1 + $0xc00] ss:$16 sps:$4 sm:$0xff]  }
 0x134   :  { %2865 = vmatpush1.bf16.msra.mxu0 %v5007_v36  ;;  %3071 = vmatprep.subr.bf16.mxu1 %v5018_v39  ;;  %v5034_v54 = vld [vmem:[%s6992_s1 + $0x808] ss:$16 sps:$4 sm:$0xff]   ;;  %v5039_v10 = vld [vmem:[%s6992_s1 + $0xc24] ss:$16 sps:$4 sm:$0xff]   ;;  %v5042_v55 = vld [vmem:[%s6992_s1 + $0x82c] ss:$16 sps:$4 sm:$0xff]  }
 0x135   :  { %2866 = vmatprep.subr.bf16.mxu0 %v5015_v37  ;;  %v5037_v56 = vld [vmem:[%s6992_s1 + $0xc20] ss:$16 sps:$4 sm:$0xff]   ;;  %v5040_v57 = vld [vmem:[%s6992_s1 + $0x828] ss:$16 sps:$4 sm:$0xff]   ;;  %v5045_v58 = vld [vmem:[%s6992_s1 + $0xc44] ss:$16 sps:$4 sm:$0xff]  }
 0x136   :  { %v5314_v59 = vmov 0   ;;  %v5043_v60 = vld [vmem:[%s6992_s1 + $0xc40] ss:$16 sps:$4 sm:$0xff]   ;;  %v5046_v61 = vld [vmem:[%s6992_s1 + $0x848] ss:$16 sps:$4 sm:$0xff]   ;;  %s5316_s16 = smov [#allocation3]  }
 0x137   :  { %3072 = vmatpush1.bf16.msra.mxu1 %v5016_v41  ;;  %v5051_v62 = vld [vmem:[%s6992_s1 + $0xc64] ss:$16 sps:$4 sm:$0xff]   ;;  %v5049_v63 = vld [vmem:[%s6992_s1 + $0xc60] ss:$16 sps:$4 sm:$0xff]   ;;  %v5052_v1 = vld [vmem:[%s6992_s1 + $0x868] ss:$16 sps:$4 sm:$0xff]  }
 0x138   :  { %2867 = vmatpush1.bf16.msra.mxu0 %v5013_v40  ;;  %3073 = vmatprep.subr.bf16.mxu1 %v5024_v42  ;;  %v5057_v3 = vld [vmem:[%s6992_s1 + $0xc84] ss:$16 sps:$4 sm:$0xff]   ;;  %v5060_v4 = vld [vmem:[%s6992_s1 + $0x88c] ss:$16 sps:$4 sm:$0xff]   ;;  %v5055_v6 = vld [vmem:[%s6992_s1 + $0xc80] ss:$16 sps:$4 sm:$0xff]  }
 0x139   :  { %2868 = vmatprep.subr.bf16.mxu0 %v5021_v18  ;;  %v5058_v7 = vld [vmem:[%s6992_s1 + $0x888] ss:$16 sps:$4 sm:$0xff]   ;;  %v5063_v8 = vld [vmem:[%s6992_s1 + $0xca4] ss:$16 sps:$4 sm:$0xff]   ;;  %v5066_v9 = vld [vmem:[%s6992_s1 + $0x8ac] ss:$16 sps:$4 sm:$0xff]  }
 0x13a   :  { %v5061_v11 = vld [vmem:[%s6992_s1 + $0xca0] ss:$16 sps:$4 sm:$0xff]   ;;  %v5064_v13 = vld [vmem:[%s6992_s1 + $0x8a8] ss:$16 sps:$4 sm:$0xff]   ;;  %v5069_v14 = vld [vmem:[%s6992_s1 + $0xcc4] ss:$16 sps:$4 sm:$0xff]  }
 0x13b   :  { %3074 = vmatpush1.bf16.msra.mxu1 %v5022_v22  ;;  %v5072_v15 = vld [vmem:[%s6992_s1 + $0x8cc] ss:$16 sps:$4 sm:$0xff]   ;;  %v5067_v19 = vld [vmem:[%s6992_s1 + $0xcc0] ss:$16 sps:$4 sm:$0xff]   ;;  %v5070_v20 = vld [vmem:[%s6992_s1 + $0x8c8] ss:$16 sps:$4 sm:$0xff]  }
 0x13c   :  { %2869 = vmatpush1.bf16.msra.mxu0 %v5019_v45  ;;  %3075 = vmatprep.subr.bf16.mxu1 %v5030_v24  ;;  %v5287_v16 = vld [vmem:[%s6991_s0 + $0x8] sm:$0x1f]  ;;  %v5075_v21 = vld [vmem:[%s6992_s1 + $0xce4] ss:$16 sps:$4 sm:$0xff]   ;;  %v5073_v26 = vld [vmem:[%s6992_s1 + $0xce0] ss:$16 sps:$4 sm:$0xff]  }
 0x13d   :  { %2870 = vmatprep.subr.bf16.mxu0 %v5027_v46  ;;  %v503_v17 = vcombine.high %v5287_v16, %v5287_v16  ;;  %v5078_v23 = vld [vmem:[%s6992_s1 + $0x8ec] ss:$16 sps:$4 sm:$0xff]   ;;  %v5076_v28 = vld [vmem:[%s6992_s1 + $0x8e8] ss:$16 sps:$4 sm:$0xff]   ;;  %s3966_s0 = sshll.u32 %s5316_s16, 4  ;;  %vm3958_vm0 = vcmask 9216   ;;  %s3967_s0 = int_to_ptr.vmem [resolvable:$true] %s3966_s0 }
 0x13e   :  { %v5081_v29 = vld [vmem:[%s6992_s1 + $0x90c] ss:$16 sps:$4 sm:$0xff]   ;;  %v5079_v31 = vld [vmem:[%s6992_s1 + $0x908] ss:$16 sps:$4 sm:$0xff]   ;;  %s5289_s17 = scalar_lea.vmem %s3967_s0, 32  ;;  %p5294_p1 = scmp.lt.s32.totalorder %s3967_s0, %s3967_s0 }
 0x13f   :  { %3076 = vmatpush1.bf16.msra.mxu1 %v5028_v50  ;;  %v517_v25 = vrot.slane %v503_v17, %v5492_v49  ;;  %v5084_v32 = vld [vmem:[%s6992_s1 + $0x92c] ss:$16 sps:$4 sm:$0xff]   ;;  %v5082_v33 = vld [vmem:[%s6992_s1 + $0x928] ss:$16 sps:$4 sm:$0xff]   ;;  %p5290_p0 = scmp.ne.s32.totalorder %s3967_s0, %s5289_s17  ;;  %p5295_p2 = scmp.lt.s32.totalorder %s5289_s17, %s5289_s17 }
 0x140   :  { %2871 = vmatpush1.bf16.msra.mxu0 %v5025_v48  ;;  %3086 = vmatprep.subr.bf16.mxu1 %v5036_v27  ;;  %v5085_v12 = vld [vmem:[%s6992_s1 + $0x948] ss:$16 sps:$4 sm:$0xff]   ;;  %v5090_v35 = vld [vmem:[%s6992_s1 + $0x96c] ss:$16 sps:$4 sm:$0xff]  }
 0x141   :  { %2881 = vmatprep.subr.bf16.mxu0 %v5033_v51  ;;  %v6506_v30 = vrot.slane %v517_v25, %v5492_v49  ;;  %v5087_v49 = vld [vmem:[%s6992_s1 + $0x94c] ss:$16 sps:$4 sm:$0xff]   ;;  %v5088_v36 = vld [vmem:[%s6992_s1 + $0x968] ss:$16 sps:$4 sm:$0xff]   ;;  %p5296_p3 = por %p5295_p2, %p5294_p1 }
 0x142   :  { %3078 = vmatmul.mubr.bf16.vlgmr.msra.gmra.mrb[4].mxu1 %v5991_v34  ;;  %v5048_v34 = vld [vmem:[%s6992_s1 + $0x84c] ss:$16 sps:$4 sm:$0xff]   ;;  %v5091_v37 = vld [vmem:[%s6992_s1 + $0x988] ss:$16 sps:$4 sm:$0xff]  }
 0x143   :  { %2873 = vmatmul.mubr.bf16.vlgmr.msra.gmra.mrb[0].mxu0 %v6402_v52  ;;  %3087 = vmatpush1.bf16.msra.mxu1 %v5034_v54  ;;  %v5093_v0 = vld [vmem:[%s6992_s1 + $0x98c] ss:$16 sps:$4 sm:$0xff]   ;;  %v5094_v40 = vld [vmem:[%s6992_s1 + $0x9a8] ss:$16 sps:$4 sm:$0xff]   ;;  %p5297_p4 = pnand %p5296_p3, %p5290_p0 }
 0x144   :  { %2882 = vmatpush1.bf16.msra.mxu0 %v5031_v53  ;;  %3088 = vmatprep.subr.bf16.mxu1 %v5042_v55  ;;  %v5096_v39 = vld [vmem:[%s6992_s1 + $0x9ac] ss:$16 sps:$4 sm:$0xff]   ;;  %v5097_v18 = vld [vmem:[%s6992_s1 + $0x9c8] ss:$16 sps:$4 sm:$0xff]  }
 0x145   :  { %2883 = vmatprep.subr.bf16.mxu0 %v5039_v10  ;;  %2913 = vmatprep.mubr.bf16.mxu0 %v5314_v59  ;;  %v5099_v41 = vld [vmem:[%s6992_s1 + $0x9cc] ss:$16 sps:$4 sm:$0xff]   ;;  %v5100_v45 = vld [vmem:[%s6992_s1 + $0x9e8] ss:$16 sps:$4 sm:$0xff]  }
 0x146   :  { %3118 = vmatprep.mubr.bf16.mxu1 %v6006_v38  ;;  %v5054_v38 = vld [vmem:[%s6992_s1 + $0x86c] ss:$16 sps:$4 sm:$0xff]   ;;  %v5103_v46 = vld [vmem:[%s6992_s1 + $0xa08] ss:$16 sps:$4 sm:$0xff]  }
 0x147   :  { %3089 = vmatpush1.bf16.msra.mxu1 %v5040_v57  ;;  %v5102_v42 = vld [vmem:[%s6992_s1 + $0x9ec] ss:$16 sps:$4 sm:$0xff]   ;;  %v5106_v48 = vld [vmem:[%s6992_s1 + $0xa28] ss:$16 sps:$4 sm:$0xff]  }
 0x148   :  { %2884 = vmatpush1.bf16.msra.mxu0 %v5037_v56  ;;  %3090 = vmatprep.subr.bf16.mxu1 %v5048_v34  ;;  %v5105_v22 = vld [vmem:[%s6992_s1 + $0xa0c] ss:$16 sps:$4 sm:$0xff]   ;;  %v5109_v51 = vld [vmem:[%s6992_s1 + $0xa48] ss:$16 sps:$4 sm:$0xff]  }
 0x149   :  { %2885 = vmatprep.subr.bf16.mxu0 %v5045_v58  ;;  %v5108_v24 = vld [vmem:[%s6992_s1 + $0xa2c] ss:$16 sps:$4 sm:$0xff]   ;;  %v5115_v53 = vld [vmem:[%s6992_s1 + $0xa88] ss:$16 sps:$4 sm:$0xff]  }
 0x14a   :  { %v5111_v50 = vld [vmem:[%s6992_s1 + $0xa4c] ss:$16 sps:$4 sm:$0xff]   ;;  %v5118_v10 = vld [vmem:[%s6992_s1 + $0xaa8] ss:$16 sps:$4 sm:$0xff]  }
 0x14b   :  { %3091 = vmatpush1.bf16.msra.mxu1 %v5046_v61  ;;  %v5117_v27 = vld [vmem:[%s6992_s1 + $0xa8c] ss:$16 sps:$4 sm:$0xff]   ;;  %v5121_v56 = vld [vmem:[%s6992_s1 + $0xac8] ss:$16 sps:$4 sm:$0xff]  }
 0x14c   :  { %2886 = vmatpush1.bf16.msra.mxu0 %v5043_v60  ;;  %3092 = vmatprep.subr.bf16.mxu1 %v5054_v38  ;;  %v5120_v54 = vld [vmem:[%s6992_s1 + $0xaac] ss:$16 sps:$4 sm:$0xff]   ;;  %v5124_v58 = vld [vmem:[%s6992_s1 + $0xae8] ss:$16 sps:$4 sm:$0xff]  }
 0x14d   :  { %2887 = vmatprep.subr.bf16.mxu0 %v5051_v62  ;;  %v5123_v55 = vld [vmem:[%s6992_s1 + $0xacc] ss:$16 sps:$4 sm:$0xff]   ;;  %v5127_v60 = vld [vmem:[%s6992_s1 + $0xb08] ss:$16 sps:$4 sm:$0xff]  }
 0x14e   :  { %v5126_v57 = vld [vmem:[%s6992_s1 + $0xaec] ss:$16 sps:$4 sm:$0xff]   ;;  %v5130_v62 = vld [vmem:[%s6992_s1 + $0xb28] ss:$16 sps:$4 sm:$0xff]  }
 0x14f   :  { %3093 = vmatpush1.bf16.msra.mxu1 %v5052_v1  ;;  %v5129_v34 = vld [vmem:[%s6992_s1 + $0xb0c] ss:$16 sps:$4 sm:$0xff]  }
 0x150   :  { %2888 = vmatpush1.bf16.msra.mxu0 %v5049_v63  ;;  %3094 = vmatprep.subr.bf16.mxu1 %v5060_v4  ;;  %v5132_v61 = vld [vmem:[%s6992_s1 + $0xb2c] ss:$16 sps:$4 sm:$0xff]   ;;  %v5133_v63 = vld [vmem:[%s6992_s1 + $0xb48] ss:$16 sps:$4 sm:$0xff]  }
 0x151   :  { %2889 = vmatprep.subr.bf16.mxu0 %v5057_v3  ;;  %v5135_v38 = vld [vmem:[%s6992_s1 + $0xb4c] ss:$16 sps:$4 sm:$0xff]   ;;  %v5136_v3 = vld [vmem:[%s6992_s1 + $0xb68] ss:$16 sps:$4 sm:$0xff]  }
 0x152   :  { %v5138_v1 = vld [vmem:[%s6992_s1 + $0xb6c] ss:$16 sps:$4 sm:$0xff]  }
 0x153   :  { %3095 = vmatpush1.bf16.msra.mxu1 %v5058_v7  ;;  %v5141_v4 = vld [vmem:[%s6992_s1 + $0xb8c] ss:$16 sps:$4 sm:$0xff]  }
 0x154   :  { %2890 = vmatpush1.bf16.msra.mxu0 %v5055_v6  ;;  %3096 = vmatprep.subr.bf16.mxu1 %v5066_v9  ;;  %v5139_v6 = vld [vmem:[%s6992_s1 + $0xb88] ss:$16 sps:$4 sm:$0xff]   ;;  %v5144_v7 = vld [vmem:[%s6992_s1 + $0xbac] ss:$16 sps:$4 sm:$0xff]  }
 0x155   :  { %2891 = vmatprep.subr.bf16.mxu0 %v5063_v8  ;;  %v5142_v8 = vld [vmem:[%s6992_s1 + $0xba8] ss:$16 sps:$4 sm:$0xff]   ;;  %v5147_v9 = vld [vmem:[%s6992_s1 + $0xbcc] ss:$16 sps:$4 sm:$0xff]  }
 0x156   :  { %v5177_v16 = vld [vmem:[%s6994_s3 + $0x4] ss:$8 sps:$4 sm:$0xff]  }
 0x157   :  { %3097 = vmatpush1.bf16.msra.mxu1 %v5064_v13  ;;  %v5150_v13 = vld [vmem:[%s6992_s1 + $0xbec] ss:$16 sps:$4 sm:$0xff]  }
 0x158   :  { %2892 = vmatpush1.bf16.msra.mxu0 %v5061_v11  ;;  %3098 = vmatprep.subr.bf16.mxu1 %v5072_v15  ;;  %v5145_v11 = vld [vmem:[%s6992_s1 + $0xbc8] ss:$16 sps:$4 sm:$0xff]   ;;  %v5153_v17 = vld [vmem:[%s6992_s1 + $0xc0c] ss:$16 sps:$4 sm:$0xff]  }
 0x159   :  { %2893 = vmatprep.subr.bf16.mxu0 %v5069_v14  ;;  %v5148_v14 = vld [vmem:[%s6992_s1 + $0xbe8] ss:$16 sps:$4 sm:$0xff]   ;;  %v5183_v25 = vld [vmem:[%s6994_s3 + $0x24] ss:$8 sps:$4 sm:$0xff]  }
 0x15a   :  { %v5175_v15 = vld [vmem:[%s6994_s3] ss:$8 sps:$4 sm:$0xff]  }
 0x15b   :  { %3099 = vmatpush1.bf16.msra.mxu1 %v5070_v20  ;;  %v5178_v20 = vld [vmem:[%s6994_s3 + $0x10] ss:$8 sps:$4 sm:$0xff]  }
 0x15c   :  { %2894 = vmatpush1.bf16.msra.mxu0 %v5067_v19  ;;  %3100 = vmatprep.subr.bf16.mxu1 %v5078_v23  ;;  %v5180_v19 = vld [vmem:[%s6994_s3 + $0x14] ss:$8 sps:$4 sm:$0xff]  }
 0x15d   :  { %2895 = vmatprep.subr.bf16.mxu0 %v5075_v21  ;;  %v5151_v21 = vld [vmem:[%s6992_s1 + $0xc08] ss:$16 sps:$4 sm:$0xff]   ;;  %v5156_v23 = vld [vmem:[%s6992_s1 + $0xc2c] ss:$16 sps:$4 sm:$0xff]  }
 0x15f   :  { %3101 = vmatpush1.bf16.msra.mxu1 %v5076_v28  ;;  %v5154_v28 = vld [vmem:[%s6992_s1 + $0xc28] ss:$16 sps:$4 sm:$0xff]  }
 0x160   :  { %2896 = vmatpush1.bf16.msra.mxu0 %v5073_v26  ;;  %3102 = vmatprep.subr.bf16.mxu1 %v5081_v29  ;;  %v5181_v26 = vld [vmem:[%s6994_s3 + $0x20] ss:$8 sps:$4 sm:$0xff]   ;;  %v5186_v29 = vld [vmem:[%s6994_s3 + $0x34] ss:$8 sps:$4 sm:$0xff]  }
 0x161   :  { %3697 = vmatprep.subr.bf16.mxu0 %v5177_v16  ;;  %v5279_v16 = vld [vmem:[%s6996_s5 + $0x60] sm:$0xff]  }
 0x163   :  { %2914 = vmatmul.mubr.bf16.vlgmr.msra.gmra.mrb[0].mxu0 %v6506_v30  ;;  %3103 = vmatpush1.bf16.msra.mxu1 %v5079_v31  ;;  %v5184_v31 = vld [vmem:[%s6994_s3 + $0x30] ss:$8 sps:$4 sm:$0xff]  }
 0x164   :  { %3104 = vmatprep.subr.bf16.mxu1 %v5084_v32  ;;  %3698 = vmatpush1.bf16.msra.mxu0 %v5175_v15  ;;  %v5189_v32 = vld [vmem:[%s6994_s3 + $0x44] ss:$8 sps:$4 sm:$0xff]   ;;  %v5278_v15 = vld [vmem:[%s6996_s5 + $0x18] sm:$0xff]  }
 0x165   :  { %3699 = vmatprep.subr.bf16.mxu0 %v5180_v19  ;;  %v5281_v19 = vld [vmem:[%s6996_s5 + $0x68] sm:$0xff]  }
 0x167   :  { %3105 = vmatpush1.bf16.msra.mxu1 %v5082_v33  ;;  %v5162_v33 = vld [vmem:[%s6992_s1 + $0xc6c] ss:$16 sps:$4 sm:$0xff]  }
 0x168   :  { %3106 = vmatprep.subr.bf16.mxu1 %v5087_v49  ;;  %3700 = vmatpush1.bf16.msra.mxu0 %v5178_v20  ;;  %v5187_v49 = vld [vmem:[%s6994_s3 + $0x40] ss:$8 sps:$4 sm:$0xff]  }
 0x169   :  { %3701 = vmatprep.subr.bf16.mxu0 %v5183_v25  ;;  %v5282_v20 = vld [vmem:[%s6996_s5 + $0x28] sm:$0xff]   ;;  %v3249_v25 = vsub.s32 2, %v5474_v43 }
 0x16b   :  { %3107 = vmatpush1.bf16.msra.mxu1 %v5085_v12  ;;  %v5160_v12 = vld [vmem:[%s6992_s1 + $0xc68] ss:$16 sps:$4 sm:$0xff]  }
 0x16c   :  { %3108 = vmatprep.subr.bf16.mxu1 %v5090_v35  ;;  %3702 = vmatpush1.bf16.msra.mxu0 %v5181_v26  ;;  %v5192_v35 = vld [vmem:[%s6994_s3 + $0x54] ss:$8 sps:$4 sm:$0xff]   ;;  %v3253_v26 = vsub.s32 3, %v5474_v43 }
 0x16d   :  { %3703 = vmatprep.subr.bf16.mxu0 %v5186_v29  ;;  %v5315_v29 = vmov 1983009808  }
 0x16f   :  { %3109 = vmatpush1.bf16.msra.mxu1 %v5088_v36  ;;  %v5165_v36 = vld [vmem:[%s6992_s1 + $0xc8c] ss:$16 sps:$4 sm:$0xff]  }
 0x170   :  { %3110 = vmatprep.subr.bf16.mxu1 %v5093_v0  ;;  %3704 = vmatpush1.bf16.msra.mxu0 %v5184_v31  ;;  %v5190_v0 = vld [vmem:[%s6994_s3 + $0x50] ss:$8 sps:$4 sm:$0xff]  }
 0x171   :  { %3705 = vmatprep.subr.bf16.mxu0 %v5189_v32 }
 0x173   :  { %3111 = vmatpush1.bf16.msra.mxu1 %v5091_v37  ;;  %v5163_v37 = vld [vmem:[%s6992_s1 + $0xc88] ss:$16 sps:$4 sm:$0xff]  }
 0x174   :  { %3112 = vmatprep.subr.bf16.mxu1 %v5096_v39  ;;  %3706 = vmatpush1.bf16.msra.mxu0 %v5187_v49  ;;  %v5195_v39 = vld [vmem:[%s6994_s3 + $0x64] ss:$8 sps:$4 sm:$0xff]  }
 0x175   :  { %3707 = vmatprep.subr.bf16.mxu0 %v5192_v35 }
 0x177   :  { %3113 = vmatpush1.bf16.msra.mxu1 %v5094_v40  ;;  %v5168_v40 = vld [vmem:[%s6992_s1 + $0xcac] ss:$16 sps:$4 sm:$0xff]  }
 0x178   :  { %3114 = vmatprep.subr.bf16.mxu1 %v5099_v41  ;;  %3708 = vmatpush1.bf16.msra.mxu0 %v5190_v0  ;;  %v5193_v41 = vld [vmem:[%s6994_s3 + $0x60] ss:$8 sps:$4 sm:$0xff]  }
 0x179   :  { %3709 = vmatprep.subr.bf16.mxu0 %v5195_v39 }
 0x17b   :  { %3115 = vmatpush1.bf16.msra.mxu1 %v5097_v18  ;;  %v5166_v18 = vld [vmem:[%s6992_s1 + $0xca8] ss:$16 sps:$4 sm:$0xff]  }
 0x17c   :  { %3116 = vmatprep.subr.bf16.mxu1 %v5102_v42  ;;  %v5198_v42 = vld [vmem:[%s6994_s3 + $0x74] ss:$8 sps:$4 sm:$0xff]   ;;  %3710 = vmatpush1.bf16.msra.mxu0 %v5193_v41 }
 0x17d   :  { %3711 = vmatprep.subr.bf16.mxu0 %v5198_v42 }
 0x17f   :  { %3117 = vmatpush1.bf16.msra.mxu1 %v5100_v45  ;;  %v5171_v45 = vld [vmem:[%s6992_s1 + $0xccc] ss:$16 sps:$4 sm:$0xff]  }
 0x180   :  { %3127 = vmatprep.subr.bf16.mxu1 %v5105_v22  ;;  %v5196_v22 = vld [vmem:[%s6994_s3 + $0x70] ss:$8 sps:$4 sm:$0xff]  }
 0x181   :  { %3712 = vmatpush1.bf16.msra.mxu0 %v5196_v22 }
 0x182   :  { %3119 = vmatmul.mubr.bf16.vlgmr.msra.gmra.mrb[4].mxu1 %v6200_v44  ;;  %v5114_v44 = vld [vmem:[%s6992_s1 + $0xa6c] ss:$16 sps:$4 sm:$0xff]  }
 0x183   :  { %3128 = vmatpush1.bf16.msra.mxu1 %v5103_v46  ;;  %3159 = vmatprep.mubr.bf16.mxu1 %v6216_v47  ;;  %v5112_v47 = vld [vmem:[%s6992_s1 + $0xa68] ss:$16 sps:$4 sm:$0xff]  }
 0x184   :  { %3129 = vmatprep.subr.bf16.mxu1 %v5108_v24  ;;  %v5169_v46 = vld [vmem:[%s6992_s1 + $0xcc8] ss:$16 sps:$4 sm:$0xff]   ;;  %v5201_v24 = vld [vmem:[%s6994_s3 + $0x84] ss:$8 sps:$4 sm:$0xff]  }
 0x185   :  { %3713 = vmatprep.subr.bf16.mxu0 %v5201_v24 }
 0x187   :  { %3130 = vmatpush1.bf16.msra.mxu1 %v5106_v48  ;;  %v5174_v48 = vld [vmem:[%s6992_s1 + $0xcec] ss:$16 sps:$4 sm:$0xff]  }
 0x188   :  { %3131 = vmatprep.subr.bf16.mxu1 %v5111_v50  ;;  %v5199_v50 = vld [vmem:[%s6994_s3 + $0x80] ss:$8 sps:$4 sm:$0xff]  }
 0x189   :  { %3714 = vmatpush1.bf16.msra.mxu0 %v5199_v50 }
 0x18b   :  { %3132 = vmatpush1.bf16.msra.mxu1 %v5109_v51  ;;  %v5172_v51 = vld [vmem:[%s6992_s1 + $0xce8] ss:$16 sps:$4 sm:$0xff]  }
 0x18c   :  { %3133 = vmatprep.subr.bf16.mxu1 %v5114_v44  ;;  %v5204_v44 = vld [vmem:[%s6994_s3 + $0x94] ss:$8 sps:$4 sm:$0xff]  }
 0x18d   :  { %3715 = vmatprep.subr.bf16.mxu0 %v5204_v44 }
 0x18f   :  { %3134 = vmatpush1.bf16.msra.mxu1 %v5112_v47  ;;  %v5202_v47 = vld [vmem:[%s6994_s3 + $0x90] ss:$8 sps:$4 sm:$0xff]  }
 0x190   :  { %3135 = vmatprep.subr.bf16.mxu1 %v5117_v27  ;;  %v5207_v27 = vld [vmem:[%s6994_s3 + $0xa4] ss:$8 sps:$4 sm:$0xff]   ;;  %3716 = vmatpush1.bf16.msra.mxu0 %v5202_v47 }
 0x191   :  { %3717 = vmatprep.subr.bf16.mxu0 %v5207_v27 }
 0x193   :  { %3136 = vmatpush1.bf16.msra.mxu1 %v5115_v53  ;;  %v5205_v53 = vld [vmem:[%s6994_s3 + $0xa0] ss:$8 sps:$4 sm:$0xff]  }
 0x194   :  { %3137 = vmatprep.subr.bf16.mxu1 %v5120_v54  ;;  %v5210_v54 = vld [vmem:[%s6994_s3 + $0xb4] ss:$8 sps:$4 sm:$0xff]   ;;  %3718 = vmatpush1.bf16.msra.mxu0 %v5205_v53 }
 0x195   :  { %3719 = vmatprep.subr.bf16.mxu0 %v5210_v54  ;;  %v5223_v54 = vld [vmem:[%s6994_s3 + $0x100] ss:$8 sps:$4 sm:$0xff]  }
 0x197   :  { %3138 = vmatpush1.bf16.msra.mxu1 %v5118_v10  ;;  %v5208_v10 = vld [vmem:[%s6994_s3 + $0xb0] ss:$8 sps:$4 sm:$0xff]  }
 0x198   :  { %3139 = vmatprep.subr.bf16.mxu1 %v5123_v55  ;;  %3720 = vmatpush1.bf16.msra.mxu0 %v5208_v10 }
 0x19b   :  { %3140 = vmatpush1.bf16.msra.mxu1 %v5121_v56 }
 0x19c   :  { %3141 = vmatprep.subr.bf16.mxu1 %v5126_v57 }
 0x19f   :  { %3142 = vmatpush1.bf16.msra.mxu1 %v5124_v58  ;;  %v5211_v58 = vld [vmem:[%s6994_s3 + $0xc0] ss:$8 sps:$4 sm:$0xff]  }
 0x1a0   :  { %3143 = vmatprep.subr.bf16.mxu1 %v5129_v34 }
 0x1a3   :  { %3144 = vmatpush1.bf16.msra.mxu1 %v5127_v60 }
 0x1a4   :  { %3145 = vmatprep.subr.bf16.mxu1 %v5132_v61 }
 0x1a7   :  { %3146 = vmatpush1.bf16.msra.mxu1 %v5130_v62 }
 0x1a8   :  { %3147 = vmatprep.subr.bf16.mxu1 %v5135_v38  ;;  %v5214_v38 = vld [vmem:[%s6994_s3 + $0xd0] ss:$8 sps:$4 sm:$0xff]  }
 0x1ab   :  { %3148 = vmatpush1.bf16.msra.mxu1 %v5133_v63  ;;  %v5217_v63 = vld [vmem:[%s6994_s3 + $0xe0] ss:$8 sps:$4 sm:$0xff]  }
 0x1ac   :  { %3149 = vmatprep.subr.bf16.mxu1 %v5138_v1  ;;  %v5222_v1 = vld [vmem:[%s6994_s3 + $0xf4] ss:$8 sps:$4 sm:$0xff]  }
 0x1af   :  { %3150 = vmatpush1.bf16.msra.mxu1 %v5136_v3  ;;  %v5220_v3 = vld [vmem:[%s6994_s3 + $0xf0] ss:$8 sps:$4 sm:$0xff]  }
 0x1b0   :  { %3151 = vmatprep.subr.bf16.mxu1 %v5141_v4  ;;  %v5225_v4 = vld [vmem:[%s6994_s3 + $0x104] ss:$8 sps:$4 sm:$0xff]  }
 0x1b3   :  { %3152 = vmatpush1.bf16.msra.mxu1 %v5139_v6  ;;  %v5271_v6 = vld [vmem:[%s6996_s5 + $0x40] sm:$0xff]  }
 0x1b4   :  { %3153 = vmatprep.subr.bf16.mxu1 %v5144_v7  ;;  %v5272_v7 = vld [vmem:[%s6996_s5] sm:$0xff]  }
 0x1b7   :  { %3154 = vmatpush1.bf16.msra.mxu1 %v5142_v8  ;;  %v5273_v8 = vld [vmem:[%s6996_s5 + $0x48] sm:$0xff]  }
 0x1b8   :  { %3155 = vmatprep.subr.bf16.mxu1 %v5147_v9  ;;  %v5274_v9 = vld [vmem:[%s6996_s5 + $0x8] sm:$0xff]  }
 0x1bb   :  { %3156 = vmatpush1.bf16.msra.mxu1 %v5145_v11  ;;  %v5275_v11 = vld [vmem:[%s6996_s5 + $0x50] sm:$0xff]  }
 0x1bc   :  { %3157 = vmatprep.subr.bf16.mxu1 %v5150_v13  ;;  %v5276_v13 = vld [vmem:[%s6996_s5 + $0x10] sm:$0xff]  }
 0x1bf   :  { %3158 = vmatpush1.bf16.msra.mxu1 %v5148_v14  ;;  %v5277_v14 = vld [vmem:[%s6996_s5 + $0x58] sm:$0xff]  }
 0x1c0   :  { %3168 = vmatprep.subr.bf16.mxu1 %v5153_v17  ;;  %v5280_v17 = vld [vmem:[%s6996_s5 + $0x20] sm:$0xff]  }
 0x1c2   :  { %3160 = vmatmul.mubr.bf16.vlgmr.msra.gmra.mrb[4].mxu1 %v6402_v52  ;;  %v5159_v52 = vld [vmem:[%s6992_s1 + $0xc4c] ss:$16 sps:$4 sm:$0xff]  }
 0x1c3   :  { %3169 = vmatpush1.bf16.msra.mxu1 %v5151_v21  ;;  %3200 = vmatprep.mubr.bf16.mxu1 %v5314_v59  ;;  %v5157_v59 = vld [vmem:[%s6992_s1 + $0xc48] ss:$16 sps:$4 sm:$0xff]   ;;  %v3241_v21 = vsub.s32 0, %v5474_v43 }
 0x1c4   :  { %3170 = vmatprep.subr.bf16.mxu1 %v5156_v23  ;;  %v3245_v23 = vsub.s32 1, %v5474_v43 }
 0x1c7   :  { %3171 = vmatpush1.bf16.msra.mxu1 %v5154_v28  ;;  %v3237_v28 = vld [vmem:[%s6993_s2] sm:$0xf] }
 0x1c8   :  { %3172 = vmatprep.subr.bf16.mxu1 %v5159_v52  ;;  %v3216_v52 = vunpack.c.l.s4 %v5315_v29  ;;  %v3242_v31 = vrot.slane %v3237_v28, %v3241_v21  ;;  %v3250_v32 = vrot.slane %v3237_v28, %v3249_v25  ;;  %v5267_v25 = vld [vmem:[%s6994_s3 + $0x1e4] ss:$8 sps:$4 sm:$0xff]   ;;  %v5268_v29 = vld [vmem:[%s6994_s3 + $0x1f0] ss:$8 sps:$4 sm:$0xff]  }
 0x1ca   :  { %v3217_v49 = vunpack.c.0.s8 %v3216_v52 }
 0x1cb   :  { %3173 = vmatpush1.bf16.msra.mxu1 %v5157_v59  ;;  %v3246_v59 = vrot.slane %v3237_v28, %v3245_v23 }
 0x1cc   :  { %3174 = vmatprep.subr.bf16.mxu1 %v5162_v33  ;;  %v3254_v33 = vrot.slane %v3237_v28, %v3253_v26  ;;  %v5265_v26 = vld [vmem:[%s6994_s3 + $0x1e0] ss:$8 sps:$4 sm:$0xff]   ;;  %v5270_v28 = vld [vmem:[%s6994_s3 + $0x1f4] ss:$8 sps:$4 sm:$0xff]  }
 0x1ce   :  { %v3256_v35 = vcombine.low %v3250_v32, %v3254_v33  ;;  %v5285_v32 = vld [vmem:[%s6996_s5 + $0x78] sm:$0xff]  }
 0x1cf   :  { %3175 = vmatpush1.bf16.msra.mxu1 %v5160_v12  ;;  %v3255_v12 = vcombine.low %v3242_v31, %v3246_v59  ;;  %v5283_v31 = vld [vmem:[%s6996_s5 + $0x70] sm:$0xff]   ;;  %v5286_v33 = vld [vmem:[%s6996_s5 + $0x38] sm:$0xff]  }
 0x1d0   :  { %3176 = vmatprep.subr.bf16.mxu1 %v5165_v36  ;;  %v3220_v36 = vsub.s32 %v3217_v49, %v5474_v43  ;;  %v5284_v59 = vld [vmem:[%s6996_s5 + $0x30] sm:$0xff]   ;;  %v3365_v49 = vld [vmem:[%s6995_s4] sm:$0x3] }
 0x1d2   :  { %v3270_v39 = vrot.slane %v3256_v35, %v3220_v36  ;;  %v3374_v35 = vrot.slane %v3365_v49, %v3245_v23 }
 0x1d3   :  { %3177 = vmatpush1.bf16.msra.mxu1 %v5163_v37  ;;  %v3263_v37 = vrot.slane %v3255_v12, %v3220_v36  ;;  %v3370_v12 = vrot.slane %v3365_v49, %v3241_v21  ;;  %v4454_v21 = vld [vmem:[%s6997_s6] ss:$0 sm:$0xff] }
 0x1d4   :  { %3178 = vmatprep.subr.bf16.mxu1 %v5168_v40 }
 0x1d7   :  { %3179 = vmatpush1.bf16.msra.mxu1 %v5166_v18 }
 0x1d8   :  { %3180 = vmatprep.subr.bf16.mxu1 %v5171_v45 }
 0x1db   :  { %3181 = vmatpush1.bf16.msra.mxu1 %v5169_v46  ;;  %v3271_v46 = vcombine.low %v3263_v37, %v3270_v39 }
 0x1dc   :  { %3182 = vmatprep.subr.bf16.mxu1 %v5174_v48 }
 0x1df   :  { %3183 = vmatpush1.bf16.msra.mxu1 %v5172_v51 }
 0x1e0   :  { %4471 = vmatprep.subr.bf16.mxu1 %v5271_v6  ;;  %v5249_v6 = vld [vmem:[%s6994_s3 + $0x184] ss:$8 sps:$4 sm:$0xff]  }
 0x1e2   :  { %3201 = vmatmul.mubr.bf16.vlgmr.msra.gmra.mrb[4].mxu1 %v6506_v30  ;;  %v5213_v30 = vld [vmem:[%s6994_s3 + $0xc4] ss:$8 sps:$4 sm:$0xff]  }
 0x1e3   :  { %3721 = vmatprep.subr.bf16.mxu0 %v5213_v30  ;;  %4472 = vmatpush3.bf16.msra.mxu1 %v5272_v7  ;;  %v5228_v30 = vld [vmem:[%s6994_s3 + $0x114] ss:$8 sps:$4 sm:$0xff]   ;;  %v5247_v7 = vld [vmem:[%s6994_s3 + $0x180] ss:$8 sps:$4 sm:$0xff]  }
 0x1e4   :  { %3722 = vmatpush1.bf16.msra.mxu0 %v5211_v58  ;;  %4473 = vmatprep.subr.bf16.mxu1 %v5273_v8  ;;  %v5231_v58 = vld [vmem:[%s6994_s3 + $0x124] ss:$8 sps:$4 sm:$0xff]   ;;  %v5252_v8 = vld [vmem:[%s6994_s3 + $0x194] ss:$8 sps:$4 sm:$0xff]  }
 0x1e7   :  { %4474 = vmatpush3.bf16.msra.mxu1 %v5274_v9  ;;  %v5250_v9 = vld [vmem:[%s6994_s3 + $0x190] ss:$8 sps:$4 sm:$0xff]  }
 0x1e8   :  { %4475 = vmatprep.subr.bf16.mxu1 %v5275_v11  ;;  %v5255_v11 = vld [vmem:[%s6994_s3 + $0x1a4] ss:$8 sps:$4 sm:$0xff]  }
 0x1eb   :  { %4476 = vmatpush3.bf16.msra.mxu1 %v5276_v13  ;;  %v5253_v13 = vld [vmem:[%s6994_s3 + $0x1a0] ss:$8 sps:$4 sm:$0xff]  }
 0x1ec   :  { %4477 = vmatprep.subr.bf16.mxu1 %v5277_v14  ;;  %v5258_v14 = vld [vmem:[%s6994_s3 + $0x1b4] ss:$8 sps:$4 sm:$0xff]  }
 0x1ef   :  { %4478 = vmatpush3.bf16.msra.mxu1 %v5278_v15  ;;  %v5256_v15 = vld [vmem:[%s6994_s3 + $0x1b0] ss:$8 sps:$4 sm:$0xff]  }
 0x1f0   :  { %4479 = vmatprep.subr.bf16.mxu1 %v5279_v16  ;;  %v5261_v16 = vld [vmem:[%s6994_s3 + $0x1c4] ss:$8 sps:$4 sm:$0xff]  }
 0x1f3   :  { %4480 = vmatpush3.bf16.msra.mxu1 %v5280_v17  ;;  %v5259_v17 = vld [vmem:[%s6994_s3 + $0x1c0] ss:$8 sps:$4 sm:$0xff]  }
 0x1f4   :  { %4481 = vmatprep.subr.bf16.mxu1 %v5281_v19  ;;  %v5264_v19 = vld [vmem:[%s6994_s3 + $0x1d4] ss:$8 sps:$4 sm:$0xff]  }
 0x1f7   :  { %4482 = vmatpush3.bf16.msra.mxu1 %v5282_v20  ;;  %v5262_v20 = vld [vmem:[%s6994_s3 + $0x1d0] ss:$8 sps:$4 sm:$0xff]  }
 0x1f8   :  { %4483 = vmatprep.subr.bf16.mxu1 %v5283_v31 }
 0x1fb   :  { %4484 = vmatpush3.bf16.msra.mxu1 %v5284_v59 }
 0x1fc   :  { %4485 = vmatprep.subr.bf16.mxu1 %v5285_v32 }
 0x1ff   :  { %4486 = vmatpush3.bf16.msra.mxu1 %v5286_v33 }
 0x236   :  { %v2915_v55 = vpop.f32.mrb[0].mxu0 }
 0x237   :  { %v6779_v56 = vadd.f32 %v2915_v55, %v6276_v2  ;;  %v2917_v57 = vpop.f32.mrb[1].mxu0  ;;  %v5216_v2 = vld [vmem:[%s6994_s3 + $0xd4] ss:$8 sps:$4 sm:$0xff]  }
 0x238   :  { %v6785_v34 = vadd.f32 %v2917_v57, %v6284_v5  ;;  %v2919_v60 = vpop.f32.mrb[2].mxu0  ;;  %3723 = vmatprep.subr.bf16.mxu0 %v5216_v2  ;;  %v5219_v5 = vld [vmem:[%s6994_s3 + $0xe4] ss:$8 sps:$4 sm:$0xff]   ;;  %v5226_v57 = vld [vmem:[%s6994_s3 + $0x110] ss:$8 sps:$4 sm:$0xff]  }
 0x239   :  { %v2920_v61 = vpop.f32.mrb[3].mxu0  ;;  %3724 = vmatpush1.bf16.msra.mxu0 %v5214_v38  ;;  %v5234_v60 = vld [vmem:[%s6994_s3 + $0x134] ss:$8 sps:$4 sm:$0xff]   ;;  %v5235_v2 = vld [vmem:[%s6994_s3 + $0x140] ss:$8 sps:$4 sm:$0xff]  }
 0x23a   :  { %v3213_v62 = vcombine.low %v6779_v56, %v6785_v34  ;;  %3725 = vmatprep.subr.bf16.mxu0 %v5219_v5  ;;  %v5229_v34 = vld [vmem:[%s6994_s3 + $0x120] ss:$8 sps:$4 sm:$0xff]   ;;  %v5232_v61 = vld [vmem:[%s6994_s3 + $0x130] ss:$8 sps:$4 sm:$0xff]   ;;  %v5240_v38 = vld [vmem:[%s6994_s3 + $0x154] ss:$8 sps:$4 sm:$0xff]  }
 0x23b   :  { %v5238_v5 = vld [vmem:[%s6994_s3 + $0x150] ss:$8 sps:$4 sm:$0xff]  }
 0x23c   :  { %v3221_v45 = vrot.slane %v3213_v62, %v3220_v36  ;;  %v5237_v62 = vld [vmem:[%s6994_s3 + $0x144] ss:$8 sps:$4 sm:$0xff]  }
 0x23d   :  { %3726 = vmatpush1.bf16.msra.mxu0 %v5217_v63  ;;  %v5243_v63 = vld [vmem:[%s6994_s3 + $0x164] ss:$8 sps:$4 sm:$0xff]  }
 0x23e   :  { %3727 = vmatprep.subr.bf16.mxu0 %v5222_v1  ;;  %v5241_v1 = vld [vmem:[%s6994_s3 + $0x160] ss:$8 sps:$4 sm:$0xff]  }
 0x241   :  { %3728 = vmatpush1.bf16.msra.mxu0 %v5220_v3  ;;  %v5246_v3 = vld [vmem:[%s6994_s3 + $0x174] ss:$8 sps:$4 sm:$0xff]  }
 0x242   :  { %3738 = vmatprep.subr.bf16.mxu0 %v5225_v4  ;;  %v5244_v4 = vld [vmem:[%s6994_s3 + $0x170] ss:$8 sps:$4 sm:$0xff]  }
 0x2b5   :  { %v3202_v0 = vpop.f32.mrb[4].mxu1 }
 0x2b6   :  { %v3204_v40 = vpop.f32.mrb[5].mxu1 }
 0x2b7   :  { %v3214_v41 = vcombine.low %v3202_v0, %v3204_v40  ;;  %v3206_v18 = vpop.f32.mrb[6].mxu1 }
 0x2b8   :  { %v3207_v42 = vpop.f32.mrb[7].mxu1 }
 0x2b9   :  { %v3228_v22 = vrot.slane %v3214_v41, %v3220_v36 }
 0x2bb   :  { %v3229_v24 = vcombine.low %v3221_v45, %v3228_v22 }
 0x2bd   :  { %v3273_v48 = vadd.f32 %v3271_v46, %v3229_v24 }
 0x2bf   :  { %v3274_v50 = vmax.f32 %v3273_v48, 0.0 }
 0x2c1   :  { %v3283_v51 = vrot.slane %v3274_v50, %v3220_v36  ;;  %v3276_v44 = vcombine.high %v3274_v50, %v3274_v50 }
 0x2c3   :  { %v3291_v47 = vcombine.high %v3283_v51, %v3283_v51  ;;  %v6858_v27 = vrot.slane %v3276_v44, %v3220_v36  ;;  %v3297_v55 = vpack.c.bf16 %v3283_v51, %v3283_v51 }
 0x2c5   :  { %v3298_v53 = vpack.c.bf16 %v3291_v47, %v3291_v47  ;;  %v3292_v10 = vcombine.high %v6858_v27, %v6858_v27  ;;  %v3299_v52 = vpack.c.bf16 %v6858_v27, %v6858_v27 }
 0x2c7   :  { %3729 = vmatprep.mubr.bf16.mxu0 %v3298_v53  ;;  %v3300_v56 = vpack.c.bf16 %v3292_v10, %v3292_v10 }
 0x2c8   :  { %3730 = vmatmul.mubr.bf16.vlgmr.msra.gmra.mrb[4].mxu0 %v3297_v55 }
 0x2c9   :  { %3739 = vmatpush1.bf16.msra.mxu0 %v5223_v54  ;;  %3770 = vmatprep.mubr.bf16.mxu0 %v3300_v56 }
 0x2ca   :  { %3740 = vmatprep.subr.bf16.mxu0 %v5228_v30 }
 0x2cd   :  { %3741 = vmatpush1.bf16.msra.mxu0 %v5226_v57 }
 0x2ce   :  { %3742 = vmatprep.subr.bf16.mxu0 %v5231_v58 }
 0x2d1   :  { %3743 = vmatpush1.bf16.msra.mxu0 %v5229_v34 }
 0x2d2   :  { %3744 = vmatprep.subr.bf16.mxu0 %v5234_v60 }
 0x2d5   :  { %3745 = vmatpush1.bf16.msra.mxu0 %v5232_v61 }
 0x2d6   :  { %3746 = vmatprep.subr.bf16.mxu0 %v5237_v62 }
 0x2d9   :  { %3747 = vmatpush1.bf16.msra.mxu0 %v5235_v2 }
 0x2da   :  { %3748 = vmatprep.subr.bf16.mxu0 %v5240_v38 }
 0x2dd   :  { %3749 = vmatpush1.bf16.msra.mxu0 %v5238_v5 }
 0x2de   :  { %3750 = vmatprep.subr.bf16.mxu0 %v5243_v63 }
 0x2e1   :  { %3751 = vmatpush1.bf16.msra.mxu0 %v5241_v1 }
 0x2e2   :  { %3752 = vmatprep.subr.bf16.mxu0 %v5246_v3 }
 0x2e5   :  { %3753 = vmatpush1.bf16.msra.mxu0 %v5244_v4 }
 0x2e6   :  { %3754 = vmatprep.subr.bf16.mxu0 %v5249_v6 }
 0x2e9   :  { %3755 = vmatpush1.bf16.msra.mxu0 %v5247_v7 }
 0x2ea   :  { %3756 = vmatprep.subr.bf16.mxu0 %v5252_v8 }
 0x2ed   :  { %3757 = vmatpush1.bf16.msra.mxu0 %v5250_v9 }
 0x2ee   :  { %3758 = vmatprep.subr.bf16.mxu0 %v5255_v11 }
 0x2f1   :  { %3759 = vmatpush1.bf16.msra.mxu0 %v5253_v13 }
 0x2f2   :  { %3760 = vmatprep.subr.bf16.mxu0 %v5258_v14 }
 0x2f5   :  { %3761 = vmatpush1.bf16.msra.mxu0 %v5256_v15 }
 0x2f6   :  { %3762 = vmatprep.subr.bf16.mxu0 %v5261_v16 }
 0x2f9   :  { %3763 = vmatpush1.bf16.msra.mxu0 %v5259_v17 }
 0x2fa   :  { %3764 = vmatprep.subr.bf16.mxu0 %v5264_v19 }
 0x2fd   :  { %3765 = vmatpush1.bf16.msra.mxu0 %v5262_v20 }
 0x2fe   :  { %3766 = vmatprep.subr.bf16.mxu0 %v5267_v25 }
 0x301   :  { %3767 = vmatpush1.bf16.msra.mxu0 %v5265_v26 }
 0x302   :  { %3768 = vmatprep.subr.bf16.mxu0 %v5270_v28 }
 0x305   :  { %3769 = vmatpush1.bf16.msra.mxu0 %v5268_v29 }
 0x308   :  { %3771 = vmatmul.mubr.bf16.vlgmr.msra.gmra.mrb[4].mxu0 %v3299_v52 }
 0x3db   :  { %v3772_v36 = vpop.f32.mrb[4].mxu0 }
 0x3dc   :  { %v4495_v0 = vadd.f32 %v3772_v36, %v3370_v12  ;;  %v3774_v37 = vpop.f32.mrb[5].mxu0 }
 0x3dd   :  { %v4496_v39 = vadd.f32 %v3774_v37, %v3374_v35  ;;  %v3776_v40 = vpop.f32.mrb[6].mxu0 }
 0x3de   :  { %v3779_v41 = vmax.f32 %v4495_v0, 0.0  ;;  %v3777_v18 = vpop.f32.mrb[7].mxu0 }
 0x3df   :  { %v3780_v42 = vmax.f32 %v4496_v39, 0.0 }
 0x3e0   :  { %v3781_v22 = vpack.c.bf16 %v3779_v41, %v3779_v41 }
 0x3e1   :  { %v3782_v45 = vpack.c.bf16 %v3780_v42, %v3780_v42 }
 0x3e3   :  { %3950 = vmatprep.mubr.bf16.mxu1 %v3782_v45 }
 0x3e4   :  { %3951 = vmatmul.mubr.bf16.vlgmr.msra.gmra.mrb[8].mxu1 %v3781_v22 }
 0x4b7   :  { %v4487_v46 = vpop.f32.mrb[8].mxu1 }
 0x4b8   :  { %v4488_v24 = vpop.f32.mrb[9].mxu1 }
 0x4b9   :  { %v4489_v43 = vadd.f32 %v4488_v24, %v4487_v46  ;;  %v4490_v23 = vpop.f32.mrb[10].mxu1 }
 0x4ba   :  { %v4491_v48 = vpop.f32.mrb[11].mxu1 }
 0x4bb   :  { %v3953_v50 = vadd.f32 %v4489_v43, %v4454_v21 }
 0x4bd   :  { %3959 = vst.msk [vmem:[#allocation3] sm:$0x3] %vm3958_vm0, %v3953_v50 }
 0x4be   :  { %5300 = shalt.err (!%p5297_p4)
}
 0x4bf   :  { %s5301_s6 = scalar_lea.hbm %s6998_s7, 32 }
 0x4c0   :  { %p5302_p5 = scmp.ne.s32.totalorder %s6998_s7, %s5301_s6  ;;  %p5305_p6 = scmp.lt.u32.totalorder %s5301_s6, %s6998_s7 }
 0x4c2   :  { %p5307_p7 = pnand %p5305_p6, %p5302_p5 }
 0x4c4   :  { %5310 = shalt.err (!%p5307_p7)
}
 0x4c5   :  { %3969 = dma.vmem_to_hbm [thread:$0]  %s3967_s0, 32, %s6998_s7, [#allocation4]  }
 0x4c6   :  { %5311 = dma.done.wait [#allocation4], 32  }
 0x4c7   :  { %5312 = vsyncadd [#allocation4], 4294967264 }
 0x4c8   :  { %3973 = vsyncpa [#allocation4], 1 }

</bundles_post_ra>
